<compile_context>
chip_gen: v6e
topology: v6e:2x2x1
jax: 0.10.0
libtpu: 0.0.40
codegen_flags: <defaults>
</compile_context>

<pallas_src>
import functools

import jax
import jax.numpy as jnp
from jax.experimental import pallas as pl
from jax.experimental.pallas import tpu as pltpu

# ----------------------------------------------------------------------------
# Small, module-consistent config
# ----------------------------------------------------------------------------
BATCH = 2
SEQ_LEN = 8
INPUT_DIM = 16            # input_feature_dim
HIDDEN = 32               # hidden_size
NUM_LAYERS = 2            # num_layers
NUM_HEADS = 4             # mhsa_heads
EMBED = 2 * HIDDEN        # bidirectional -> embed_dim_audio = 64
EPS = 1e-5

VMEM_SPEC = pl.BlockSpec(memory_space=pltpu.MemorySpace.VMEM)


# ----------------------------------------------------------------------------
# In-kernel helper: one bidirectional LSTM layer (trace-time Python, unrolled)
# ----------------------------------------------------------------------------
def _bilstm_layer(x_flat, wih, whh_blk, bias, y_ref, B, T, H):
    """One Bi-LSTM layer, fully VMEM-resident, streaming output into a scratch.

    x_flat:  (B*T, Din)  flattened input sequence (batch-major)
    wih:     (Din, 8H)   gate-interleaved [i_f i_b f_f f_b g_f g_b o_f o_b]
    whh_blk: (2H, 8H)    block-diagonal (rows: [h_f | h_b]), same column order
    bias:    (1, 8H)     gate-interleaved (b_ih + b_hh folded per direction)
    y_ref:   (B, T, 2H)  VMEM scratch; written as [fwd | bwd] per timestep
    """
    H2 = 2 * H
    G = 8 * H

    # Hoisted input projection: ONE 2-D matmul covers both directions & steps.
    gx = jnp.dot(x_flat, wih, preferred_element_type=jnp.float32) + bias
    gx = gx.reshape(B, T, G)                                        # (B,T,8H)

    # Lane mask selecting the backward half of every 2H-wide gate block.
    lane = jax.lax.broadcasted_iota(jnp.int32, (1, G), 1)
    bwd_mask = (lane % H2) >= H                                     # (1, 8H)

    h = jnp.zeros((B, H2), jnp.float32)     # [h_f | h_b]
    c = jnp.zeros((B, H2), jnp.float32)     # [c_f | c_b]

    # Fully-unrolled time loop: one MXU push, one sigmoid pass, one g-tanh and
    # one c-tanh per step; no concats/relayouts on the serial chain.
    for t in range(T):
        hh = jnp.dot(h, whh_blk, preferred_element_type=jnp.float32)   # (B,8H)
        g_fwd = gx[:, t, :]                                             # static
        g_bwd = gx[:, T - 1 - t, :]                                     # static
        gates = jnp.where(bwd_mask, g_bwd, g_fwd) + hh                  # (B,8H)

        sig = jax.nn.sigmoid(gates)
        i_g = sig[:, 0 * H2:1 * H2]
        f_g = sig[:, 1 * H2:2 * H2]
        o_g = sig[:, 3 * H2:4 * H2]
        g_g = jnp.tanh(gates[:, 2 * H2:3 * H2])

        c = f_g * c + i_g * g_g
        h = o_g * jnp.tanh(c)

        # Stream directly into the scratch (PyTorch bidirectional layout).
        y_ref[:, t, 0:H] = h[:, 0:H]                  # forward hidden @ time t
        y_ref[:, T - 1 - t, H:H2] = h[:, H:H2]        # backward hidden @ T-1-t


# ----------------------------------------------------------------------------
# Single fused kernel: BiLSTM x2 -> MHSA -> residual -> LayerNorm
# ----------------------------------------------------------------------------
def audio_encoder_kernel(x_ref,
                         wih0_ref, whh0_ref, b0_ref,
                         wih1_ref, whh1_ref, b1_ref,
                         wq_ref, wk_ref, wv_ref,
                         bq_ref, bk_ref, bv_ref,
                         wo_ref, bo_ref, gamma_ref, beta_ref,
                         out_ref, y0_ref, y1_ref, *, num_heads):
    B, T, D = x_ref.shape
    H = whh0_ref.shape[0] // 2
    E = 2 * H
    hd = E // num_heads
    BT = B * T

    # ---- 2-layer bidirectional LSTM (streamed into VMEM scratch) -----------
    _bilstm_layer(x_ref[...].reshape(BT, D),
                  wih0_ref[...], whh0_ref[...], b0_ref[...], y0_ref, B, T, H)
    _bilstm_layer(y0_ref[...].reshape(BT, E),
                  wih1_ref[...], whh1_ref[...], b1_ref[...], y1_ref, B, T, H)

    y2 = y1_ref[...].reshape(BT, E)                                 # (B*T, E)

    # ---- multi-head self-attention (heads batched on the leading axis) -----
    # 1/sqrt(hd) is already folded into wq/bq by the wrapper.
    q = jnp.dot(y2, wq_ref[...], preferred_element_type=jnp.float32) + bq_ref[...]
    k = jnp.dot(y2, wk_ref[...], preferred_element_type=jnp.float32) + bk_ref[...]
    v = jnp.dot(y2, wv_ref[...], preferred_element_type=jnp.float32) + bv_ref[...]

    q3 = q.reshape(B, T, E)
    k3 = k.reshape(B, T, E)
    v3 = v.reshape(B, T, E)

    # Stack heads on the leading axis: (num_heads*B, T, hd).
    qh = jnp.concatenate([q3[:, :, h * hd:(h + 1) * hd] for h in range(num_heads)], axis=0)
    kh = jnp.concatenate([k3[:, :, h * hd:(h + 1) * hd] for h in range(num_heads)], axis=0)
    vh = jnp.concatenate([v3[:, :, h * hd:(h + 1) * hd] for h in range(num_heads)], axis=0)

    s = jnp.einsum('gqd,gkd->gqk', qh, kh,
                   preferred_element_type=jnp.float32)              # (nh*B,T,T)
    m = jnp.max(s, axis=-1, keepdims=True)
    e = jnp.exp(s - m)
    p = e * pl.reciprocal(jnp.sum(e, axis=-1, keepdims=True), approx=True)
    ctx = jnp.einsum('gqk,gkd->gqd', p, vh,
                     preferred_element_type=jnp.float32)            # (nh*B,T,hd)

    # Recombine heads (one lane concat) and apply W_o as ONE matmul.
    ctx2 = jnp.concatenate([ctx[h * B:(h + 1) * B] for h in range(num_heads)],
                           axis=-1).reshape(BT, E)                  # (B*T, E)
    attn = jnp.dot(ctx2, wo_ref[...],
                   preferred_element_type=jnp.float32) + bo_ref[...]

    # ---- residual + LayerNorm (single-pass statistics) ----------------------
    r = y2 + attn
    inv_e = 1.0 / E
    mean = jnp.sum(r, axis=-1, keepdims=True) * inv_e
    var = jnp.sum(r * r, axis=-1, keepdims=True) * inv_e - mean * mean
    out = (r - mean) * jax.lax.rsqrt(var + EPS) * gamma_ref[...] + beta_ref[...]
    out_ref[...] = out.reshape(B, T, E)


# ----------------------------------------------------------------------------
# Wrapper: pack LSTM weights (gate-interleaved, block-diag W_hh), fold the
# attention scale into wq/bq, one fused pallas_call.
# ----------------------------------------------------------------------------
def _pack_ih(wf, wb, H):
    """Columns [i_f i_b f_f f_b g_f g_b o_f o_b], each H wide. Works for bias too."""
    blocks = []
    for g in range(4):
        blocks.append(wf[:, g * H:(g + 1) * H])
        blocks.append(wb[:, g * H:(g + 1) * H])
    return jnp.concatenate(blocks, axis=1)


def _pack_hh(wf, wb, H):
    """Block-diagonal (2H, 8H): rows [h_f | h_b], columns gate-interleaved."""
    z = jnp.zeros((H, H), wf.dtype)
    cols = []
    for g in range(4):
        cols.append(jnp.concatenate([wf[:, g * H:(g + 1) * H], z], axis=0))
        cols.append(jnp.concatenate([z, wb[:, g * H:(g + 1) * H]], axis=0))
    return jnp.concatenate(cols, axis=1)


@jax.jit
def audio_encoder_forward(audio_btd, params):
    B, T, _ = audio_btd.shape
    hd = EMBED // NUM_HEADS
    scale = float(hd) ** -0.5

    packed = []
    for layer in params['lstm']:
        packed += [
            _pack_ih(layer['wih_f'], layer['wih_b'], HIDDEN),   # (Din, 8H)
            _pack_hh(layer['whh_f'], layer['whh_b'], HIDDEN),   # (2H, 8H)
            _pack_ih(layer['b_f'], layer['b_b'], HIDDEN),       # (1, 8H)
        ]

    kernel = functools.partial(audio_encoder_kernel, num_heads=NUM_HEADS)
    return pl.pallas_call(
        kernel,
        out_shape=jax.ShapeDtypeStruct((B, T, EMBED), jnp.float32),
        in_specs=[VMEM_SPEC] * 17,
        out_specs=VMEM_SPEC,
        scratch_shapes=[pltpu.VMEM((B, T, EMBED), jnp.float32),   # layer-0 out
                        pltpu.VMEM((B, T, EMBED), jnp.float32)],  # layer-1 out
    )(audio_btd, *packed,
      params['wq'] * scale, params['wk'], params['wv'],
      params['bq'] * scale, params['bk'], params['bv'],
      params['wo'], params['bo'], params['gamma'], params['beta'])


# ----------------------------------------------------------------------------
# Deterministic synthetic parameters (module-faithful layout)
# ----------------------------------------------------------------------------
def init_params(key):
    keys = iter(jax.random.split(key, 64))

    def w(shape, scale=0.1):
        return (scale * jax.random.normal(next(keys), shape)).astype(jnp.float32)

    params = {}
    lstm_layers = []
    for in_dim in (INPUT_DIM, EMBED):                    # layer 0, layer 1 inputs
        layer = {}
        for d in ('f', 'b'):                             # forward / backward dirs
            layer['wih_' + d] = w((in_dim, 4 * HIDDEN))
            layer['whh_' + d] = w((HIDDEN, 4 * HIDDEN))
            layer['b_' + d] = w((1, 4 * HIDDEN))         # b_ih + b_hh folded
        lstm_layers.append(layer)
    params['lstm'] = lstm_layers

    for name in ('wq', 'wk', 'wv', 'wo'):
        params[name] = w((EMBED, EMBED))
    for name in ('bq', 'bk', 'bv', 'bo'):
        params[name] = w((1, EMBED))
    params['gamma'] = 1.0 + w((1, EMBED))
    params['beta'] = w((1, EMBED))
    return params


# ----------------------------------------------------------------------------
# Pure-JAX reference (same math) for a sanity check
# ----------------------------------------------------------------------------
def _ref_lstm_dir(x_tbd, wih, whh, b, reverse):
    _, B, _ = x_tbd.shape
    H = whh.shape[0]

    def step(carry, x_t):
        h, c = carry
        gates = x_t @ wih + h @ whh + b
        i = jax.nn.sigmoid(gates[:, 0 * H:1 * H])
        f = jax.nn.sigmoid(gates[:, 1 * H:2 * H])
        g = jnp.tanh(gates[:, 2 * H:3 * H])
        o = jax.nn.sigmoid(gates[:, 3 * H:4 * H])
        c = f * c + i * g
        h = o * jnp.tanh(c)
        return (h, c), h

    init = (jnp.zeros((B, H), jnp.float32), jnp.zeros((B, H), jnp.float32))
    xs = x_tbd[::-1] if reverse else x_tbd
    _, hs = jax.lax.scan(step, init, xs)
    return hs[::-1] if reverse else hs


def reference_forward(audio_btd, params):
    x = jnp.transpose(audio_btd, (1, 0, 2))
    for layer in params['lstm']:
        hf = _ref_lstm_dir(x, layer['wih_f'], layer['whh_f'], layer['b_f'], False)
        hb = _ref_lstm_dir(x, layer['wih_b'], layer['whh_b'], layer['b_b'], True)
        x = jnp.concatenate([hf, hb], axis=-1)
    y = jnp.transpose(x, (1, 0, 2))                      # (B, T, E)

    hd = EMBED // NUM_HEADS
    scale = float(hd) ** -0.5
    q = y @ params['wq'] + params['bq']
    k = y @ params['wk'] + params['bk']
    v = y @ params['wv'] + params['bv']
    ctx = []
    for h in range(NUM_HEADS):
        sl = slice(h * hd, (h + 1) * hd)
        s = jnp.einsum('btd,bsd->bts', q[:, :, sl] * scale, k[:, :, sl])
        p = jax.nn.softmax(s, axis=-1)
        ctx.append(jnp.einsum('bts,bsd->btd', p, v[:, :, sl]))
    attn = jnp.concatenate(ctx, axis=-1) @ params['wo'] + params['bo']
    xres = y + attn
    mean = jnp.mean(xres, axis=-1, keepdims=True)
    var = jnp.mean((xres - mean) ** 2, axis=-1, keepdims=True)
    return ((xres - mean) * jax.lax.rsqrt(var + EPS)
            * params['gamma'] + params['beta'])


# ----------------------------------------------------------------------------
if __name__ == "__main__":
    key = jax.random.PRNGKey(0)
    k_param, k_input = jax.random.split(key)
    params = init_params(k_param)
    audio = jax.random.normal(k_input, (BATCH, SEQ_LEN, INPUT_DIM),
                              dtype=jnp.float32)

    out = jax.block_until_ready(audio_encoder_forward(audio, params))
    ref = jax.block_until_ready(reference_forward(audio, params))

    assert out.shape == (BATCH, SEQ_LEN, EMBED), out.shape
    assert jnp.allclose(out, ref, atol=2e-2, rtol=2e-2), (
        float(jnp.max(jnp.abs(out - ref))))

    print("KERNEL_OK")
</pallas_src>

<mosaic_0001>
module attributes {stable_mosaic.version = 11 : i64} {
  func.func @audio_encoder_kernel(%arg0: memref<2x8x16xf32, #tpu.memory_space<vmem>>, %arg1: memref<16x256xf32, #tpu.memory_space<vmem>>, %arg2: memref<64x256xf32, #tpu.memory_space<vmem>>, %arg3: memref<1x256xf32, #tpu.memory_space<vmem>>, %arg4: memref<64x256xf32, #tpu.memory_space<vmem>>, %arg5: memref<64x256xf32, #tpu.memory_space<vmem>>, %arg6: memref<1x256xf32, #tpu.memory_space<vmem>>, %arg7: memref<64x64xf32, #tpu.memory_space<vmem>>, %arg8: memref<64x64xf32, #tpu.memory_space<vmem>>, %arg9: memref<64x64xf32, #tpu.memory_space<vmem>>, %arg10: memref<1x64xf32, #tpu.memory_space<vmem>>, %arg11: memref<1x64xf32, #tpu.memory_space<vmem>>, %arg12: memref<1x64xf32, #tpu.memory_space<vmem>>, %arg13: memref<64x64xf32, #tpu.memory_space<vmem>>, %arg14: memref<1x64xf32, #tpu.memory_space<vmem>>, %arg15: memref<1x64xf32, #tpu.memory_space<vmem>>, %arg16: memref<1x64xf32, #tpu.memory_space<vmem>>, %arg17: memref<2x8x64xf32, #tpu.memory_space<vmem>>, %arg18: memref<2x8x64xf32, #tpu.memory_space<vmem>>, %arg19: memref<2x8x64xf32, #tpu.memory_space<vmem>>) attributes {dimension_semantics = [], scalar_prefetch = 0 : i64, scratch_operands = 2 : i64, tpu.core_type = #tpu.core_type<tc>} {
    %c0 = arith.constant 0 : index
    %c0_0 = arith.constant 0 : index
    %c0_1 = arith.constant 0 : index
    %0 = vector.load %arg0[%c0, %c0_0, %c0_1] : memref<2x8x16xf32, #tpu.memory_space<vmem>>, vector<2x8x16xf32>
    %1 = vector.shape_cast %0 : vector<2x8x16xf32> to vector<16x16xf32>
    %c0_2 = arith.constant 0 : index
    %c0_3 = arith.constant 0 : index
    %2 = vector.load %arg1[%c0_2, %c0_3] : memref<16x256xf32, #tpu.memory_space<vmem>>, vector<16x256xf32>
    %c0_4 = arith.constant 0 : index
    %c0_5 = arith.constant 0 : index
    %3 = vector.load %arg2[%c0_4, %c0_5] : memref<64x256xf32, #tpu.memory_space<vmem>>, vector<64x256xf32>
    %c0_6 = arith.constant 0 : index
    %c0_7 = arith.constant 0 : index
    %4 = vector.load %arg3[%c0_6, %c0_7] : memref<1x256xf32, #tpu.memory_space<vmem>>, vector<1x256xf32>
    %cst = arith.constant dense<0.000000e+00> : vector<16x256xf32>
    %5 = tpu.matmul %1, %2, %cst {dimension_numbers = #tpu.dot_dimension_numbers<[1], [0], [0], [1], [0, 0, 1, 1], [], []>} : vector<16x16xf32>, vector<16x256xf32>, vector<16x256xf32> -> vector<16x256xf32>
    %6 = vector.broadcast %4 : vector<1x256xf32> to vector<16x256xf32>
    %7 = arith.addf %5, %6 : vector<16x256xf32>
    %8 = vector.shape_cast %7 : vector<16x256xf32> to vector<2x8x256xf32>
    %9 = tpu.iota {dimensions = array<i32: 1>} : vector<1x256xi32>
    %c64_i32 = arith.constant 64 : i32
    %c0_i32 = arith.constant 0 : i32
    %10 = arith.cmpi eq, %c64_i32, %c0_i32 : i32
    %c1_i32 = arith.constant 1 : i32
    %11 = arith.select %10, %c1_i32, %c64_i32 : i32
    %12 = vector.broadcast %11 : i32 to vector<1x256xi32>
    %13 = arith.remsi %9, %12 : vector<1x256xi32>
    %c0_i32_8 = arith.constant 0 : i32
    %14 = vector.broadcast %c0_i32_8 : i32 to vector<1x256xi32>
    %15 = arith.cmpi ne, %13, %14 : vector<1x256xi32>
    %c0_i32_9 = arith.constant 0 : i32
    %16 = vector.broadcast %c0_i32_9 : i32 to vector<1x256xi32>
    %17 = arith.cmpi slt, %13, %16 : vector<1x256xi32>
    %c0_i32_10 = arith.constant 0 : i32
    %18 = arith.cmpi slt, %11, %c0_i32_10 : i32
    %19 = vector.broadcast %18 : i1 to vector<1x256xi1>
    %20 = vector.broadcast %19 : vector<1x256xi1> to vector<1x256xi1>
    %21 = arith.xori %17, %20 : vector<1x256xi1>
    %22 = arith.andi %21, %15 : vector<1x256xi1>
    %23 = vector.broadcast %11 : i32 to vector<1x256xi32>
    %24 = arith.addi %13, %23 : vector<1x256xi32>
    %25 = arith.select %22, %24, %13 : vector<1x256xi1>, vector<1x256xi32>
    %c32_i32 = arith.constant 32 : i32
    %26 = vector.broadcast %c32_i32 : i32 to vector<1x256xi32>
    %27 = arith.cmpi sge, %25, %26 : vector<1x256xi32>
    %cst_11 = arith.constant 0.000000e+00 : f32
    %28 = vector.broadcast %cst_11 : f32 to vector<2x64xf32>
    %cst_12 = arith.constant 0.000000e+00 : f32
    %29 = vector.broadcast %cst_12 : f32 to vector<2x64xf32>
    %cst_13 = arith.constant dense<0.000000e+00> : vector<2x256xf32>
    %30 = tpu.matmul %28, %3, %cst_13 {dimension_numbers = #tpu.dot_dimension_numbers<[1], [0], [0], [1], [0, 0, 1, 1], [], []>} : vector<2x64xf32>, vector<64x256xf32>, vector<2x256xf32> -> vector<2x256xf32>
    %31 = vector.extract_strided_slice %8 {offsets = [0, 0, 0], sizes = [2, 1, 256], strides = [1, 1, 1]} : vector<2x8x256xf32> to vector<2x1x256xf32>
    %32 = vector.shape_cast %31 : vector<2x1x256xf32> to vector<2x256xf32>
    %33 = vector.extract_strided_slice %8 {offsets = [0, 7, 0], sizes = [2, 1, 256], strides = [1, 1, 1]} : vector<2x8x256xf32> to vector<2x1x256xf32>
    %34 = vector.shape_cast %33 : vector<2x1x256xf32> to vector<2x256xf32>
    %35 = vector.shape_cast %27 : vector<1x256xi1> to vector<1x256xi1>
    %36 = vector.broadcast %35 : vector<1x256xi1> to vector<2x256xi1>
    %37 = arith.select %36, %34, %32 : vector<2x256xi1>, vector<2x256xf32>
    %38 = arith.addf %37, %30 : vector<2x256xf32>
    %39 = arith.negf %38 : vector<2x256xf32>
    %40 = math.exp %39 : vector<2x256xf32>
    %cst_14 = arith.constant 1.000000e+00 : f32
    %41 = vector.broadcast %cst_14 : f32 to vector<2x256xf32>
    %42 = arith.addf %41, %40 : vector<2x256xf32>
    %43 = arith.divf %41, %42 : vector<2x256xf32>
    %44 = vector.extract_strided_slice %43 {offsets = [0, 0], sizes = [2, 64], strides = [1, 1]} : vector<2x256xf32> to vector<2x64xf32>
    %45 = vector.extract_strided_slice %43 {offsets = [0, 64], sizes = [2, 64], strides = [1, 1]} : vector<2x256xf32> to vector<2x64xf32>
    %46 = vector.extract_strided_slice %43 {offsets = [0, 192], sizes = [2, 64], strides = [1, 1]} : vector<2x256xf32> to vector<2x64xf32>
    %47 = vector.extract_strided_slice %38 {offsets = [0, 128], sizes = [2, 64], strides = [1, 1]} : vector<2x256xf32> to vector<2x64xf32>
    %48 = math.tanh %47 : vector<2x64xf32>
    %49 = arith.mulf %45, %29 : vector<2x64xf32>
    %50 = arith.mulf %44, %48 : vector<2x64xf32>
    %51 = arith.addf %49, %50 : vector<2x64xf32>
    %52 = math.tanh %51 : vector<2x64xf32>
    %53 = arith.mulf %46, %52 : vector<2x64xf32>
    %54 = vector.extract_strided_slice %53 {offsets = [0, 0], sizes = [2, 32], strides = [1, 1]} : vector<2x64xf32> to vector<2x32xf32>
    %c0_15 = arith.constant 0 : index
    %c0_16 = arith.constant 0 : index
    %c0_17 = arith.constant 0 : index
    %55 = vector.load %arg18[%c0_15, %c0_16, %c0_17] : memref<2x8x64xf32, #tpu.memory_space<vmem>>, vector<2x1x32xf32>
    %56 = vector.shape_cast %55 : vector<2x1x32xf32> to vector<2x32xf32>
    %57 = vector.shape_cast %54 : vector<2x32xf32> to vector<2x1x32xf32>
    tpu.vector_store %arg18[%c0_15, %c0_16, %c0_17], %57 {strides = array<i32>} : memref<2x8x64xf32, #tpu.memory_space<vmem>>, vector<2x1x32xf32>,
    %58 = vector.extract_strided_slice %53 {offsets = [0, 32], sizes = [2, 32], strides = [1, 1]} : vector<2x64xf32> to vector<2x32xf32>
    %c0_18 = arith.constant 0 : index
    %c7 = arith.constant 7 : index
    %c32 = arith.constant 32 : index
    %59 = vector.load %arg18[%c0_18, %c7, %c32] : memref<2x8x64xf32, #tpu.memory_space<vmem>>, vector<2x1x32xf32>
    %60 = vector.shape_cast %59 : vector<2x1x32xf32> to vector<2x32xf32>
    %61 = vector.shape_cast %58 : vector<2x32xf32> to vector<2x1x32xf32>
    tpu.vector_store %arg18[%c0_18, %c7, %c32], %61 {strides = array<i32>} : memref<2x8x64xf32, #tpu.memory_space<vmem>>, vector<2x1x32xf32>,
    %cst_19 = arith.constant dense<0.000000e+00> : vector<2x256xf32>
    %62 = tpu.matmul %53, %3, %cst_19 {dimension_numbers = #tpu.dot_dimension_numbers<[1], [0], [0], [1], [0, 0, 1, 1], [], []>} : vector<2x64xf32>, vector<64x256xf32>, vector<2x256xf32> -> vector<2x256xf32>
    %63 = vector.extract_strided_slice %8 {offsets = [0, 1, 0], sizes = [2, 1, 256], strides = [1, 1, 1]} : vector<2x8x256xf32> to vector<2x1x256xf32>
    %64 = vector.shape_cast %63 : vector<2x1x256xf32> to vector<2x256xf32>
    %65 = vector.extract_strided_slice %8 {offsets = [0, 6, 0], sizes = [2, 1, 256], strides = [1, 1, 1]} : vector<2x8x256xf32> to vector<2x1x256xf32>
    %66 = vector.shape_cast %65 : vector<2x1x256xf32> to vector<2x256xf32>
    %67 = vector.shape_cast %27 : vector<1x256xi1> to vector<1x256xi1>
    %68 = vector.broadcast %67 : vector<1x256xi1> to vector<2x256xi1>
    %69 = arith.select %68, %66, %64 : vector<2x256xi1>, vector<2x256xf32>
    %70 = arith.addf %69, %62 : vector<2x256xf32>
    %71 = arith.negf %70 : vector<2x256xf32>
    %72 = math.exp %71 : vector<2x256xf32>
    %cst_20 = arith.constant 1.000000e+00 : f32
    %73 = vector.broadcast %cst_20 : f32 to vector<2x256xf32>
    %74 = arith.addf %73, %72 : vector<2x256xf32>
    %75 = arith.divf %73, %74 : vector<2x256xf32>
    %76 = vector.extract_strided_slice %75 {offsets = [0, 0], sizes = [2, 64], strides = [1, 1]} : vector<2x256xf32> to vector<2x64xf32>
    %77 = vector.extract_strided_slice %75 {offsets = [0, 64], sizes = [2, 64], strides = [1, 1]} : vector<2x256xf32> to vector<2x64xf32>
    %78 = vector.extract_strided_slice %75 {offsets = [0, 192], sizes = [2, 64], strides = [1, 1]} : vector<2x256xf32> to vector<2x64xf32>
    %79 = vector.extract_strided_slice %70 {offsets = [0, 128], sizes = [2, 64], strides = [1, 1]} : vector<2x256xf32> to vector<2x64xf32>
    %80 = math.tanh %79 : vector<2x64xf32>
    %81 = arith.mulf %77, %51 : vector<2x64xf32>
    %82 = arith.mulf %76, %80 : vector<2x64xf32>
    %83 = arith.addf %81, %82 : vector<2x64xf32>
    %84 = math.tanh %83 : vector<2x64xf32>
    %85 = arith.mulf %78, %84 : vector<2x64xf32>
    %86 = vector.extract_strided_slice %85 {offsets = [0, 0], sizes = [2, 32], strides = [1, 1]} : vector<2x64xf32> to vector<2x32xf32>
    %c0_21 = arith.constant 0 : index
    %c1 = arith.constant 1 : index
    %c0_22 = arith.constant 0 : index
    %87 = vector.load %arg18[%c0_21, %c1, %c0_22] : memref<2x8x64xf32, #tpu.memory_space<vmem>>, vector<2x1x32xf32>
    %88 = vector.shape_cast %87 : vector<2x1x32xf32> to vector<2x32xf32>
    %89 = vector.shape_cast %86 : vector<2x32xf32> to vector<2x1x32xf32>
    tpu.vector_store %arg18[%c0_21, %c1, %c0_22], %89 {strides = array<i32>} : memref<2x8x64xf32, #tpu.memory_space<vmem>>, vector<2x1x32xf32>,
    %90 = vector.extract_strided_slice %85 {offsets = [0, 32], sizes = [2, 32], strides = [1, 1]} : vector<2x64xf32> to vector<2x32xf32>
    %c0_23 = arith.constant 0 : index
    %c6 = arith.constant 6 : index
    %c32_24 = arith.constant 32 : index
    %91 = vector.load %arg18[%c0_23, %c6, %c32_24] : memref<2x8x64xf32, #tpu.memory_space<vmem>>, vector<2x1x32xf32>
    %92 = vector.shape_cast %91 : vector<2x1x32xf32> to vector<2x32xf32>
    %93 = vector.shape_cast %90 : vector<2x32xf32> to vector<2x1x32xf32>
    tpu.vector_store %arg18[%c0_23, %c6, %c32_24], %93 {strides = array<i32>} : memref<2x8x64xf32, #tpu.memory_space<vmem>>, vector<2x1x32xf32>,
    %cst_25 = arith.constant dense<0.000000e+00> : vector<2x256xf32>
    %94 = tpu.matmul %85, %3, %cst_25 {dimension_numbers = #tpu.dot_dimension_numbers<[1], [0], [0], [1], [0, 0, 1, 1], [], []>} : vector<2x64xf32>, vector<64x256xf32>, vector<2x256xf32> -> vector<2x256xf32>
    %95 = vector.extract_strided_slice %8 {offsets = [0, 2, 0], sizes = [2, 1, 256], strides = [1, 1, 1]} : vector<2x8x256xf32> to vector<2x1x256xf32>
    %96 = vector.shape_cast %95 : vector<2x1x256xf32> to vector<2x256xf32>
    %97 = vector.extract_strided_slice %8 {offsets = [0, 5, 0], sizes = [2, 1, 256], strides = [1, 1, 1]} : vector<2x8x256xf32> to vector<2x1x256xf32>
    %98 = vector.shape_cast %97 : vector<2x1x256xf32> to vector<2x256xf32>
    %99 = vector.shape_cast %27 : vector<1x256xi1> to vector<1x256xi1>
    %100 = vector.broadcast %99 : vector<1x256xi1> to vector<2x256xi1>
    %101 = arith.select %100, %98, %96 : vector<2x256xi1>, vector<2x256xf32>
    %102 = arith.addf %101, %94 : vector<2x256xf32>
    %103 = arith.negf %102 : vector<2x256xf32>
    %104 = math.exp %103 : vector<2x256xf32>
    %cst_26 = arith.constant 1.000000e+00 : f32
    %105 = vector.broadcast %cst_26 : f32 to vector<2x256xf32>
    %106 = arith.addf %105, %104 : vector<2x256xf32>
    %107 = arith.divf %105, %106 : vector<2x256xf32>
    %108 = vector.extract_strided_slice %107 {offsets = [0, 0], sizes = [2, 64], strides = [1, 1]} : vector<2x256xf32> to vector<2x64xf32>
    %109 = vector.extract_strided_slice %107 {offsets = [0, 64], sizes = [2, 64], strides = [1, 1]} : vector<2x256xf32> to vector<2x64xf32>
    %110 = vector.extract_strided_slice %107 {offsets = [0, 192], sizes = [2, 64], strides = [1, 1]} : vector<2x256xf32> to vector<2x64xf32>
    %111 = vector.extract_strided_slice %102 {offsets = [0, 128], sizes = [2, 64], strides = [1, 1]} : vector<2x256xf32> to vector<2x64xf32>
    %112 = math.tanh %111 : vector<2x64xf32>
    %113 = arith.mulf %109, %83 : vector<2x64xf32>
    %114 = arith.mulf %108, %112 : vector<2x64xf32>
    %115 = arith.addf %113, %114 : vector<2x64xf32>
    %116 = math.tanh %115 : vector<2x64xf32>
    %117 = arith.mulf %110, %116 : vector<2x64xf32>
    %118 = vector.extract_strided_slice %117 {offsets = [0, 0], sizes = [2, 32], strides = [1, 1]} : vector<2x64xf32> to vector<2x32xf32>
    %c0_27 = arith.constant 0 : index
    %c2 = arith.constant 2 : index
    %c0_28 = arith.constant 0 : index
    %119 = vector.load %arg18[%c0_27, %c2, %c0_28] : memref<2x8x64xf32, #tpu.memory_space<vmem>>, vector<2x1x32xf32>
    %120 = vector.shape_cast %119 : vector<2x1x32xf32> to vector<2x32xf32>
    %121 = vector.shape_cast %118 : vector<2x32xf32> to vector<2x1x32xf32>
    tpu.vector_store %arg18[%c0_27, %c2, %c0_28], %121 {strides = array<i32>} : memref<2x8x64xf32, #tpu.memory_space<vmem>>, vector<2x1x32xf32>,
    %122 = vector.extract_strided_slice %117 {offsets = [0, 32], sizes = [2, 32], strides = [1, 1]} : vector<2x64xf32> to vector<2x32xf32>
    %c0_29 = arith.constant 0 : index
    %c5 = arith.constant 5 : index
    %c32_30 = arith.constant 32 : index
    %123 = vector.load %arg18[%c0_29, %c5, %c32_30] : memref<2x8x64xf32, #tpu.memory_space<vmem>>, vector<2x1x32xf32>
    %124 = vector.shape_cast %123 : vector<2x1x32xf32> to vector<2x32xf32>
    %125 = vector.shape_cast %122 : vector<2x32xf32> to vector<2x1x32xf32>
    tpu.vector_store %arg18[%c0_29, %c5, %c32_30], %125 {strides = array<i32>} : memref<2x8x64xf32, #tpu.memory_space<vmem>>, vector<2x1x32xf32>,
    %cst_31 = arith.constant dense<0.000000e+00> : vector<2x256xf32>
    %126 = tpu.matmul %117, %3, %cst_31 {dimension_numbers = #tpu.dot_dimension_numbers<[1], [0], [0], [1], [0, 0, 1, 1], [], []>} : vector<2x64xf32>, vector<64x256xf32>, vector<2x256xf32> -> vector<2x256xf32>
    %127 = vector.extract_strided_slice %8 {offsets = [0, 3, 0], sizes = [2, 1, 256], strides = [1, 1, 1]} : vector<2x8x256xf32> to vector<2x1x256xf32>
    %128 = vector.shape_cast %127 : vector<2x1x256xf32> to vector<2x256xf32>
    %129 = vector.extract_strided_slice %8 {offsets = [0, 4, 0], sizes = [2, 1, 256], strides = [1, 1, 1]} : vector<2x8x256xf32> to vector<2x1x256xf32>
    %130 = vector.shape_cast %129 : vector<2x1x256xf32> to vector<2x256xf32>
    %131 = vector.shape_cast %27 : vector<1x256xi1> to vector<1x256xi1>
    %132 = vector.broadcast %131 : vector<1x256xi1> to vector<2x256xi1>
    %133 = arith.select %132, %130, %128 : vector<2x256xi1>, vector<2x256xf32>
    %134 = arith.addf %133, %126 : vector<2x256xf32>
    %135 = arith.negf %134 : vector<2x256xf32>
    %136 = math.exp %135 : vector<2x256xf32>
    %cst_32 = arith.constant 1.000000e+00 : f32
    %137 = vector.broadcast %cst_32 : f32 to vector<2x256xf32>
    %138 = arith.addf %137, %136 : vector<2x256xf32>
    %139 = arith.divf %137, %138 : vector<2x256xf32>
    %140 = vector.extract_strided_slice %139 {offsets = [0, 0], sizes = [2, 64], strides = [1, 1]} : vector<2x256xf32> to vector<2x64xf32>
    %141 = vector.extract_strided_slice %139 {offsets = [0, 64], sizes = [2, 64], strides = [1, 1]} : vector<2x256xf32> to vector<2x64xf32>
    %142 = vector.extract_strided_slice %139 {offsets = [0, 192], sizes = [2, 64], strides = [1, 1]} : vector<2x256xf32> to vector<2x64xf32>
    %143 = vector.extract_strided_slice %134 {offsets = [0, 128], sizes = [2, 64], strides = [1, 1]} : vector<2x256xf32> to vector<2x64xf32>
    %144 = math.tanh %143 : vector<2x64xf32>
    %145 = arith.mulf %141, %115 : vector<2x64xf32>
    %146 = arith.mulf %140, %144 : vector<2x64xf32>
    %147 = arith.addf %145, %146 : vector<2x64xf32>
    %148 = math.tanh %147 : vector<2x64xf32>
    %149 = arith.mulf %142, %148 : vector<2x64xf32>
    %150 = vector.extract_strided_slice %149 {offsets = [0, 0], sizes = [2, 32], strides = [1, 1]} : vector<2x64xf32> to vector<2x32xf32>
    %c0_33 = arith.constant 0 : index
    %c3 = arith.constant 3 : index
    %c0_34 = arith.constant 0 : index
    %151 = vector.load %arg18[%c0_33, %c3, %c0_34] : memref<2x8x64xf32, #tpu.memory_space<vmem>>, vector<2x1x32xf32>
    %152 = vector.shape_cast %151 : vector<2x1x32xf32> to vector<2x32xf32>
    %153 = vector.shape_cast %150 : vector<2x32xf32> to vector<2x1x32xf32>
    tpu.vector_store %arg18[%c0_33, %c3, %c0_34], %153 {strides = array<i32>} : memref<2x8x64xf32, #tpu.memory_space<vmem>>, vector<2x1x32xf32>,
    %154 = vector.extract_strided_slice %149 {offsets = [0, 32], sizes = [2, 32], strides = [1, 1]} : vector<2x64xf32> to vector<2x32xf32>
    %c0_35 = arith.constant 0 : index
    %c4 = arith.constant 4 : index
    %c32_36 = arith.constant 32 : index
    %155 = vector.load %arg18[%c0_35, %c4, %c32_36] : memref<2x8x64xf32, #tpu.memory_space<vmem>>, vector<2x1x32xf32>
    %156 = vector.shape_cast %155 : vector<2x1x32xf32> to vector<2x32xf32>
    %157 = vector.shape_cast %154 : vector<2x32xf32> to vector<2x1x32xf32>
    tpu.vector_store %arg18[%c0_35, %c4, %c32_36], %157 {strides = array<i32>} : memref<2x8x64xf32, #tpu.memory_space<vmem>>, vector<2x1x32xf32>,
    %cst_37 = arith.constant dense<0.000000e+00> : vector<2x256xf32>
    %158 = tpu.matmul %149, %3, %cst_37 {dimension_numbers = #tpu.dot_dimension_numbers<[1], [0], [0], [1], [0, 0, 1, 1], [], []>} : vector<2x64xf32>, vector<64x256xf32>, vector<2x256xf32> -> vector<2x256xf32>
    %159 = vector.extract_strided_slice %8 {offsets = [0, 4, 0], sizes = [2, 1, 256], strides = [1, 1, 1]} : vector<2x8x256xf32> to vector<2x1x256xf32>
    %160 = vector.shape_cast %159 : vector<2x1x256xf32> to vector<2x256xf32>
    %161 = vector.extract_strided_slice %8 {offsets = [0, 3, 0], sizes = [2, 1, 256], strides = [1, 1, 1]} : vector<2x8x256xf32> to vector<2x1x256xf32>
    %162 = vector.shape_cast %161 : vector<2x1x256xf32> to vector<2x256xf32>
    %163 = vector.shape_cast %27 : vector<1x256xi1> to vector<1x256xi1>
    %164 = vector.broadcast %163 : vector<1x256xi1> to vector<2x256xi1>
    %165 = arith.select %164, %162, %160 : vector<2x256xi1>, vector<2x256xf32>
    %166 = arith.addf %165, %158 : vector<2x256xf32>
    %167 = arith.negf %166 : vector<2x256xf32>
    %168 = math.exp %167 : vector<2x256xf32>
    %cst_38 = arith.constant 1.000000e+00 : f32
    %169 = vector.broadcast %cst_38 : f32 to vector<2x256xf32>
    %170 = arith.addf %169, %168 : vector<2x256xf32>
    %171 = arith.divf %169, %170 : vector<2x256xf32>
    %172 = vector.extract_strided_slice %171 {offsets = [0, 0], sizes = [2, 64], strides = [1, 1]} : vector<2x256xf32> to vector<2x64xf32>
    %173 = vector.extract_strided_slice %171 {offsets = [0, 64], sizes = [2, 64], strides = [1, 1]} : vector<2x256xf32> to vector<2x64xf32>
    %174 = vector.extract_strided_slice %171 {offsets = [0, 192], sizes = [2, 64], strides = [1, 1]} : vector<2x256xf32> to vector<2x64xf32>
    %175 = vector.extract_strided_slice %166 {offsets = [0, 128], sizes = [2, 64], strides = [1, 1]} : vector<2x256xf32> to vector<2x64xf32>
    %176 = math.tanh %175 : vector<2x64xf32>
    %177 = arith.mulf %173, %147 : vector<2x64xf32>
    %178 = arith.mulf %172, %176 : vector<2x64xf32>
    %179 = arith.addf %177, %178 : vector<2x64xf32>
    %180 = math.tanh %179 : vector<2x64xf32>
    %181 = arith.mulf %174, %180 : vector<2x64xf32>
    %182 = vector.extract_strided_slice %181 {offsets = [0, 0], sizes = [2, 32], strides = [1, 1]} : vector<2x64xf32> to vector<2x32xf32>
    %c0_39 = arith.constant 0 : index
    %c4_40 = arith.constant 4 : index
    %c0_41 = arith.constant 0 : index
    %183 = vector.load %arg18[%c0_39, %c4_40, %c0_41] : memref<2x8x64xf32, #tpu.memory_space<vmem>>, vector<2x1x32xf32>
    %184 = vector.shape_cast %183 : vector<2x1x32xf32> to vector<2x32xf32>
    %185 = vector.shape_cast %182 : vector<2x32xf32> to vector<2x1x32xf32>
    tpu.vector_store %arg18[%c0_39, %c4_40, %c0_41], %185 {strides = array<i32>} : memref<2x8x64xf32, #tpu.memory_space<vmem>>, vector<2x1x32xf32>,
    %186 = vector.extract_strided_slice %181 {offsets = [0, 32], sizes = [2, 32], strides = [1, 1]} : vector<2x64xf32> to vector<2x32xf32>
    %c0_42 = arith.constant 0 : index
    %c3_43 = arith.constant 3 : index
    %c32_44 = arith.constant 32 : index
    %187 = vector.load %arg18[%c0_42, %c3_43, %c32_44] : memref<2x8x64xf32, #tpu.memory_space<vmem>>, vector<2x1x32xf32>
    %188 = vector.shape_cast %187 : vector<2x1x32xf32> to vector<2x32xf32>
    %189 = vector.shape_cast %186 : vector<2x32xf32> to vector<2x1x32xf32>
    tpu.vector_store %arg18[%c0_42, %c3_43, %c32_44], %189 {strides = array<i32>} : memref<2x8x64xf32, #tpu.memory_space<vmem>>, vector<2x1x32xf32>,
    %cst_45 = arith.constant dense<0.000000e+00> : vector<2x256xf32>
    %190 = tpu.matmul %181, %3, %cst_45 {dimension_numbers = #tpu.dot_dimension_numbers<[1], [0], [0], [1], [0, 0, 1, 1], [], []>} : vector<2x64xf32>, vector<64x256xf32>, vector<2x256xf32> -> vector<2x256xf32>
    %191 = vector.extract_strided_slice %8 {offsets = [0, 5, 0], sizes = [2, 1, 256], strides = [1, 1, 1]} : vector<2x8x256xf32> to vector<2x1x256xf32>
    %192 = vector.shape_cast %191 : vector<2x1x256xf32> to vector<2x256xf32>
    %193 = vector.extract_strided_slice %8 {offsets = [0, 2, 0], sizes = [2, 1, 256], strides = [1, 1, 1]} : vector<2x8x256xf32> to vector<2x1x256xf32>
    %194 = vector.shape_cast %193 : vector<2x1x256xf32> to vector<2x256xf32>
    %195 = vector.shape_cast %27 : vector<1x256xi1> to vector<1x256xi1>
    %196 = vector.broadcast %195 : vector<1x256xi1> to vector<2x256xi1>
    %197 = arith.select %196, %194, %192 : vector<2x256xi1>, vector<2x256xf32>
    %198 = arith.addf %197, %190 : vector<2x256xf32>
    %199 = arith.negf %198 : vector<2x256xf32>
    %200 = math.exp %199 : vector<2x256xf32>
    %cst_46 = arith.constant 1.000000e+00 : f32
    %201 = vector.broadcast %cst_46 : f32 to vector<2x256xf32>
    %202 = arith.addf %201, %200 : vector<2x256xf32>
    %203 = arith.divf %201, %202 : vector<2x256xf32>
    %204 = vector.extract_strided_slice %203 {offsets = [0, 0], sizes = [2, 64], strides = [1, 1]} : vector<2x256xf32> to vector<2x64xf32>
    %205 = vector.extract_strided_slice %203 {offsets = [0, 64], sizes = [2, 64], strides = [1, 1]} : vector<2x256xf32> to vector<2x64xf32>
    %206 = vector.extract_strided_slice %203 {offsets = [0, 192], sizes = [2, 64], strides = [1, 1]} : vector<2x256xf32> to vector<2x64xf32>
    %207 = vector.extract_strided_slice %198 {offsets = [0, 128], sizes = [2, 64], strides = [1, 1]} : vector<2x256xf32> to vector<2x64xf32>
    %208 = math.tanh %207 : vector<2x64xf32>
    %209 = arith.mulf %205, %179 : vector<2x64xf32>
    %210 = arith.mulf %204, %208 : vector<2x64xf32>
    %211 = arith.addf %209, %210 : vector<2x64xf32>
    %212 = math.tanh %211 : vector<2x64xf32>
    %213 = arith.mulf %206, %212 : vector<2x64xf32>
    %214 = vector.extract_strided_slice %213 {offsets = [0, 0], sizes = [2, 32], strides = [1, 1]} : vector<2x64xf32> to vector<2x32xf32>
    %c0_47 = arith.constant 0 : index
    %c5_48 = arith.constant 5 : index
    %c0_49 = arith.constant 0 : index
    %215 = vector.load %arg18[%c0_47, %c5_48, %c0_49] : memref<2x8x64xf32, #tpu.memory_space<vmem>>, vector<2x1x32xf32>
    %216 = vector.shape_cast %215 : vector<2x1x32xf32> to vector<2x32xf32>
    %217 = vector.shape_cast %214 : vector<2x32xf32> to vector<2x1x32xf32>
    tpu.vector_store %arg18[%c0_47, %c5_48, %c0_49], %217 {strides = array<i32>} : memref<2x8x64xf32, #tpu.memory_space<vmem>>, vector<2x1x32xf32>,
    %218 = vector.extract_strided_slice %213 {offsets = [0, 32], sizes = [2, 32], strides = [1, 1]} : vector<2x64xf32> to vector<2x32xf32>
    %c0_50 = arith.constant 0 : index
    %c2_51 = arith.constant 2 : index
    %c32_52 = arith.constant 32 : index
    %219 = vector.load %arg18[%c0_50, %c2_51, %c32_52] : memref<2x8x64xf32, #tpu.memory_space<vmem>>, vector<2x1x32xf32>
    %220 = vector.shape_cast %219 : vector<2x1x32xf32> to vector<2x32xf32>
    %221 = vector.shape_cast %218 : vector<2x32xf32> to vector<2x1x32xf32>
    tpu.vector_store %arg18[%c0_50, %c2_51, %c32_52], %221 {strides = array<i32>} : memref<2x8x64xf32, #tpu.memory_space<vmem>>, vector<2x1x32xf32>,
    %cst_53 = arith.constant dense<0.000000e+00> : vector<2x256xf32>
    %222 = tpu.matmul %213, %3, %cst_53 {dimension_numbers = #tpu.dot_dimension_numbers<[1], [0], [0], [1], [0, 0, 1, 1], [], []>} : vector<2x64xf32>, vector<64x256xf32>, vector<2x256xf32> -> vector<2x256xf32>
    %223 = vector.extract_strided_slice %8 {offsets = [0, 6, 0], sizes = [2, 1, 256], strides = [1, 1, 1]} : vector<2x8x256xf32> to vector<2x1x256xf32>
    %224 = vector.shape_cast %223 : vector<2x1x256xf32> to vector<2x256xf32>
    %225 = vector.extract_strided_slice %8 {offsets = [0, 1, 0], sizes = [2, 1, 256], strides = [1, 1, 1]} : vector<2x8x256xf32> to vector<2x1x256xf32>
    %226 = vector.shape_cast %225 : vector<2x1x256xf32> to vector<2x256xf32>
    %227 = vector.shape_cast %27 : vector<1x256xi1> to vector<1x256xi1>
    %228 = vector.broadcast %227 : vector<1x256xi1> to vector<2x256xi1>
    %229 = arith.select %228, %226, %224 : vector<2x256xi1>, vector<2x256xf32>
    %230 = arith.addf %229, %222 : vector<2x256xf32>
    %231 = arith.negf %230 : vector<2x256xf32>
    %232 = math.exp %231 : vector<2x256xf32>
    %cst_54 = arith.constant 1.000000e+00 : f32
    %233 = vector.broadcast %cst_54 : f32 to vector<2x256xf32>
    %234 = arith.addf %233, %232 : vector<2x256xf32>
    %235 = arith.divf %233, %234 : vector<2x256xf32>
    %236 = vector.extract_strided_slice %235 {offsets = [0, 0], sizes = [2, 64], strides = [1, 1]} : vector<2x256xf32> to vector<2x64xf32>
    %237 = vector.extract_strided_slice %235 {offsets = [0, 64], sizes = [2, 64], strides = [1, 1]} : vector<2x256xf32> to vector<2x64xf32>
    %238 = vector.extract_strided_slice %235 {offsets = [0, 192], sizes = [2, 64], strides = [1, 1]} : vector<2x256xf32> to vector<2x64xf32>
    %239 = vector.extract_strided_slice %230 {offsets = [0, 128], sizes = [2, 64], strides = [1, 1]} : vector<2x256xf32> to vector<2x64xf32>
    %240 = math.tanh %239 : vector<2x64xf32>
    %241 = arith.mulf %237, %211 : vector<2x64xf32>
    %242 = arith.mulf %236, %240 : vector<2x64xf32>
    %243 = arith.addf %241, %242 : vector<2x64xf32>
    %244 = math.tanh %243 : vector<2x64xf32>
    %245 = arith.mulf %238, %244 : vector<2x64xf32>
    %246 = vector.extract_strided_slice %245 {offsets = [0, 0], sizes = [2, 32], strides = [1, 1]} : vector<2x64xf32> to vector<2x32xf32>
    %c0_55 = arith.constant 0 : index
    %c6_56 = arith.constant 6 : index
    %c0_57 = arith.constant 0 : index
    %247 = vector.load %arg18[%c0_55, %c6_56, %c0_57] : memref<2x8x64xf32, #tpu.memory_space<vmem>>, vector<2x1x32xf32>
    %248 = vector.shape_cast %247 : vector<2x1x32xf32> to vector<2x32xf32>
    %249 = vector.shape_cast %246 : vector<2x32xf32> to vector<2x1x32xf32>
    tpu.vector_store %arg18[%c0_55, %c6_56, %c0_57], %249 {strides = array<i32>} : memref<2x8x64xf32, #tpu.memory_space<vmem>>, vector<2x1x32xf32>,
    %250 = vector.extract_strided_slice %245 {offsets = [0, 32], sizes = [2, 32], strides = [1, 1]} : vector<2x64xf32> to vector<2x32xf32>
    %c0_58 = arith.constant 0 : index
    %c1_59 = arith.constant 1 : index
    %c32_60 = arith.constant 32 : index
    %251 = vector.load %arg18[%c0_58, %c1_59, %c32_60] : memref<2x8x64xf32, #tpu.memory_space<vmem>>, vector<2x1x32xf32>
    %252 = vector.shape_cast %251 : vector<2x1x32xf32> to vector<2x32xf32>
    %253 = vector.shape_cast %250 : vector<2x32xf32> to vector<2x1x32xf32>
    tpu.vector_store %arg18[%c0_58, %c1_59, %c32_60], %253 {strides = array<i32>} : memref<2x8x64xf32, #tpu.memory_space<vmem>>, vector<2x1x32xf32>,
    %cst_61 = arith.constant dense<0.000000e+00> : vector<2x256xf32>
    %254 = tpu.matmul %245, %3, %cst_61 {dimension_numbers = #tpu.dot_dimension_numbers<[1], [0], [0], [1], [0, 0, 1, 1], [], []>} : vector<2x64xf32>, vector<64x256xf32>, vector<2x256xf32> -> vector<2x256xf32>
    %255 = vector.extract_strided_slice %8 {offsets = [0, 7, 0], sizes = [2, 1, 256], strides = [1, 1, 1]} : vector<2x8x256xf32> to vector<2x1x256xf32>
    %256 = vector.shape_cast %255 : vector<2x1x256xf32> to vector<2x256xf32>
    %257 = vector.extract_strided_slice %8 {offsets = [0, 0, 0], sizes = [2, 1, 256], strides = [1, 1, 1]} : vector<2x8x256xf32> to vector<2x1x256xf32>
    %258 = vector.shape_cast %257 : vector<2x1x256xf32> to vector<2x256xf32>
    %259 = vector.shape_cast %27 : vector<1x256xi1> to vector<1x256xi1>
    %260 = vector.broadcast %259 : vector<1x256xi1> to vector<2x256xi1>
    %261 = arith.select %260, %258, %256 : vector<2x256xi1>, vector<2x256xf32>
    %262 = arith.addf %261, %254 : vector<2x256xf32>
    %263 = arith.negf %262 : vector<2x256xf32>
    %264 = math.exp %263 : vector<2x256xf32>
    %cst_62 = arith.constant 1.000000e+00 : f32
    %265 = vector.broadcast %cst_62 : f32 to vector<2x256xf32>
    %266 = arith.addf %265, %264 : vector<2x256xf32>
    %267 = arith.divf %265, %266 : vector<2x256xf32>
    %268 = vector.extract_strided_slice %267 {offsets = [0, 0], sizes = [2, 64], strides = [1, 1]} : vector<2x256xf32> to vector<2x64xf32>
    %269 = vector.extract_strided_slice %267 {offsets = [0, 64], sizes = [2, 64], strides = [1, 1]} : vector<2x256xf32> to vector<2x64xf32>
    %270 = vector.extract_strided_slice %267 {offsets = [0, 192], sizes = [2, 64], strides = [1, 1]} : vector<2x256xf32> to vector<2x64xf32>
    %271 = vector.extract_strided_slice %262 {offsets = [0, 128], sizes = [2, 64], strides = [1, 1]} : vector<2x256xf32> to vector<2x64xf32>
    %272 = math.tanh %271 : vector<2x64xf32>
    %273 = arith.mulf %269, %243 : vector<2x64xf32>
    %274 = arith.mulf %268, %272 : vector<2x64xf32>
    %275 = arith.addf %273, %274 : vector<2x64xf32>
    %276 = math.tanh %275 : vector<2x64xf32>
    %277 = arith.mulf %270, %276 : vector<2x64xf32>
    %278 = vector.extract_strided_slice %277 {offsets = [0, 0], sizes = [2, 32], strides = [1, 1]} : vector<2x64xf32> to vector<2x32xf32>
    %c0_63 = arith.constant 0 : index
    %c7_64 = arith.constant 7 : index
    %c0_65 = arith.constant 0 : index
    %279 = vector.load %arg18[%c0_63, %c7_64, %c0_65] : memref<2x8x64xf32, #tpu.memory_space<vmem>>, vector<2x1x32xf32>
    %280 = vector.shape_cast %279 : vector<2x1x32xf32> to vector<2x32xf32>
    %281 = vector.shape_cast %278 : vector<2x32xf32> to vector<2x1x32xf32>
    tpu.vector_store %arg18[%c0_63, %c7_64, %c0_65], %281 {strides = array<i32>} : memref<2x8x64xf32, #tpu.memory_space<vmem>>, vector<2x1x32xf32>,
    %282 = vector.extract_strided_slice %277 {offsets = [0, 32], sizes = [2, 32], strides = [1, 1]} : vector<2x64xf32> to vector<2x32xf32>
    %c0_66 = arith.constant 0 : index
    %c0_67 = arith.constant 0 : index
    %c32_68 = arith.constant 32 : index
    %283 = vector.load %arg18[%c0_66, %c0_67, %c32_68] : memref<2x8x64xf32, #tpu.memory_space<vmem>>, vector<2x1x32xf32>
    %284 = vector.shape_cast %283 : vector<2x1x32xf32> to vector<2x32xf32>
    %285 = vector.shape_cast %282 : vector<2x32xf32> to vector<2x1x32xf32>
    tpu.vector_store %arg18[%c0_66, %c0_67, %c32_68], %285 {strides = array<i32>} : memref<2x8x64xf32, #tpu.memory_space<vmem>>, vector<2x1x32xf32>,
    %c0_69 = arith.constant 0 : index
    %c0_70 = arith.constant 0 : index
    %c0_71 = arith.constant 0 : index
    %286 = vector.load %arg18[%c0_69, %c0_70, %c0_71] : memref<2x8x64xf32, #tpu.memory_space<vmem>>, vector<2x8x64xf32>
    %287 = vector.shape_cast %286 : vector<2x8x64xf32> to vector<16x64xf32>
    %c0_72 = arith.constant 0 : index
    %c0_73 = arith.constant 0 : index
    %288 = vector.load %arg4[%c0_72, %c0_73] : memref<64x256xf32, #tpu.memory_space<vmem>>, vector<64x256xf32>
    %c0_74 = arith.constant 0 : index
    %c0_75 = arith.constant 0 : index
    %289 = vector.load %arg5[%c0_74, %c0_75] : memref<64x256xf32, #tpu.memory_space<vmem>>, vector<64x256xf32>
    %c0_76 = arith.constant 0 : index
    %c0_77 = arith.constant 0 : index
    %290 = vector.load %arg6[%c0_76, %c0_77] : memref<1x256xf32, #tpu.memory_space<vmem>>, vector<1x256xf32>
    %cst_78 = arith.constant dense<0.000000e+00> : vector<16x256xf32>
    %291 = tpu.matmul %287, %288, %cst_78 {dimension_numbers = #tpu.dot_dimension_numbers<[1], [0], [0], [1], [0, 0, 1, 1], [], []>} : vector<16x64xf32>, vector<64x256xf32>, vector<16x256xf32> -> vector<16x256xf32>
    %292 = vector.broadcast %290 : vector<1x256xf32> to vector<16x256xf32>
    %293 = arith.addf %291, %292 : vector<16x256xf32>
    %294 = vector.shape_cast %293 : vector<16x256xf32> to vector<2x8x256xf32>
    %295 = tpu.iota {dimensions = array<i32: 1>} : vector<1x256xi32>
    %c64_i32_79 = arith.constant 64 : i32
    %c0_i32_80 = arith.constant 0 : i32
    %296 = arith.cmpi eq, %c64_i32_79, %c0_i32_80 : i32
    %c1_i32_81 = arith.constant 1 : i32
    %297 = arith.select %296, %c1_i32_81, %c64_i32_79 : i32
    %298 = vector.broadcast %297 : i32 to vector<1x256xi32>
    %299 = arith.remsi %295, %298 : vector<1x256xi32>
    %c0_i32_82 = arith.constant 0 : i32
    %300 = vector.broadcast %c0_i32_82 : i32 to vector<1x256xi32>
    %301 = arith.cmpi ne, %299, %300 : vector<1x256xi32>
    %c0_i32_83 = arith.constant 0 : i32
    %302 = vector.broadcast %c0_i32_83 : i32 to vector<1x256xi32>
    %303 = arith.cmpi slt, %299, %302 : vector<1x256xi32>
    %c0_i32_84 = arith.constant 0 : i32
    %304 = arith.cmpi slt, %297, %c0_i32_84 : i32
    %305 = vector.broadcast %304 : i1 to vector<1x256xi1>
    %306 = vector.broadcast %305 : vector<1x256xi1> to vector<1x256xi1>
    %307 = arith.xori %303, %306 : vector<1x256xi1>
    %308 = arith.andi %307, %301 : vector<1x256xi1>
    %309 = vector.broadcast %297 : i32 to vector<1x256xi32>
    %310 = arith.addi %299, %309 : vector<1x256xi32>
    %311 = arith.select %308, %310, %299 : vector<1x256xi1>, vector<1x256xi32>
    %c32_i32_85 = arith.constant 32 : i32
    %312 = vector.broadcast %c32_i32_85 : i32 to vector<1x256xi32>
    %313 = arith.cmpi sge, %311, %312 : vector<1x256xi32>
    %cst_86 = arith.constant 0.000000e+00 : f32
    %314 = vector.broadcast %cst_86 : f32 to vector<2x64xf32>
    %cst_87 = arith.constant 0.000000e+00 : f32
    %315 = vector.broadcast %cst_87 : f32 to vector<2x64xf32>
    %cst_88 = arith.constant dense<0.000000e+00> : vector<2x256xf32>
    %316 = tpu.matmul %314, %289, %cst_88 {dimension_numbers = #tpu.dot_dimension_numbers<[1], [0], [0], [1], [0, 0, 1, 1], [], []>} : vector<2x64xf32>, vector<64x256xf32>, vector<2x256xf32> -> vector<2x256xf32>
    %317 = vector.extract_strided_slice %294 {offsets = [0, 0, 0], sizes = [2, 1, 256], strides = [1, 1, 1]} : vector<2x8x256xf32> to vector<2x1x256xf32>
    %318 = vector.shape_cast %317 : vector<2x1x256xf32> to vector<2x256xf32>
    %319 = vector.extract_strided_slice %294 {offsets = [0, 7, 0], sizes = [2, 1, 256], strides = [1, 1, 1]} : vector<2x8x256xf32> to vector<2x1x256xf32>
    %320 = vector.shape_cast %319 : vector<2x1x256xf32> to vector<2x256xf32>
    %321 = vector.shape_cast %313 : vector<1x256xi1> to vector<1x256xi1>
    %322 = vector.broadcast %321 : vector<1x256xi1> to vector<2x256xi1>
    %323 = arith.select %322, %320, %318 : vector<2x256xi1>, vector<2x256xf32>
    %324 = arith.addf %323, %316 : vector<2x256xf32>
    %325 = arith.negf %324 : vector<2x256xf32>
    %326 = math.exp %325 : vector<2x256xf32>
    %cst_89 = arith.constant 1.000000e+00 : f32
    %327 = vector.broadcast %cst_89 : f32 to vector<2x256xf32>
    %328 = arith.addf %327, %326 : vector<2x256xf32>
    %329 = arith.divf %327, %328 : vector<2x256xf32>
    %330 = vector.extract_strided_slice %329 {offsets = [0, 0], sizes = [2, 64], strides = [1, 1]} : vector<2x256xf32> to vector<2x64xf32>
    %331 = vector.extract_strided_slice %329 {offsets = [0, 64], sizes = [2, 64], strides = [1, 1]} : vector<2x256xf32> to vector<2x64xf32>
    %332 = vector.extract_strided_slice %329 {offsets = [0, 192], sizes = [2, 64], strides = [1, 1]} : vector<2x256xf32> to vector<2x64xf32>
    %333 = vector.extract_strided_slice %324 {offsets = [0, 128], sizes = [2, 64], strides = [1, 1]} : vector<2x256xf32> to vector<2x64xf32>
    %334 = math.tanh %333 : vector<2x64xf32>
    %335 = arith.mulf %331, %315 : vector<2x64xf32>
    %336 = arith.mulf %330, %334 : vector<2x64xf32>
    %337 = arith.addf %335, %336 : vector<2x64xf32>
    %338 = math.tanh %337 : vector<2x64xf32>
    %339 = arith.mulf %332, %338 : vector<2x64xf32>
    %340 = vector.extract_strided_slice %339 {offsets = [0, 0], sizes = [2, 32], strides = [1, 1]} : vector<2x64xf32> to vector<2x32xf32>
    %c0_90 = arith.constant 0 : index
    %c0_91 = arith.constant 0 : index
    %c0_92 = arith.constant 0 : index
    %341 = vector.load %arg19[%c0_90, %c0_91, %c0_92] : memref<2x8x64xf32, #tpu.memory_space<vmem>>, vector<2x1x32xf32>
    %342 = vector.shape_cast %341 : vector<2x1x32xf32> to vector<2x32xf32>
    %343 = vector.shape_cast %340 : vector<2x32xf32> to vector<2x1x32xf32>
    tpu.vector_store %arg19[%c0_90, %c0_91, %c0_92], %343 {strides = array<i32>} : memref<2x8x64xf32, #tpu.memory_space<vmem>>, vector<2x1x32xf32>,
    %344 = vector.extract_strided_slice %339 {offsets = [0, 32], sizes = [2, 32], strides = [1, 1]} : vector<2x64xf32> to vector<2x32xf32>
    %c0_93 = arith.constant 0 : index
    %c7_94 = arith.constant 7 : index
    %c32_95 = arith.constant 32 : index
    %345 = vector.load %arg19[%c0_93, %c7_94, %c32_95] : memref<2x8x64xf32, #tpu.memory_space<vmem>>, vector<2x1x32xf32>
    %346 = vector.shape_cast %345 : vector<2x1x32xf32> to vector<2x32xf32>
    %347 = vector.shape_cast %344 : vector<2x32xf32> to vector<2x1x32xf32>
    tpu.vector_store %arg19[%c0_93, %c7_94, %c32_95], %347 {strides = array<i32>} : memref<2x8x64xf32, #tpu.memory_space<vmem>>, vector<2x1x32xf32>,
    %cst_96 = arith.constant dense<0.000000e+00> : vector<2x256xf32>
    %348 = tpu.matmul %339, %289, %cst_96 {dimension_numbers = #tpu.dot_dimension_numbers<[1], [0], [0], [1], [0, 0, 1, 1], [], []>} : vector<2x64xf32>, vector<64x256xf32>, vector<2x256xf32> -> vector<2x256xf32>
    %349 = vector.extract_strided_slice %294 {offsets = [0, 1, 0], sizes = [2, 1, 256], strides = [1, 1, 1]} : vector<2x8x256xf32> to vector<2x1x256xf32>
    %350 = vector.shape_cast %349 : vector<2x1x256xf32> to vector<2x256xf32>
    %351 = vector.extract_strided_slice %294 {offsets = [0, 6, 0], sizes = [2, 1, 256], strides = [1, 1, 1]} : vector<2x8x256xf32> to vector<2x1x256xf32>
    %352 = vector.shape_cast %351 : vector<2x1x256xf32> to vector<2x256xf32>
    %353 = vector.shape_cast %313 : vector<1x256xi1> to vector<1x256xi1>
    %354 = vector.broadcast %353 : vector<1x256xi1> to vector<2x256xi1>
    %355 = arith.select %354, %352, %350 : vector<2x256xi1>, vector<2x256xf32>
    %356 = arith.addf %355, %348 : vector<2x256xf32>
    %357 = arith.negf %356 : vector<2x256xf32>
    %358 = math.exp %357 : vector<2x256xf32>
    %cst_97 = arith.constant 1.000000e+00 : f32
    %359 = vector.broadcast %cst_97 : f32 to vector<2x256xf32>
    %360 = arith.addf %359, %358 : vector<2x256xf32>
    %361 = arith.divf %359, %360 : vector<2x256xf32>
    %362 = vector.extract_strided_slice %361 {offsets = [0, 0], sizes = [2, 64], strides = [1, 1]} : vector<2x256xf32> to vector<2x64xf32>
    %363 = vector.extract_strided_slice %361 {offsets = [0, 64], sizes = [2, 64], strides = [1, 1]} : vector<2x256xf32> to vector<2x64xf32>
    %364 = vector.extract_strided_slice %361 {offsets = [0, 192], sizes = [2, 64], strides = [1, 1]} : vector<2x256xf32> to vector<2x64xf32>
    %365 = vector.extract_strided_slice %356 {offsets = [0, 128], sizes = [2, 64], strides = [1, 1]} : vector<2x256xf32> to vector<2x64xf32>
    %366 = math.tanh %365 : vector<2x64xf32>
    %367 = arith.mulf %363, %337 : vector<2x64xf32>
    %368 = arith.mulf %362, %366 : vector<2x64xf32>
    %369 = arith.addf %367, %368 : vector<2x64xf32>
    %370 = math.tanh %369 : vector<2x64xf32>
    %371 = arith.mulf %364, %370 : vector<2x64xf32>
    %372 = vector.extract_strided_slice %371 {offsets = [0, 0], sizes = [2, 32], strides = [1, 1]} : vector<2x64xf32> to vector<2x32xf32>
    %c0_98 = arith.constant 0 : index
    %c1_99 = arith.constant 1 : index
    %c0_100 = arith.constant 0 : index
    %373 = vector.load %arg19[%c0_98, %c1_99, %c0_100] : memref<2x8x64xf32, #tpu.memory_space<vmem>>, vector<2x1x32xf32>
    %374 = vector.shape_cast %373 : vector<2x1x32xf32> to vector<2x32xf32>
    %375 = vector.shape_cast %372 : vector<2x32xf32> to vector<2x1x32xf32>
    tpu.vector_store %arg19[%c0_98, %c1_99, %c0_100], %375 {strides = array<i32>} : memref<2x8x64xf32, #tpu.memory_space<vmem>>, vector<2x1x32xf32>,
    %376 = vector.extract_strided_slice %371 {offsets = [0, 32], sizes = [2, 32], strides = [1, 1]} : vector<2x64xf32> to vector<2x32xf32>
    %c0_101 = arith.constant 0 : index
    %c6_102 = arith.constant 6 : index
    %c32_103 = arith.constant 32 : index
    %377 = vector.load %arg19[%c0_101, %c6_102, %c32_103] : memref<2x8x64xf32, #tpu.memory_space<vmem>>, vector<2x1x32xf32>
    %378 = vector.shape_cast %377 : vector<2x1x32xf32> to vector<2x32xf32>
    %379 = vector.shape_cast %376 : vector<2x32xf32> to vector<2x1x32xf32>
    tpu.vector_store %arg19[%c0_101, %c6_102, %c32_103], %379 {strides = array<i32>} : memref<2x8x64xf32, #tpu.memory_space<vmem>>, vector<2x1x32xf32>,
    %cst_104 = arith.constant dense<0.000000e+00> : vector<2x256xf32>
    %380 = tpu.matmul %371, %289, %cst_104 {dimension_numbers = #tpu.dot_dimension_numbers<[1], [0], [0], [1], [0, 0, 1, 1], [], []>} : vector<2x64xf32>, vector<64x256xf32>, vector<2x256xf32> -> vector<2x256xf32>
    %381 = vector.extract_strided_slice %294 {offsets = [0, 2, 0], sizes = [2, 1, 256], strides = [1, 1, 1]} : vector<2x8x256xf32> to vector<2x1x256xf32>
    %382 = vector.shape_cast %381 : vector<2x1x256xf32> to vector<2x256xf32>
    %383 = vector.extract_strided_slice %294 {offsets = [0, 5, 0], sizes = [2, 1, 256], strides = [1, 1, 1]} : vector<2x8x256xf32> to vector<2x1x256xf32>
    %384 = vector.shape_cast %383 : vector<2x1x256xf32> to vector<2x256xf32>
    %385 = vector.shape_cast %313 : vector<1x256xi1> to vector<1x256xi1>
    %386 = vector.broadcast %385 : vector<1x256xi1> to vector<2x256xi1>
    %387 = arith.select %386, %384, %382 : vector<2x256xi1>, vector<2x256xf32>
    %388 = arith.addf %387, %380 : vector<2x256xf32>
    %389 = arith.negf %388 : vector<2x256xf32>
    %390 = math.exp %389 : vector<2x256xf32>
    %cst_105 = arith.constant 1.000000e+00 : f32
    %391 = vector.broadcast %cst_105 : f32 to vector<2x256xf32>
    %392 = arith.addf %391, %390 : vector<2x256xf32>
    %393 = arith.divf %391, %392 : vector<2x256xf32>
    %394 = vector.extract_strided_slice %393 {offsets = [0, 0], sizes = [2, 64], strides = [1, 1]} : vector<2x256xf32> to vector<2x64xf32>
    %395 = vector.extract_strided_slice %393 {offsets = [0, 64], sizes = [2, 64], strides = [1, 1]} : vector<2x256xf32> to vector<2x64xf32>
    %396 = vector.extract_strided_slice %393 {offsets = [0, 192], sizes = [2, 64], strides = [1, 1]} : vector<2x256xf32> to vector<2x64xf32>
    %397 = vector.extract_strided_slice %388 {offsets = [0, 128], sizes = [2, 64], strides = [1, 1]} : vector<2x256xf32> to vector<2x64xf32>
    %398 = math.tanh %397 : vector<2x64xf32>
    %399 = arith.mulf %395, %369 : vector<2x64xf32>
    %400 = arith.mulf %394, %398 : vector<2x64xf32>
    %401 = arith.addf %399, %400 : vector<2x64xf32>
    %402 = math.tanh %401 : vector<2x64xf32>
    %403 = arith.mulf %396, %402 : vector<2x64xf32>
    %404 = vector.extract_strided_slice %403 {offsets = [0, 0], sizes = [2, 32], strides = [1, 1]} : vector<2x64xf32> to vector<2x32xf32>
    %c0_106 = arith.constant 0 : index
    %c2_107 = arith.constant 2 : index
    %c0_108 = arith.constant 0 : index
    %405 = vector.load %arg19[%c0_106, %c2_107, %c0_108] : memref<2x8x64xf32, #tpu.memory_space<vmem>>, vector<2x1x32xf32>
    %406 = vector.shape_cast %405 : vector<2x1x32xf32> to vector<2x32xf32>
    %407 = vector.shape_cast %404 : vector<2x32xf32> to vector<2x1x32xf32>
    tpu.vector_store %arg19[%c0_106, %c2_107, %c0_108], %407 {strides = array<i32>} : memref<2x8x64xf32, #tpu.memory_space<vmem>>, vector<2x1x32xf32>,
    %408 = vector.extract_strided_slice %403 {offsets = [0, 32], sizes = [2, 32], strides = [1, 1]} : vector<2x64xf32> to vector<2x32xf32>
    %c0_109 = arith.constant 0 : index
    %c5_110 = arith.constant 5 : index
    %c32_111 = arith.constant 32 : index
    %409 = vector.load %arg19[%c0_109, %c5_110, %c32_111] : memref<2x8x64xf32, #tpu.memory_space<vmem>>, vector<2x1x32xf32>
    %410 = vector.shape_cast %409 : vector<2x1x32xf32> to vector<2x32xf32>
    %411 = vector.shape_cast %408 : vector<2x32xf32> to vector<2x1x32xf32>
    tpu.vector_store %arg19[%c0_109, %c5_110, %c32_111], %411 {strides = array<i32>} : memref<2x8x64xf32, #tpu.memory_space<vmem>>, vector<2x1x32xf32>,
    %cst_112 = arith.constant dense<0.000000e+00> : vector<2x256xf32>
    %412 = tpu.matmul %403, %289, %cst_112 {dimension_numbers = #tpu.dot_dimension_numbers<[1], [0], [0], [1], [0, 0, 1, 1], [], []>} : vector<2x64xf32>, vector<64x256xf32>, vector<2x256xf32> -> vector<2x256xf32>
    %413 = vector.extract_strided_slice %294 {offsets = [0, 3, 0], sizes = [2, 1, 256], strides = [1, 1, 1]} : vector<2x8x256xf32> to vector<2x1x256xf32>
    %414 = vector.shape_cast %413 : vector<2x1x256xf32> to vector<2x256xf32>
    %415 = vector.extract_strided_slice %294 {offsets = [0, 4, 0], sizes = [2, 1, 256], strides = [1, 1, 1]} : vector<2x8x256xf32> to vector<2x1x256xf32>
    %416 = vector.shape_cast %415 : vector<2x1x256xf32> to vector<2x256xf32>
    %417 = vector.shape_cast %313 : vector<1x256xi1> to vector<1x256xi1>
    %418 = vector.broadcast %417 : vector<1x256xi1> to vector<2x256xi1>
    %419 = arith.select %418, %416, %414 : vector<2x256xi1>, vector<2x256xf32>
    %420 = arith.addf %419, %412 : vector<2x256xf32>
    %421 = arith.negf %420 : vector<2x256xf32>
    %422 = math.exp %421 : vector<2x256xf32>
    %cst_113 = arith.constant 1.000000e+00 : f32
    %423 = vector.broadcast %cst_113 : f32 to vector<2x256xf32>
    %424 = arith.addf %423, %422 : vector<2x256xf32>
    %425 = arith.divf %423, %424 : vector<2x256xf32>
    %426 = vector.extract_strided_slice %425 {offsets = [0, 0], sizes = [2, 64], strides = [1, 1]} : vector<2x256xf32> to vector<2x64xf32>
    %427 = vector.extract_strided_slice %425 {offsets = [0, 64], sizes = [2, 64], strides = [1, 1]} : vector<2x256xf32> to vector<2x64xf32>
    %428 = vector.extract_strided_slice %425 {offsets = [0, 192], sizes = [2, 64], strides = [1, 1]} : vector<2x256xf32> to vector<2x64xf32>
    %429 = vector.extract_strided_slice %420 {offsets = [0, 128], sizes = [2, 64], strides = [1, 1]} : vector<2x256xf32> to vector<2x64xf32>
    %430 = math.tanh %429 : vector<2x64xf32>
    %431 = arith.mulf %427, %401 : vector<2x64xf32>
    %432 = arith.mulf %426, %430 : vector<2x64xf32>
    %433 = arith.addf %431, %432 : vector<2x64xf32>
    %434 = math.tanh %433 : vector<2x64xf32>
    %435 = arith.mulf %428, %434 : vector<2x64xf32>
    %436 = vector.extract_strided_slice %435 {offsets = [0, 0], sizes = [2, 32], strides = [1, 1]} : vector<2x64xf32> to vector<2x32xf32>
    %c0_114 = arith.constant 0 : index
    %c3_115 = arith.constant 3 : index
    %c0_116 = arith.constant 0 : index
    %437 = vector.load %arg19[%c0_114, %c3_115, %c0_116] : memref<2x8x64xf32, #tpu.memory_space<vmem>>, vector<2x1x32xf32>
    %438 = vector.shape_cast %437 : vector<2x1x32xf32> to vector<2x32xf32>
    %439 = vector.shape_cast %436 : vector<2x32xf32> to vector<2x1x32xf32>
    tpu.vector_store %arg19[%c0_114, %c3_115, %c0_116], %439 {strides = array<i32>} : memref<2x8x64xf32, #tpu.memory_space<vmem>>, vector<2x1x32xf32>,
    %440 = vector.extract_strided_slice %435 {offsets = [0, 32], sizes = [2, 32], strides = [1, 1]} : vector<2x64xf32> to vector<2x32xf32>
    %c0_117 = arith.constant 0 : index
    %c4_118 = arith.constant 4 : index
    %c32_119 = arith.constant 32 : index
    %441 = vector.load %arg19[%c0_117, %c4_118, %c32_119] : memref<2x8x64xf32, #tpu.memory_space<vmem>>, vector<2x1x32xf32>
    %442 = vector.shape_cast %441 : vector<2x1x32xf32> to vector<2x32xf32>
    %443 = vector.shape_cast %440 : vector<2x32xf32> to vector<2x1x32xf32>
    tpu.vector_store %arg19[%c0_117, %c4_118, %c32_119], %443 {strides = array<i32>} : memref<2x8x64xf32, #tpu.memory_space<vmem>>, vector<2x1x32xf32>,
    %cst_120 = arith.constant dense<0.000000e+00> : vector<2x256xf32>
    %444 = tpu.matmul %435, %289, %cst_120 {dimension_numbers = #tpu.dot_dimension_numbers<[1], [0], [0], [1], [0, 0, 1, 1], [], []>} : vector<2x64xf32>, vector<64x256xf32>, vector<2x256xf32> -> vector<2x256xf32>
    %445 = vector.extract_strided_slice %294 {offsets = [0, 4, 0], sizes = [2, 1, 256], strides = [1, 1, 1]} : vector<2x8x256xf32> to vector<2x1x256xf32>
    %446 = vector.shape_cast %445 : vector<2x1x256xf32> to vector<2x256xf32>
    %447 = vector.extract_strided_slice %294 {offsets = [0, 3, 0], sizes = [2, 1, 256], strides = [1, 1, 1]} : vector<2x8x256xf32> to vector<2x1x256xf32>
    %448 = vector.shape_cast %447 : vector<2x1x256xf32> to vector<2x256xf32>
    %449 = vector.shape_cast %313 : vector<1x256xi1> to vector<1x256xi1>
    %450 = vector.broadcast %449 : vector<1x256xi1> to vector<2x256xi1>
    %451 = arith.select %450, %448, %446 : vector<2x256xi1>, vector<2x256xf32>
    %452 = arith.addf %451, %444 : vector<2x256xf32>
    %453 = arith.negf %452 : vector<2x256xf32>
    %454 = math.exp %453 : vector<2x256xf32>
    %cst_121 = arith.constant 1.000000e+00 : f32
    %455 = vector.broadcast %cst_121 : f32 to vector<2x256xf32>
    %456 = arith.addf %455, %454 : vector<2x256xf32>
    %457 = arith.divf %455, %456 : vector<2x256xf32>
    %458 = vector.extract_strided_slice %457 {offsets = [0, 0], sizes = [2, 64], strides = [1, 1]} : vector<2x256xf32> to vector<2x64xf32>
    %459 = vector.extract_strided_slice %457 {offsets = [0, 64], sizes = [2, 64], strides = [1, 1]} : vector<2x256xf32> to vector<2x64xf32>
    %460 = vector.extract_strided_slice %457 {offsets = [0, 192], sizes = [2, 64], strides = [1, 1]} : vector<2x256xf32> to vector<2x64xf32>
    %461 = vector.extract_strided_slice %452 {offsets = [0, 128], sizes = [2, 64], strides = [1, 1]} : vector<2x256xf32> to vector<2x64xf32>
    %462 = math.tanh %461 : vector<2x64xf32>
    %463 = arith.mulf %459, %433 : vector<2x64xf32>
    %464 = arith.mulf %458, %462 : vector<2x64xf32>
    %465 = arith.addf %463, %464 : vector<2x64xf32>
    %466 = math.tanh %465 : vector<2x64xf32>
    %467 = arith.mulf %460, %466 : vector<2x64xf32>
    %468 = vector.extract_strided_slice %467 {offsets = [0, 0], sizes = [2, 32], strides = [1, 1]} : vector<2x64xf32> to vector<2x32xf32>
    %c0_122 = arith.constant 0 : index
    %c4_123 = arith.constant 4 : index
    %c0_124 = arith.constant 0 : index
    %469 = vector.load %arg19[%c0_122, %c4_123, %c0_124] : memref<2x8x64xf32, #tpu.memory_space<vmem>>, vector<2x1x32xf32>
    %470 = vector.shape_cast %469 : vector<2x1x32xf32> to vector<2x32xf32>
    %471 = vector.shape_cast %468 : vector<2x32xf32> to vector<2x1x32xf32>
    tpu.vector_store %arg19[%c0_122, %c4_123, %c0_124], %471 {strides = array<i32>} : memref<2x8x64xf32, #tpu.memory_space<vmem>>, vector<2x1x32xf32>,
    %472 = vector.extract_strided_slice %467 {offsets = [0, 32], sizes = [2, 32], strides = [1, 1]} : vector<2x64xf32> to vector<2x32xf32>
    %c0_125 = arith.constant 0 : index
    %c3_126 = arith.constant 3 : index
    %c32_127 = arith.constant 32 : index
    %473 = vector.load %arg19[%c0_125, %c3_126, %c32_127] : memref<2x8x64xf32, #tpu.memory_space<vmem>>, vector<2x1x32xf32>
    %474 = vector.shape_cast %473 : vector<2x1x32xf32> to vector<2x32xf32>
    %475 = vector.shape_cast %472 : vector<2x32xf32> to vector<2x1x32xf32>
    tpu.vector_store %arg19[%c0_125, %c3_126, %c32_127], %475 {strides = array<i32>} : memref<2x8x64xf32, #tpu.memory_space<vmem>>, vector<2x1x32xf32>,
    %cst_128 = arith.constant dense<0.000000e+00> : vector<2x256xf32>
    %476 = tpu.matmul %467, %289, %cst_128 {dimension_numbers = #tpu.dot_dimension_numbers<[1], [0], [0], [1], [0, 0, 1, 1], [], []>} : vector<2x64xf32>, vector<64x256xf32>, vector<2x256xf32> -> vector<2x256xf32>
    %477 = vector.extract_strided_slice %294 {offsets = [0, 5, 0], sizes = [2, 1, 256], strides = [1, 1, 1]} : vector<2x8x256xf32> to vector<2x1x256xf32>
    %478 = vector.shape_cast %477 : vector<2x1x256xf32> to vector<2x256xf32>
    %479 = vector.extract_strided_slice %294 {offsets = [0, 2, 0], sizes = [2, 1, 256], strides = [1, 1, 1]} : vector<2x8x256xf32> to vector<2x1x256xf32>
    %480 = vector.shape_cast %479 : vector<2x1x256xf32> to vector<2x256xf32>
    %481 = vector.shape_cast %313 : vector<1x256xi1> to vector<1x256xi1>
    %482 = vector.broadcast %481 : vector<1x256xi1> to vector<2x256xi1>
    %483 = arith.select %482, %480, %478 : vector<2x256xi1>, vector<2x256xf32>
    %484 = arith.addf %483, %476 : vector<2x256xf32>
    %485 = arith.negf %484 : vector<2x256xf32>
    %486 = math.exp %485 : vector<2x256xf32>
    %cst_129 = arith.constant 1.000000e+00 : f32
    %487 = vector.broadcast %cst_129 : f32 to vector<2x256xf32>
    %488 = arith.addf %487, %486 : vector<2x256xf32>
    %489 = arith.divf %487, %488 : vector<2x256xf32>
    %490 = vector.extract_strided_slice %489 {offsets = [0, 0], sizes = [2, 64], strides = [1, 1]} : vector<2x256xf32> to vector<2x64xf32>
    %491 = vector.extract_strided_slice %489 {offsets = [0, 64], sizes = [2, 64], strides = [1, 1]} : vector<2x256xf32> to vector<2x64xf32>
    %492 = vector.extract_strided_slice %489 {offsets = [0, 192], sizes = [2, 64], strides = [1, 1]} : vector<2x256xf32> to vector<2x64xf32>
    %493 = vector.extract_strided_slice %484 {offsets = [0, 128], sizes = [2, 64], strides = [1, 1]} : vector<2x256xf32> to vector<2x64xf32>
    %494 = math.tanh %493 : vector<2x64xf32>
    %495 = arith.mulf %491, %465 : vector<2x64xf32>
    %496 = arith.mulf %490, %494 : vector<2x64xf32>
    %497 = arith.addf %495, %496 : vector<2x64xf32>
    %498 = math.tanh %497 : vector<2x64xf32>
    %499 = arith.mulf %492, %498 : vector<2x64xf32>
    %500 = vector.extract_strided_slice %499 {offsets = [0, 0], sizes = [2, 32], strides = [1, 1]} : vector<2x64xf32> to vector<2x32xf32>
    %c0_130 = arith.constant 0 : index
    %c5_131 = arith.constant 5 : index
    %c0_132 = arith.constant 0 : index
    %501 = vector.load %arg19[%c0_130, %c5_131, %c0_132] : memref<2x8x64xf32, #tpu.memory_space<vmem>>, vector<2x1x32xf32>
    %502 = vector.shape_cast %501 : vector<2x1x32xf32> to vector<2x32xf32>
    %503 = vector.shape_cast %500 : vector<2x32xf32> to vector<2x1x32xf32>
    tpu.vector_store %arg19[%c0_130, %c5_131, %c0_132], %503 {strides = array<i32>} : memref<2x8x64xf32, #tpu.memory_space<vmem>>, vector<2x1x32xf32>,
    %504 = vector.extract_strided_slice %499 {offsets = [0, 32], sizes = [2, 32], strides = [1, 1]} : vector<2x64xf32> to vector<2x32xf32>
    %c0_133 = arith.constant 0 : index
    %c2_134 = arith.constant 2 : index
    %c32_135 = arith.constant 32 : index
    %505 = vector.load %arg19[%c0_133, %c2_134, %c32_135] : memref<2x8x64xf32, #tpu.memory_space<vmem>>, vector<2x1x32xf32>
    %506 = vector.shape_cast %505 : vector<2x1x32xf32> to vector<2x32xf32>
    %507 = vector.shape_cast %504 : vector<2x32xf32> to vector<2x1x32xf32>
    tpu.vector_store %arg19[%c0_133, %c2_134, %c32_135], %507 {strides = array<i32>} : memref<2x8x64xf32, #tpu.memory_space<vmem>>, vector<2x1x32xf32>,
    %cst_136 = arith.constant dense<0.000000e+00> : vector<2x256xf32>
    %508 = tpu.matmul %499, %289, %cst_136 {dimension_numbers = #tpu.dot_dimension_numbers<[1], [0], [0], [1], [0, 0, 1, 1], [], []>} : vector<2x64xf32>, vector<64x256xf32>, vector<2x256xf32> -> vector<2x256xf32>
    %509 = vector.extract_strided_slice %294 {offsets = [0, 6, 0], sizes = [2, 1, 256], strides = [1, 1, 1]} : vector<2x8x256xf32> to vector<2x1x256xf32>
    %510 = vector.shape_cast %509 : vector<2x1x256xf32> to vector<2x256xf32>
    %511 = vector.extract_strided_slice %294 {offsets = [0, 1, 0], sizes = [2, 1, 256], strides = [1, 1, 1]} : vector<2x8x256xf32> to vector<2x1x256xf32>
    %512 = vector.shape_cast %511 : vector<2x1x256xf32> to vector<2x256xf32>
    %513 = vector.shape_cast %313 : vector<1x256xi1> to vector<1x256xi1>
    %514 = vector.broadcast %513 : vector<1x256xi1> to vector<2x256xi1>
    %515 = arith.select %514, %512, %510 : vector<2x256xi1>, vector<2x256xf32>
    %516 = arith.addf %515, %508 : vector<2x256xf32>
    %517 = arith.negf %516 : vector<2x256xf32>
    %518 = math.exp %517 : vector<2x256xf32>
    %cst_137 = arith.constant 1.000000e+00 : f32
    %519 = vector.broadcast %cst_137 : f32 to vector<2x256xf32>
    %520 = arith.addf %519, %518 : vector<2x256xf32>
    %521 = arith.divf %519, %520 : vector<2x256xf32>
    %522 = vector.extract_strided_slice %521 {offsets = [0, 0], sizes = [2, 64], strides = [1, 1]} : vector<2x256xf32> to vector<2x64xf32>
    %523 = vector.extract_strided_slice %521 {offsets = [0, 64], sizes = [2, 64], strides = [1, 1]} : vector<2x256xf32> to vector<2x64xf32>
    %524 = vector.extract_strided_slice %521 {offsets = [0, 192], sizes = [2, 64], strides = [1, 1]} : vector<2x256xf32> to vector<2x64xf32>
    %525 = vector.extract_strided_slice %516 {offsets = [0, 128], sizes = [2, 64], strides = [1, 1]} : vector<2x256xf32> to vector<2x64xf32>
    %526 = math.tanh %525 : vector<2x64xf32>
    %527 = arith.mulf %523, %497 : vector<2x64xf32>
    %528 = arith.mulf %522, %526 : vector<2x64xf32>
    %529 = arith.addf %527, %528 : vector<2x64xf32>
    %530 = math.tanh %529 : vector<2x64xf32>
    %531 = arith.mulf %524, %530 : vector<2x64xf32>
    %532 = vector.extract_strided_slice %531 {offsets = [0, 0], sizes = [2, 32], strides = [1, 1]} : vector<2x64xf32> to vector<2x32xf32>
    %c0_138 = arith.constant 0 : index
    %c6_139 = arith.constant 6 : index
    %c0_140 = arith.constant 0 : index
    %533 = vector.load %arg19[%c0_138, %c6_139, %c0_140] : memref<2x8x64xf32, #tpu.memory_space<vmem>>, vector<2x1x32xf32>
    %534 = vector.shape_cast %533 : vector<2x1x32xf32> to vector<2x32xf32>
    %535 = vector.shape_cast %532 : vector<2x32xf32> to vector<2x1x32xf32>
    tpu.vector_store %arg19[%c0_138, %c6_139, %c0_140], %535 {strides = array<i32>} : memref<2x8x64xf32, #tpu.memory_space<vmem>>, vector<2x1x32xf32>,
    %536 = vector.extract_strided_slice %531 {offsets = [0, 32], sizes = [2, 32], strides = [1, 1]} : vector<2x64xf32> to vector<2x32xf32>
    %c0_141 = arith.constant 0 : index
    %c1_142 = arith.constant 1 : index
    %c32_143 = arith.constant 32 : index
    %537 = vector.load %arg19[%c0_141, %c1_142, %c32_143] : memref<2x8x64xf32, #tpu.memory_space<vmem>>, vector<2x1x32xf32>
    %538 = vector.shape_cast %537 : vector<2x1x32xf32> to vector<2x32xf32>
    %539 = vector.shape_cast %536 : vector<2x32xf32> to vector<2x1x32xf32>
    tpu.vector_store %arg19[%c0_141, %c1_142, %c32_143], %539 {strides = array<i32>} : memref<2x8x64xf32, #tpu.memory_space<vmem>>, vector<2x1x32xf32>,
    %cst_144 = arith.constant dense<0.000000e+00> : vector<2x256xf32>
    %540 = tpu.matmul %531, %289, %cst_144 {dimension_numbers = #tpu.dot_dimension_numbers<[1], [0], [0], [1], [0, 0, 1, 1], [], []>} : vector<2x64xf32>, vector<64x256xf32>, vector<2x256xf32> -> vector<2x256xf32>
    %541 = vector.extract_strided_slice %294 {offsets = [0, 7, 0], sizes = [2, 1, 256], strides = [1, 1, 1]} : vector<2x8x256xf32> to vector<2x1x256xf32>
    %542 = vector.shape_cast %541 : vector<2x1x256xf32> to vector<2x256xf32>
    %543 = vector.extract_strided_slice %294 {offsets = [0, 0, 0], sizes = [2, 1, 256], strides = [1, 1, 1]} : vector<2x8x256xf32> to vector<2x1x256xf32>
    %544 = vector.shape_cast %543 : vector<2x1x256xf32> to vector<2x256xf32>
    %545 = vector.shape_cast %313 : vector<1x256xi1> to vector<1x256xi1>
    %546 = vector.broadcast %545 : vector<1x256xi1> to vector<2x256xi1>
    %547 = arith.select %546, %544, %542 : vector<2x256xi1>, vector<2x256xf32>
    %548 = arith.addf %547, %540 : vector<2x256xf32>
    %549 = arith.negf %548 : vector<2x256xf32>
    %550 = math.exp %549 : vector<2x256xf32>
    %cst_145 = arith.constant 1.000000e+00 : f32
    %551 = vector.broadcast %cst_145 : f32 to vector<2x256xf32>
    %552 = arith.addf %551, %550 : vector<2x256xf32>
    %553 = arith.divf %551, %552 : vector<2x256xf32>
    %554 = vector.extract_strided_slice %553 {offsets = [0, 0], sizes = [2, 64], strides = [1, 1]} : vector<2x256xf32> to vector<2x64xf32>
    %555 = vector.extract_strided_slice %553 {offsets = [0, 64], sizes = [2, 64], strides = [1, 1]} : vector<2x256xf32> to vector<2x64xf32>
    %556 = vector.extract_strided_slice %553 {offsets = [0, 192], sizes = [2, 64], strides = [1, 1]} : vector<2x256xf32> to vector<2x64xf32>
    %557 = vector.extract_strided_slice %548 {offsets = [0, 128], sizes = [2, 64], strides = [1, 1]} : vector<2x256xf32> to vector<2x64xf32>
    %558 = math.tanh %557 : vector<2x64xf32>
    %559 = arith.mulf %555, %529 : vector<2x64xf32>
    %560 = arith.mulf %554, %558 : vector<2x64xf32>
    %561 = arith.addf %559, %560 : vector<2x64xf32>
    %562 = math.tanh %561 : vector<2x64xf32>
    %563 = arith.mulf %556, %562 : vector<2x64xf32>
    %564 = vector.extract_strided_slice %563 {offsets = [0, 0], sizes = [2, 32], strides = [1, 1]} : vector<2x64xf32> to vector<2x32xf32>
    %c0_146 = arith.constant 0 : index
    %c7_147 = arith.constant 7 : index
    %c0_148 = arith.constant 0 : index
    %565 = vector.load %arg19[%c0_146, %c7_147, %c0_148] : memref<2x8x64xf32, #tpu.memory_space<vmem>>, vector<2x1x32xf32>
    %566 = vector.shape_cast %565 : vector<2x1x32xf32> to vector<2x32xf32>
    %567 = vector.shape_cast %564 : vector<2x32xf32> to vector<2x1x32xf32>
    tpu.vector_store %arg19[%c0_146, %c7_147, %c0_148], %567 {strides = array<i32>} : memref<2x8x64xf32, #tpu.memory_space<vmem>>, vector<2x1x32xf32>,
    %568 = vector.extract_strided_slice %563 {offsets = [0, 32], sizes = [2, 32], strides = [1, 1]} : vector<2x64xf32> to vector<2x32xf32>
    %c0_149 = arith.constant 0 : index
    %c0_150 = arith.constant 0 : index
    %c32_151 = arith.constant 32 : index
    %569 = vector.load %arg19[%c0_149, %c0_150, %c32_151] : memref<2x8x64xf32, #tpu.memory_space<vmem>>, vector<2x1x32xf32>
    %570 = vector.shape_cast %569 : vector<2x1x32xf32> to vector<2x32xf32>
    %571 = vector.shape_cast %568 : vector<2x32xf32> to vector<2x1x32xf32>
    tpu.vector_store %arg19[%c0_149, %c0_150, %c32_151], %571 {strides = array<i32>} : memref<2x8x64xf32, #tpu.memory_space<vmem>>, vector<2x1x32xf32>,
    %c0_152 = arith.constant 0 : index
    %c0_153 = arith.constant 0 : index
    %c0_154 = arith.constant 0 : index
    %572 = vector.load %arg19[%c0_152, %c0_153, %c0_154] : memref<2x8x64xf32, #tpu.memory_space<vmem>>, vector<2x8x64xf32>
    %573 = vector.shape_cast %572 : vector<2x8x64xf32> to vector<16x64xf32>
    %c0_155 = arith.constant 0 : index
    %c0_156 = arith.constant 0 : index
    %574 = vector.load %arg7[%c0_155, %c0_156] : memref<64x64xf32, #tpu.memory_space<vmem>>, vector<64x64xf32>
    %cst_157 = arith.constant dense<0.000000e+00> : vector<16x64xf32>
    %575 = tpu.matmul %573, %574, %cst_157 {dimension_numbers = #tpu.dot_dimension_numbers<[1], [0], [0], [1], [0, 0, 1, 1], [], []>} : vector<16x64xf32>, vector<64x64xf32>, vector<16x64xf32> -> vector<16x64xf32>
    %c0_158 = arith.constant 0 : index
    %c0_159 = arith.constant 0 : index
    %576 = vector.load %arg10[%c0_158, %c0_159] : memref<1x64xf32, #tpu.memory_space<vmem>>, vector<1x64xf32>
    %577 = vector.broadcast %576 : vector<1x64xf32> to vector<16x64xf32>
    %578 = arith.addf %575, %577 : vector<16x64xf32>
    %c0_160 = arith.constant 0 : index
    %c0_161 = arith.constant 0 : index
    %579 = vector.load %arg8[%c0_160, %c0_161] : memref<64x64xf32, #tpu.memory_space<vmem>>, vector<64x64xf32>
    %cst_162 = arith.constant dense<0.000000e+00> : vector<16x64xf32>
    %580 = tpu.matmul %573, %579, %cst_162 {dimension_numbers = #tpu.dot_dimension_numbers<[1], [0], [0], [1], [0, 0, 1, 1], [], []>} : vector<16x64xf32>, vector<64x64xf32>, vector<16x64xf32> -> vector<16x64xf32>
    %c0_163 = arith.constant 0 : index
    %c0_164 = arith.constant 0 : index
    %581 = vector.load %arg11[%c0_163, %c0_164] : memref<1x64xf32, #tpu.memory_space<vmem>>, vector<1x64xf32>
    %582 = vector.broadcast %581 : vector<1x64xf32> to vector<16x64xf32>
    %583 = arith.addf %580, %582 : vector<16x64xf32>
    %c0_165 = arith.constant 0 : index
    %c0_166 = arith.constant 0 : index
    %584 = vector.load %arg9[%c0_165, %c0_166] : memref<64x64xf32, #tpu.memory_space<vmem>>, vector<64x64xf32>
    %cst_167 = arith.constant dense<0.000000e+00> : vector<16x64xf32>
    %585 = tpu.matmul %573, %584, %cst_167 {dimension_numbers = #tpu.dot_dimension_numbers<[1], [0], [0], [1], [0, 0, 1, 1], [], []>} : vector<16x64xf32>, vector<64x64xf32>, vector<16x64xf32> -> vector<16x64xf32>
    %c0_168 = arith.constant 0 : index
    %c0_169 = arith.constant 0 : index
    %586 = vector.load %arg12[%c0_168, %c0_169] : memref<1x64xf32, #tpu.memory_space<vmem>>, vector<1x64xf32>
    %587 = vector.broadcast %586 : vector<1x64xf32> to vector<16x64xf32>
    %588 = arith.addf %585, %587 : vector<16x64xf32>
    %589 = vector.shape_cast %578 : vector<16x64xf32> to vector<2x8x64xf32>
    %590 = vector.shape_cast %583 : vector<16x64xf32> to vector<2x8x64xf32>
    %591 = vector.shape_cast %588 : vector<16x64xf32> to vector<2x8x64xf32>
    %592 = vector.extract_strided_slice %589 {offsets = [0, 0, 0], sizes = [2, 8, 16], strides = [1, 1, 1]} : vector<2x8x64xf32> to vector<2x8x16xf32>
    %593 = vector.extract_strided_slice %589 {offsets = [0, 0, 16], sizes = [2, 8, 16], strides = [1, 1, 1]} : vector<2x8x64xf32> to vector<2x8x16xf32>
    %594 = vector.extract_strided_slice %589 {offsets = [0, 0, 32], sizes = [2, 8, 16], strides = [1, 1, 1]} : vector<2x8x64xf32> to vector<2x8x16xf32>
    %595 = vector.extract_strided_slice %589 {offsets = [0, 0, 48], sizes = [2, 8, 16], strides = [1, 1, 1]} : vector<2x8x64xf32> to vector<2x8x16xf32>
    %596 = tpu.concatenate %592, %593, %594, %595 in 0 : vector<2x8x16xf32>, vector<2x8x16xf32>, vector<2x8x16xf32>, vector<2x8x16xf32> -> vector<8x8x16xf32>
    %597 = vector.extract_strided_slice %590 {offsets = [0, 0, 0], sizes = [2, 8, 16], strides = [1, 1, 1]} : vector<2x8x64xf32> to vector<2x8x16xf32>
    %598 = vector.extract_strided_slice %590 {offsets = [0, 0, 16], sizes = [2, 8, 16], strides = [1, 1, 1]} : vector<2x8x64xf32> to vector<2x8x16xf32>
    %599 = vector.extract_strided_slice %590 {offsets = [0, 0, 32], sizes = [2, 8, 16], strides = [1, 1, 1]} : vector<2x8x64xf32> to vector<2x8x16xf32>
    %600 = vector.extract_strided_slice %590 {offsets = [0, 0, 48], sizes = [2, 8, 16], strides = [1, 1, 1]} : vector<2x8x64xf32> to vector<2x8x16xf32>
    %601 = tpu.concatenate %597, %598, %599, %600 in 0 : vector<2x8x16xf32>, vector<2x8x16xf32>, vector<2x8x16xf32>, vector<2x8x16xf32> -> vector<8x8x16xf32>
    %602 = vector.extract_strided_slice %591 {offsets = [0, 0, 0], sizes = [2, 8, 16], strides = [1, 1, 1]} : vector<2x8x64xf32> to vector<2x8x16xf32>
    %603 = vector.extract_strided_slice %591 {offsets = [0, 0, 16], sizes = [2, 8, 16], strides = [1, 1, 1]} : vector<2x8x64xf32> to vector<2x8x16xf32>
    %604 = vector.extract_strided_slice %591 {offsets = [0, 0, 32], sizes = [2, 8, 16], strides = [1, 1, 1]} : vector<2x8x64xf32> to vector<2x8x16xf32>
    %605 = vector.extract_strided_slice %591 {offsets = [0, 0, 48], sizes = [2, 8, 16], strides = [1, 1, 1]} : vector<2x8x64xf32> to vector<2x8x16xf32>
    %606 = tpu.concatenate %602, %603, %604, %605 in 0 : vector<2x8x16xf32>, vector<2x8x16xf32>, vector<2x8x16xf32>, vector<2x8x16xf32> -> vector<8x8x16xf32>
    "tpu.trace_start"() <{level = 10 : i32, message = "gqd,gkd->gqk"}> : () -> ()
    %cst_170 = arith.constant dense<0.000000e+00> : vector<8x8x8xf32>
    %607 = tpu.matmul %596, %601, %cst_170 {dimension_numbers = #tpu.dot_dimension_numbers<[2], [2], [1], [1], [0, 0, 0, 1, 1, 1], [0], [0]>} : vector<8x8x16xf32>, vector<8x8x16xf32>, vector<8x8x8xf32> -> vector<8x8x8xf32>
    "tpu.trace_stop"() : () -> ()
    %cst_171 = arith.constant dense<0xFF800000> : vector<8x8xf32>
    %608 = vector.multi_reduction <maximumf>, %607, %cst_171 [2] : vector<8x8x8xf32> to vector<8x8xf32>
    %609 = vector.shape_cast %608 : vector<8x8xf32> to vector<8x8x1xf32>
    %610 = vector.broadcast %609 : vector<8x8x1xf32> to vector<8x8x8xf32>
    %611 = arith.subf %607, %610 : vector<8x8x8xf32>
    %612 = math.exp %611 : vector<8x8x8xf32>
    %cst_172 = arith.constant dense<0.000000e+00> : vector<8x8xf32>
    %613 = vector.multi_reduction <add>, %612, %cst_172 [2] : vector<8x8x8xf32> to vector<8x8xf32>
    %614 = vector.shape_cast %613 : vector<8x8xf32> to vector<8x8x1xf32>
    %615 = tpu.reciprocal %614 {approx = true} : vector<8x8x1xf32> -> vector<8x8x1xf32>
    %616 = vector.broadcast %615 : vector<8x8x1xf32> to vector<8x8x8xf32>
    %617 = arith.mulf %612, %616 : vector<8x8x8xf32>
    "tpu.trace_start"() <{level = 10 : i32, message = "gqk,gkd->gqd"}> : () -> ()
    %cst_173 = arith.constant dense<0.000000e+00> : vector<8x8x16xf32>
    %618 = tpu.matmul %617, %606, %cst_173 {dimension_numbers = #tpu.dot_dimension_numbers<[2], [1], [1], [2], [0, 0, 0, 1, 1, 2], [0], [0]>} : vector<8x8x8xf32>, vector<8x8x16xf32>, vector<8x8x16xf32> -> vector<8x8x16xf32>
    "tpu.trace_stop"() : () -> ()
    %619 = vector.extract_strided_slice %618 {offsets = [0, 0, 0], sizes = [2, 8, 16], strides = [1, 1, 1]} : vector<8x8x16xf32> to vector<2x8x16xf32>
    %620 = vector.extract_strided_slice %618 {offsets = [2, 0, 0], sizes = [2, 8, 16], strides = [1, 1, 1]} : vector<8x8x16xf32> to vector<2x8x16xf32>
    %621 = vector.extract_strided_slice %618 {offsets = [4, 0, 0], sizes = [2, 8, 16], strides = [1, 1, 1]} : vector<8x8x16xf32> to vector<2x8x16xf32>
    %622 = vector.extract_strided_slice %618 {offsets = [6, 0, 0], sizes = [2, 8, 16], strides = [1, 1, 1]} : vector<8x8x16xf32> to vector<2x8x16xf32>
    %623 = tpu.concatenate %619, %620, %621, %622 in 2 : vector<2x8x16xf32>, vector<2x8x16xf32>, vector<2x8x16xf32>, vector<2x8x16xf32> -> vector<2x8x64xf32>
    %624 = vector.shape_cast %623 : vector<2x8x64xf32> to vector<16x64xf32>
    %c0_174 = arith.constant 0 : index
    %c0_175 = arith.constant 0 : index
    %625 = vector.load %arg13[%c0_174, %c0_175] : memref<64x64xf32, #tpu.memory_space<vmem>>, vector<64x64xf32>
    %cst_176 = arith.constant dense<0.000000e+00> : vector<16x64xf32>
    %626 = tpu.matmul %624, %625, %cst_176 {dimension_numbers = #tpu.dot_dimension_numbers<[1], [0], [0], [1], [0, 0, 1, 1], [], []>} : vector<16x64xf32>, vector<64x64xf32>, vector<16x64xf32> -> vector<16x64xf32>
    %c0_177 = arith.constant 0 : index
    %c0_178 = arith.constant 0 : index
    %627 = vector.load %arg14[%c0_177, %c0_178] : memref<1x64xf32, #tpu.memory_space<vmem>>, vector<1x64xf32>
    %628 = vector.broadcast %627 : vector<1x64xf32> to vector<16x64xf32>
    %629 = arith.addf %626, %628 : vector<16x64xf32>
    %630 = arith.addf %573, %629 : vector<16x64xf32>
    %cst_179 = arith.constant dense<0.000000e+00> : vector<16xf32>
    %631 = vector.multi_reduction <add>, %630, %cst_179 [1] : vector<16x64xf32> to vector<16xf32>
    %632 = vector.shape_cast %631 : vector<16xf32> to vector<16x1xf32>
    %cst_180 = arith.constant 1.562500e-02 : f32
    %633 = vector.broadcast %cst_180 : f32 to vector<16x1xf32>
    %634 = arith.mulf %632, %633 : vector<16x1xf32>
    %635 = arith.mulf %630, %630 : vector<16x64xf32>
    %cst_181 = arith.constant dense<0.000000e+00> : vector<16xf32>
    %636 = vector.multi_reduction <add>, %635, %cst_181 [1] : vector<16x64xf32> to vector<16xf32>
    %637 = vector.shape_cast %636 : vector<16xf32> to vector<16x1xf32>
    %cst_182 = arith.constant 1.562500e-02 : f32
    %638 = vector.broadcast %cst_182 : f32 to vector<16x1xf32>
    %639 = arith.mulf %637, %638 : vector<16x1xf32>
    %640 = arith.mulf %634, %634 : vector<16x1xf32>
    %641 = arith.subf %639, %640 : vector<16x1xf32>
    %642 = vector.broadcast %634 : vector<16x1xf32> to vector<16x64xf32>
    %643 = arith.subf %630, %642 : vector<16x64xf32>
    %cst_183 = arith.constant 9.99999974E-6 : f32
    %644 = vector.broadcast %cst_183 : f32 to vector<16x1xf32>
    %645 = arith.addf %641, %644 : vector<16x1xf32>
    %646 = math.rsqrt %645 : vector<16x1xf32>
    %647 = vector.broadcast %646 : vector<16x1xf32> to vector<16x64xf32>
    %648 = arith.mulf %643, %647 : vector<16x64xf32>
    %c0_184 = arith.constant 0 : index
    %c0_185 = arith.constant 0 : index
    %649 = vector.load %arg15[%c0_184, %c0_185] : memref<1x64xf32, #tpu.memory_space<vmem>>, vector<1x64xf32>
    %650 = vector.broadcast %649 : vector<1x64xf32> to vector<16x64xf32>
    %651 = arith.mulf %648, %650 : vector<16x64xf32>
    %c0_186 = arith.constant 0 : index
    %c0_187 = arith.constant 0 : index
    %652 = vector.load %arg16[%c0_186, %c0_187] : memref<1x64xf32, #tpu.memory_space<vmem>>, vector<1x64xf32>
    %653 = vector.broadcast %652 : vector<1x64xf32> to vector<16x64xf32>
    %654 = arith.addf %651, %653 : vector<16x64xf32>
    %655 = vector.shape_cast %654 : vector<16x64xf32> to vector<2x8x64xf32>
    %c0_188 = arith.constant 0 : index
    %c0_189 = arith.constant 0 : index
    %c0_190 = arith.constant 0 : index
    %656 = vector.load %arg17[%c0_188, %c0_189, %c0_190] : memref<2x8x64xf32, #tpu.memory_space<vmem>>, vector<2x8x64xf32>
    tpu.vector_store %arg17[%c0_188, %c0_189, %c0_190], %655 {strides = array<i32>} : memref<2x8x64xf32, #tpu.memory_space<vmem>>, vector<2x8x64xf32>,
    return
  }
}

</mosaic_0001>

<bundles_post_ra>
// kernel: audio_encoder_forward.1
= control target key start
LH: loop header
LB: loop body
LE: loop exit
PB: predicated region body
PF: predicated region fallthrough
CT: control target
= control target key end

     0   :  { %s6681_s0 = inlined_call_operand.vmem [shape: f32[2,8,16], index: 0, kind: input, shape index: {}]   ;;  %s6682_s1 = inlined_call_operand.vmem [shape: f32[16,256], index: 1, kind: input, shape index: {}]   ;;  %s6683_s2 = inlined_call_operand.vmem [shape: f32[64,256], index: 2, kind: input, shape index: {}]   ;;  %s6684_s3 = inlined_call_operand.vmem [shape: f32[1,256], index: 3, kind: input, shape index: {}]   ;;  %s6685_s4 = inlined_call_operand.vmem [shape: f32[64,256], index: 4, kind: input, shape index: {}]   ;;  %s6686_s5 = inlined_call_operand.vmem [shape: f32[64,256], index: 5, kind: input, shape index: {}]   ;;  %s6687_s6 = inlined_call_operand.vmem [shape: f32[1,256], index: 6, kind: input, shape index: {}]   ;;  %s6688_s7 = inlined_call_operand.vmem [shape: f32[64,64], index: 7, kind: input, shape index: {}]   ;;  %s6689_s8 = inlined_call_operand.vmem [shape: f32[64,64], index: 8, kind: input, shape index: {}]   ;;  %s6690_s9 = inlined_call_operand.vmem [shape: f32[64,64], index: 9, kind: input, shape index: {}]   ;;  %s6691_s10 = inlined_call_operand.vmem [shape: f32[1,64], index: 10, kind: input, shape index: {}]   ;;  %s6692_s11 = inlined_call_operand.vmem [shape: f32[1,64], index: 11, kind: input, shape index: {}]   ;;  %s6693_s12 = inlined_call_operand.vmem [shape: f32[1,64], index: 12, kind: input, shape index: {}]   ;;  %s6694_s13 = inlined_call_operand.vmem [shape: f32[64,64], index: 13, kind: input, shape index: {}]   ;;  %s6695_s14 = inlined_call_operand.vmem [shape: f32[1,64], index: 14, kind: input, shape index: {}]   ;;  %s6696_s15 = inlined_call_operand.vmem [shape: f32[1,64], index: 15, kind: input, shape index: {}]   ;;  %s6697_s16 = inlined_call_operand.vmem [shape: f32[1,64], index: 16, kind: input, shape index: {}]   ;;  %s6698_s17 = inlined_call_operand.hbm [shape: f32[2,8,64], index: 17, kind: output, shape index: {}]  }
   0x1   :  { %6702 = sst [smem:[#allocation7_spill]] %s6681_s0 }
   0x2   :  { %6703 = sst [smem:[#allocation8_spill]] %s6682_s1 }
   0x3   :  { %s6704_s26 = sld [smem:[#allocation8_spill]]  ;;  %v5211_v1 = vld [vmem:[%s6683_s2 + $0x78] sm:$0xff]  ;;  %v5220_v3 = vld [vmem:[%s6683_s2 + $0x70] sm:$0xff]  ;;  %v5228_v5 = vld [vmem:[%s6683_s2 + $0x68] sm:$0xff]  ;;  %vm91_vm0 = vcmask 130048   ;;  %v5102_v10 = vmov 0.0  }
   0x4   :  { %224 = vmatprep.subr.mxu1 %v5211_v1  ;;  %v5237_v7 = vld [vmem:[%s6683_s2 + $0x60] sm:$0xff]  ;;  %s6705_s29 = sld [smem:[#allocation7_spill]]  ;;  %v5246_v9 = vld [vmem:[%s6683_s2 + $0x58] sm:$0xff]  ;;  %162 = vmatprep.mubr.f32.mxu0 %v5102_v10  ;;  %v5252_v11 = vld [vmem:[%s6683_s2 + $0x50] sm:$0xff] }
   0x5   :  { %225 = vmatpush1.msra.mxu1 %v5220_v3  ;;  %v5259_v12 = vld [vmem:[%s6683_s2 + $0x48] sm:$0xff]  ;;  %v5266_v13 = vld [vmem:[%s6683_s2 + $0x40] sm:$0xff]  ;;  %v5275_v15 = vld [vmem:[%s6683_s2 + $0x38] sm:$0xff]  ;;  %272 = vmatprep.mubr.f32.mxu1 %v5102_v10 }
   0x6   :  { %226 = vmatprep.subr.mxu1 %v5228_v5 }
   0x7   :  { %227 = vmatpush1.msra.mxu1 %v5237_v7 }
   0x8   :  { %228 = vmatprep.subr.mxu1 %v5246_v9 }
   0x9   :  { %v62_v0 = vld [vmem:[%s6704_s26 + $0x18] sm:$0xff]  ;;  %v61_v2 = vld [vmem:[%s6704_s26 + $0x10] sm:$0xff]  ;;  %v60_v4 = vld [vmem:[%s6704_s26 + $0x8] sm:$0xff]  ;;  %229 = vmatpush1.msra.mxu1 %v5252_v11 }
   0xa   :  { %126 = vmatprep.subr.mxu0 %v62_v0  ;;  %v59_v6 = vld [vmem:[%s6704_s26] sm:$0xff]  ;;  %v58_v14 = vld [vmem:[%s6705_s29 + $0x8] sm:$0xff] }
   0xb   :  { %127 = vmatpush1.msra.mxu0 %v61_v2  ;;  %v57_v8 = vld [vmem:[%s6705_s29] sm:$0xff] }
   0xc   :  { %128 = vmatprep.subr.mxu0 %v60_v4 }
   0xd   :  { %129 = vmatpush1.msra.mxu0 %v59_v6 }
   0xe   :  { %4523 = vmatmul.mubr.msk.f32.vlgmr.msra.gmra.mxu0 %vm91_vm0, %v57_v8 }
   0xf   :  { %168 = vmatprep.mubr.f32.mxu0 %v5102_v10 }
  0x10   :  { %22 = vsyncpa [#allocation5], 0  ;;  %230 = vmatprep.subr.mxu1 %v5259_v12  ;;  %v5282_v16 = vld [vmem:[%s6683_s2 + $0x30] sm:$0xff]  ;;  %391 = vmatprep.subr.mxu0 %v5211_v1  ;;  %v5290_v17 = vld [vmem:[%s6683_s2 + $0x28] sm:$0xff]  ;;  %v81_v23 = vlaneseq  ;;  %vm289_vm3 = vcmask 1041409   ;;  %vm204_vm4 = vcmask 523264  }
  0x11   :  { %231 = vmatpush1.msra.mxu1 %v5266_v13  ;;  %v5296_v18 = vld [vmem:[%s6683_s2 + $0x20] sm:$0xff]  ;;  %392 = vmatpush1.msra.mxu0 %v5220_v3  ;;  %v5303_v19 = vld [vmem:[%s6683_s2 + $0x18] sm:$0xff]  ;;  %v5310_v20 = vld [vmem:[%s6683_s2 + $0x10] sm:$0xff]  ;;  %vm365_vm5 = vcmask 253952   ;;  %vm368_vm6 = vcmask 516352   ;;  %vm5105_vm7 = vmmov 0  }
  0x12   :  { %4524 = vmatmul.mubr.msk.f32.gmra.mxu0 %vm91_vm0, %v58_v14  ;;  %232 = vmatprep.subr.mxu1 %v5275_v15  ;;  %v5317_v21 = vld [vmem:[%s6683_s2 + $0x8] sm:$0xff]  ;;  %v5324_v22 = vld [vmem:[%s6683_s2] sm:$0xff]  ;;  %v5361_v24 = vshrl.u32 %v81_v23, 7  ;;  %v176_v25 = vand.u32 127, %v81_v23  ;;  %s5106_s1 = smov 112   ;;  %vm3654_vm8 = vcmask 64512  }
  0x13   :  { %233 = vmatpush1.msra.mxu1 %v5282_v16  ;;  %393 = vmatprep.subr.mxu0 %v5228_v5  ;;  %v79_v27 = vld [vmem:[%s6684_s3] sm:$0x3]  ;;  %s5103_s3 = smov 64   ;;  %s5109_s28 = smov 16   ;;  %vm4353_vm9 = vcmask 261120   ;;  %vm4356_vm10 = vcmask 392192  }
  0x14   :  { %234 = vmatprep.subr.mxu1 %v5290_v17  ;;  %394 = vmatpush1.msra.mxu0 %v5237_v7  ;;  %v5364_v26 = vsub.s32 0, %v5361_v24  ;;  %v6701_v28 = vsub.s32 1, %v5361_v24  ;;  %v177_v29 = vadd.s32 128, %v176_v25  ;;  %v182_v31 = vand.u32 63, %v176_v25  ;;  %s5110_s26 = smov 32   ;;  %s5111_s18 = smov 48  }
  0x15   :  { %235 = vmatpush1.msra.mxu1 %v5296_v18  ;;  %395 = vmatprep.subr.mxu0 %v5246_v9 }
  0x16   :  { %236 = vmatprep.subr.mxu1 %v5303_v19  ;;  %396 = vmatpush1.msra.mxu0 %v5252_v11  ;;  %v84_v30 = vrot.slane %v79_v27, %v5364_v26  ;;  %v88_v32 = vrot.slane %v79_v27, %v6701_v28  ;;  %v189_v33 = vand.u32 63, %v177_v29  ;;  %vm5375_vm1 = vcmp.ge.s32.totalorder %v182_v31, 32 }
  0x17   :  { %237 = vmatpush1.msra.mxu1 %v5310_v20  ;;  %397 = vmatprep.subr.mxu0 %v5259_v12 }
  0x18   :  { %238 = vmatprep.subr.mxu1 %v5317_v21  ;;  %398 = vmatpush1.msra.mxu0 %v5266_v13  ;;  %vm5381_vm2 = vcmp.ge.s32.totalorder %v189_v33, 32 }
  0x19   :  { %239 = vmatpush1.msra.mxu1 %v5324_v22  ;;  %399 = vmatprep.subr.mxu0 %v5275_v15 }
  0x1a   :  { %273 = vmatmul.mubr.f32.vlgmr.msra.gmra.mxu1 %v5102_v10  ;;  %400 = vmatpush1.msra.mxu0 %v5282_v16 }
  0x1b   :  { %401 = vmatprep.subr.mxu0 %v5290_v17  ;;  %439 = vmatprep.mubr.f32.mxu0 %v5102_v10 }
  0x1c   :  { %402 = vmatpush1.msra.mxu0 %v5296_v18  ;;  %547 = vmatprep.subr.mxu1 %v5211_v1 }
  0x1d   :  { %403 = vmatprep.subr.mxu0 %v5303_v19  ;;  %548 = vmatpush1.msra.mxu1 %v5220_v3 }
  0x1e   :  { %404 = vmatpush1.msra.mxu0 %v5310_v20  ;;  %549 = vmatprep.subr.mxu1 %v5228_v5 }
  0x1f   :  { %405 = vmatprep.subr.mxu0 %v5317_v21  ;;  %550 = vmatpush1.msra.mxu1 %v5237_v7 }
  0x20   :  { %406 = vmatpush1.msra.mxu0 %v5324_v22  ;;  %551 = vmatprep.subr.mxu1 %v5246_v9 }
  0x21   :  { %552 = vmatpush1.msra.mxu1 %v5252_v11  ;;  %595 = vmatprep.mubr.f32.mxu1 %v5102_v10 }
  0x22   :  { %553 = vmatprep.subr.mxu1 %v5259_v12  ;;  %705 = vmatprep.subr.mxu0 %v5211_v1 }
  0x23   :  { %554 = vmatpush1.msra.mxu1 %v5266_v13 }
  0x24   :  { %555 = vmatprep.subr.mxu1 %v5275_v15 }
  0x25   :  { %556 = vmatpush1.msra.mxu1 %v5282_v16 }
  0x26   :  { %557 = vmatprep.subr.mxu1 %v5290_v17 }
  0x27   :  { %558 = vmatpush1.msra.mxu1 %v5296_v18 }
  0x28   :  { %559 = vmatprep.subr.mxu1 %v5303_v19 }
  0x29   :  { %560 = vmatpush1.msra.mxu1 %v5310_v20 }
  0x2a   :  { %561 = vmatprep.subr.mxu1 %v5317_v21 }
  0x2b   :  { %562 = vmatpush1.msra.mxu1 %v5324_v22 }
  0x2c   :  { %863 = vmatprep.subr.mxu1 %v5211_v1 }
  0xce   :  { %v164_v34 = vpop.f32.mrf.mxu0 }
  0xcf   :  { %v5373_v35 = vadd.f32 %v164_v34, %v84_v30 }
  0xd0   :  { %v166_v36 = vpop.f32.mrf.mxu0 }
  0xd1   :  { %v5379_v38 = vadd.f32 %v166_v36, %v88_v32  ;;  %v287_v40 = vrot.slane %v5373_v35, 7  ;;  %v446_v42 = vrot.slane %v5373_v35, 6  ;;  %v454_v43 = vrot.slane %v5373_v35, 1 }
  0xd2   :  { %v170_v41 = vpop.f32.mrf.mxu0  ;;  %v602_v44 = vrot.slane %v5373_v35, 5  ;;  %v610_v45 = vrot.slane %v5373_v35, 2  ;;  %v760_v48 = vrot.slane %v5373_v35, 4  ;;  %v768_v49 = vrot.slane %v5373_v35, 3 }
  0xd3   :  { %v171_v46 = vadd.f32 %v170_v41, %v84_v30  ;;  %v291_v47 = vrot.slane %v5379_v38, 7  ;;  %v449_v51 = vrot.slane %v5379_v38, 6  ;;  %v456_v52 = vrot.slane %v5379_v38, 1 }
  0xd4   :  { %v172_v50 = vpop.f32.mrf.mxu0  ;;  %v605_v53 = vrot.slane %v5379_v38, 5  ;;  %v613_v54 = vrot.slane %v5379_v38, 2  ;;  %v763_v62 = vrot.slane %v5379_v38, 4  ;;  %v771_v23 = vrot.slane %v5379_v38, 3 }
  0xd5   :  { %v173_v55 = vadd.f32 %v172_v50, %v88_v32  ;;  %v288_v56 = vrot.slane %v171_v46, 6  ;;  %v296_v57 = vrot.slane %v171_v46, 7  ;;  %v447_v58 = vrot.slane %v171_v46, 5 }
  0xd6   :  { %v5398_v59 = vsel %vm289_vm3, %v171_v46, %v454_v43  ;;  %v603_v60 = vrot.slane %v171_v46, 4  ;;  %v611_v61 = vrot.slane %v171_v46, 1  ;;  %v761_v4 = vrot.slane %v171_v46, 3 }
  0xd7   :  { %v5402_v63 = vsel %vm289_vm3, %v288_v56, %v287_v40  ;;  %v5406_v0 = vsel %vm289_vm3, %v296_v57, %v5373_v35  ;;  %v292_v2 = vrot.slane %v173_v55, 6  ;;  %v5409_v6 = vsel %vm289_vm3, %v447_v58, %v446_v42 }
  0xd8   :  { %v450_v8 = vrot.slane %v173_v55, 5  ;;  %v5412_v14 = vsel %vm289_vm3, %v173_v55, %v456_v52  ;;  %v302_v25 = vsel %vm5375_vm1, %v5402_v63, %v5406_v0  ;;  %v298_v27 = vrot.slane %v173_v55, 7 }
  0xd9   :  { %v460_v29 = vsel %vm5375_vm1, %v5409_v6, %v5398_v59  ;;  %v5424_v30 = vsel %vm289_vm3, %v603_v60, %v602_v44  ;;  %v5427_v31 = vsel %vm289_vm3, %v292_v2, %v291_v47  ;;  %v5433_v33 = vsel %vm289_vm3, %v611_v61, %v610_v45 }
  0xda   :  { %v5430_v32 = vsel %vm289_vm3, %v450_v8, %v449_v51  ;;  %v606_v34 = vrot.slane %v173_v55, 4  ;;  %v274_v35 = vpop.f32.mrf.mxu1  ;;  %v618_v40 = vsel %vm5375_vm1, %v5424_v30, %v5433_v33  ;;  %v614_v41 = vrot.slane %v173_v55, 1 }
  0xdb   :  { %v461_v36 = vsel %vm5381_vm2, %v5430_v32, %v5412_v14  ;;  %v5444_v42 = vsel %vm289_vm3, %v761_v4, %v760_v48  ;;  %v304_v43 = vadd.f32 %v302_v25, %v274_v35  ;;  %v769_v45 = vrot.slane %v171_v46, 2 }
  0xdc   :  { %v5447_v44 = vsel %vm289_vm3, %v606_v34, %v605_v53  ;;  %v764_v47 = vrot.slane %v173_v55, 3  ;;  %v5450_v50 = vsel %vm289_vm3, %v614_v41, %v613_v54  ;;  %v772_v51 = vrot.slane %v173_v55, 2  ;;  %v276_v8 = vpop.f32.mrf.mxu1 }
  0xdd   :  { %v1060_v52 = vsel %vm5375_vm1, %v5433_v33, %v5424_v30  ;;  %v1202_v48 = vsel %vm5375_vm1, %v5398_v59, %v5409_v6  ;;  %v4525_v56 = vmul.f32 -1.442695, %v304_v43  ;;  %v5462_v53 = vsel %vm289_vm3, %v298_v27, %v5379_v38 }
  0xde   :  { %v619_v46 = vsel %vm5381_vm2, %v5447_v44, %v5450_v50  ;;  %v5469_v54 = vsel %vm289_vm3, %v769_v45, %v768_v49  ;;  %v5476_v57 = vsel %vm289_vm3, %v764_v47, %v763_v62  ;;  %v5479_v58 = vsel %vm289_vm3, %v772_v51, %v771_v23 }
  0xdf   :  { %v776_v55 = vsel %vm5375_vm1, %v5444_v42, %v5469_v54  ;;  %v918_v38 = vsel %vm5375_vm1, %v5469_v54, %v5444_v42  ;;  %4852 = vpow2.f32 %v4525_v56  ;;  %v777_v49 = vsel %vm5381_vm2, %v5476_v57, %v5479_v58 }
  0xe0   :  { %v919_v60 = vsel %vm5381_vm2, %v5479_v58, %v5476_v57  ;;  %v1061_v61 = vsel %vm5381_vm2, %v5450_v50, %v5447_v44  ;;  %v1203_v62 = vsel %vm5381_vm2, %v5412_v14, %v5430_v32  ;;  %v303_v23 = vsel %vm5381_vm2, %v5427_v31, %v5462_v53 }
  0xe1   :  { %v305_v25 = vadd.f32 %v303_v23, %v276_v8 }
  0xe3   :  { %4854 = vtanh.f32 %v305_v25  ;;  %v4526_v45 = vmul.f32 -1.442695, %v305_v25 }
  0xec   :  { %v4853_v27 = vpop.eup %4852 }
  0xed   :  { %v312_v34 = vadd.f32 1.0, %v4853_v27 }
  0xef   :  { %4856 = vrcp.f32 %v312_v34 }
  0xf0   :  { %v4855_v35 = vpop.eup %4854  ;;  %4858 = vpow2.f32 %v4526_v45 }
  0xfc   :  { %v4857_v41 = vpop.eup %4856 }
  0xfd   :  { %v320_v43 = vmul.f32 %v4857_v41, %v4855_v35  ;;  %v4859_v47 = vpop.eup %4858  ;;  %v319_v56 = vmul.f32 0.0, %v4857_v41 }
  0xfe   :  { %v313_v51 = vadd.f32 1.0, %v4859_v47 }
  0xff   :  { %322 = vrot.lane.b32.xlu0 %v320_v43, %s5103_s3 }
 0x100   :  { %4860 = vrcp.f32 %v313_v51 }
 0x10d   :  { %v4861_v8 = vpop.eup %4860 }
 0x171   :  { %v323_v28 = vpop.permute.xlu0 %322 }
 0x172   :  { %v325_v4 = vadd.f32 %v323_v28, %v319_v56 }
 0x174   :  { %4862 = vtanh.f32 %v325_v4 }
 0x181   :  { %v4863_v23 = vpop.eup %4862 }
 0x182   :  { %v5514_v27 = vmul.f32 %v4863_v23, %v4861_v8 }
 0x184   :  { %371 = vrot.lane.b32.xlu0 %v5514_v27, %s5103_s3 }
 0x1f6   :  { %v372_v34 = vpop.permute.xlu0 %371 }
 0x1f7   :  { %4527 = vmatmul.mubr.msk.f32.vlgmr.msra.gmra.mxu0 %vm204_vm4, %v372_v34 }
 0x1f8   :  { %706 = vmatpush1.msra.mxu0 %v5220_v3  ;;  %753 = vmatprep.mubr.f32.mxu0 %v5102_v10 }
 0x1f9   :  { %707 = vmatprep.subr.mxu0 %v5228_v5 }
 0x1fa   :  { %708 = vmatpush1.msra.mxu0 %v5237_v7 }
 0x1fb   :  { %709 = vmatprep.subr.mxu0 %v5246_v9 }
 0x1fc   :  { %710 = vmatpush1.msra.mxu0 %v5252_v11 }
 0x1fd   :  { %711 = vmatprep.subr.mxu0 %v5259_v12 }
 0x1fe   :  { %712 = vmatpush1.msra.mxu0 %v5266_v13 }
 0x1ff   :  { %713 = vmatprep.subr.mxu0 %v5275_v15 }
 0x200   :  { %714 = vmatpush1.msra.mxu0 %v5282_v16 }
 0x201   :  { %715 = vmatprep.subr.mxu0 %v5290_v17 }
 0x202   :  { %716 = vmatpush1.msra.mxu0 %v5296_v18 }
 0x203   :  { %717 = vmatprep.subr.mxu0 %v5303_v19 }
 0x204   :  { %718 = vmatpush1.msra.mxu0 %v5310_v20 }
 0x205   :  { %719 = vmatprep.subr.mxu0 %v5317_v21 }
 0x206   :  { %720 = vmatpush1.msra.mxu0 %v5324_v22 }
 0x207   :  { %1005 = vmatprep.subr.mxu0 %v5211_v1 }
 0x2b7   :  { %v441_v28 = vpop.f32.mrf.mxu0 }
 0x2b8   :  { %v462_v25 = vadd.f32 %v460_v29, %v441_v28 }
 0x2b9   :  { %v443_v41 = vpop.f32.mrf.mxu0 }
 0x2ba   :  { %v4528_v35 = vmul.f32 -1.442695, %v462_v25  ;;  %v463_v43 = vadd.f32 %v461_v36, %v443_v41 }
 0x2bc   :  { %4864 = vpow2.f32 %v4528_v35  ;;  %v4529_v23 = vmul.f32 -1.442695, %v463_v43 }
 0x2bd   :  { %4866 = vtanh.f32 %v463_v43 }
 0x2c9   :  { %v4865_v45 = vpop.eup %4864 }
 0x2ca   :  { %v470_v47 = vadd.f32 1.0, %v4865_v45  ;;  %v4867_v51 = vpop.eup %4866 }
 0x2cc   :  { %4868 = vrcp.f32 %v470_v47 }
 0x2cd   :  { %4870 = vpow2.f32 %v4529_v23 }
 0x2d9   :  { %v4869_v56 = vpop.eup %4868 }
 0x2da   :  { %v478_v8 = vmul.f32 %v4869_v56, %v4867_v51  ;;  %v4871_v29 = vpop.eup %4870  ;;  %v477_v28 = vmul.f32 %v4869_v56, %v325_v4 }
 0x2db   :  { %v471_v34 = vadd.f32 1.0, %v4871_v29 }
 0x2dc   :  { %480 = vrot.lane.b32.xlu1 %v478_v8, %s5103_s3 }
 0x2dd   :  { %4872 = vrcp.f32 %v471_v34 }
 0x2ea   :  { %v4873_v2 = vpop.eup %4872 }
 0x34e   :  { %v481_v25 = vpop.permute.xlu1 %480 }
 0x34f   :  { %v483_v35 = vadd.f32 %v481_v25, %v477_v28 }
 0x351   :  { %4874 = vtanh.f32 %v483_v35 }
 0x35e   :  { %v4875_v36 = vpop.eup %4874 }
 0x35f   :  { %v5547_v41 = vmul.f32 %v4875_v36, %v4873_v2 }
 0x361   :  { %527 = vrot.lane.b32.xlu1 %v5547_v41, %s5103_s3 }
 0x3d3   :  { %v528_v45 = vpop.permute.xlu1 %527 }
 0x3d4   :  { %4530 = vmatmul.mubr.msk.f32.vlgmr.msra.gmra.mxu1 %vm204_vm4, %v528_v45 }
 0x3d5   :  { %864 = vmatpush1.msra.mxu1 %v5220_v3  ;;  %911 = vmatprep.mubr.f32.mxu1 %v5102_v10 }
 0x3d6   :  { %865 = vmatprep.subr.mxu1 %v5228_v5 }
 0x3d7   :  { %866 = vmatpush1.msra.mxu1 %v5237_v7 }
 0x3d8   :  { %867 = vmatprep.subr.mxu1 %v5246_v9 }
 0x3d9   :  { %868 = vmatpush1.msra.mxu1 %v5252_v11 }
 0x3da   :  { %869 = vmatprep.subr.mxu1 %v5259_v12 }
 0x3db   :  { %870 = vmatpush1.msra.mxu1 %v5266_v13 }
 0x3dc   :  { %871 = vmatprep.subr.mxu1 %v5275_v15 }
 0x3dd   :  { %872 = vmatpush1.msra.mxu1 %v5282_v16 }
 0x3de   :  { %873 = vmatprep.subr.mxu1 %v5290_v17 }
 0x3df   :  { %874 = vmatpush1.msra.mxu1 %v5296_v18 }
 0x3e0   :  { %875 = vmatprep.subr.mxu1 %v5303_v19 }
 0x3e1   :  { %876 = vmatpush1.msra.mxu1 %v5310_v20 }
 0x3e2   :  { %877 = vmatprep.subr.mxu1 %v5317_v21 }
 0x3e3   :  { %878 = vmatpush1.msra.mxu1 %v5324_v22 }
 0x3e4   :  { %1147 = vmatprep.subr.mxu1 %v5211_v1 }
 0x494   :  { %v597_v2 = vpop.f32.mrf.mxu1 }
 0x495   :  { %v620_v4 = vadd.f32 %v618_v40, %v597_v2 }
 0x496   :  { %v599_v47 = vpop.f32.mrf.mxu1 }
 0x497   :  { %v4531_v43 = vmul.f32 -1.442695, %v620_v4  ;;  %v621_v51 = vadd.f32 %v619_v46, %v599_v47 }
 0x499   :  { %4876 = vpow2.f32 %v4531_v43  ;;  %v4532_v28 = vmul.f32 -1.442695, %v621_v51 }
 0x49a   :  { %4878 = vtanh.f32 %v621_v51 }
 0x4a6   :  { %v4877_v56 = vpop.eup %4876 }
 0x4a7   :  { %v628_v8 = vadd.f32 1.0, %v4877_v56  ;;  %v4879_v23 = vpop.eup %4878 }
 0x4a9   :  { %4880 = vrcp.f32 %v628_v8 }
 0x4aa   :  { %4882 = vpow2.f32 %v4532_v28 }
 0x4b6   :  { %v4881_v29 = vpop.eup %4880 }
 0x4b7   :  { %v636_v34 = vmul.f32 %v4881_v29, %v4879_v23  ;;  %v4883_v40 = vpop.eup %4882  ;;  %v635_v36 = vmul.f32 %v4881_v29, %v483_v35 }
 0x4b8   :  { %v629_v25 = vadd.f32 1.0, %v4883_v40 }
 0x4b9   :  { %638 = vrot.lane.b32.xlu0 %v636_v34, %s5103_s3 }
 0x4ba   :  { %4884 = vrcp.f32 %v629_v25 }
 0x4c7   :  { %v4885_v4 = vpop.eup %4884 }
 0x52b   :  { %v639_v45 = vpop.permute.xlu0 %638 }
 0x52c   :  { %v641_v2 = vadd.f32 %v639_v45, %v635_v36 }
 0x52e   :  { %4886 = vtanh.f32 %v641_v2 }
 0x53b   :  { %v4887_v46 = vpop.eup %4886 }
 0x53c   :  { %v5580_v43 = vmul.f32 %v4887_v46, %v4885_v4 }
 0x53e   :  { %685 = vrot.lane.b32.xlu1 %v5580_v43, %s5103_s3 }
 0x5b0   :  { %v686_v47 = vpop.permute.xlu1 %685 }
 0x5b1   :  { %4533 = vmatmul.mubr.msk.f32.vlgmr.msra.gmra.mxu0 %vm204_vm4, %v686_v47 }
 0x5b2   :  { %1006 = vmatpush1.msra.mxu0 %v5220_v3  ;;  %1053 = vmatprep.mubr.f32.mxu0 %v5102_v10 }
 0x5b3   :  { %1007 = vmatprep.subr.mxu0 %v5228_v5 }
 0x5b4   :  { %1008 = vmatpush1.msra.mxu0 %v5237_v7 }
 0x5b5   :  { %1009 = vmatprep.subr.mxu0 %v5246_v9 }
 0x5b6   :  { %1010 = vmatpush1.msra.mxu0 %v5252_v11 }
 0x5b7   :  { %1011 = vmatprep.subr.mxu0 %v5259_v12 }
 0x5b8   :  { %1012 = vmatpush1.msra.mxu0 %v5266_v13 }
 0x5b9   :  { %1013 = vmatprep.subr.mxu0 %v5275_v15 }
 0x5ba   :  { %1014 = vmatpush1.msra.mxu0 %v5282_v16 }
 0x5bb   :  { %1015 = vmatprep.subr.mxu0 %v5290_v17 }
 0x5bc   :  { %1016 = vmatpush1.msra.mxu0 %v5296_v18 }
 0x5bd   :  { %1017 = vmatprep.subr.mxu0 %v5303_v19 }
 0x5be   :  { %1018 = vmatpush1.msra.mxu0 %v5310_v20 }
 0x5bf   :  { %1019 = vmatprep.subr.mxu0 %v5317_v21 }
 0x5c0   :  { %1020 = vmatpush1.msra.mxu0 %v5324_v22 }
 0x5c1   :  { %1289 = vmatprep.subr.mxu0 %v5211_v1 }
 0x671   :  { %v755_v35 = vpop.f32.mrf.mxu0 }
 0x672   :  { %v778_v51 = vadd.f32 %v776_v55, %v755_v35 }
 0x673   :  { %v757_v8 = vpop.f32.mrf.mxu0 }
 0x674   :  { %v4534_v56 = vmul.f32 -1.442695, %v778_v51  ;;  %v779_v23 = vadd.f32 %v777_v49, %v757_v8 }
 0x676   :  { %4888 = vpow2.f32 %v4534_v56  ;;  %v4535_v25 = vmul.f32 -1.442695, %v779_v23 }
 0x677   :  { %4890 = vtanh.f32 %v779_v23 }
 0x683   :  { %v4889_v29 = vpop.eup %4888 }
 0x684   :  { %v786_v34 = vadd.f32 1.0, %v4889_v29  ;;  %v4891_v1 = vpop.eup %4890 }
 0x686   :  { %4892 = vrcp.f32 %v786_v34 }
 0x687   :  { %4894 = vpow2.f32 %v4535_v25 }
 0x693   :  { %v4893_v28 = vpop.eup %4892 }
 0x694   :  { %v794_v40 = vmul.f32 %v4893_v28, %v4891_v1  ;;  %v4895_v55 = vpop.eup %4894  ;;  %v793_v45 = vmul.f32 %v4893_v28, %v641_v2 }
 0x695   :  { %v787_v36 = vadd.f32 1.0, %v4895_v55 }
 0x696   :  { %796 = vrot.lane.b32.xlu0 %v794_v40, %s5103_s3 }
 0x697   :  { %4896 = vrcp.f32 %v787_v36 }
 0x6a4   :  { %v4897_v47 = vpop.eup %4896 }
 0x708   :  { %v797_v4 = vpop.permute.xlu0 %796 }
 0x709   :  { %v799_v46 = vadd.f32 %v797_v4, %v793_v45 }
 0x70b   :  { %4898 = vtanh.f32 %v799_v46 }
 0x718   :  { %v4899_v49 = vpop.eup %4898 }
 0x719   :  { %v5613_v35 = vmul.f32 %v4899_v49, %v4897_v47 }
 0x71b   :  { %843 = vrot.lane.b32.xlu1 %v5613_v35, %s5103_s3 }
 0x78d   :  { %v844_v51 = vpop.permute.xlu1 %843 }
 0x78e   :  { %4536 = vmatmul.mubr.msk.f32.vlgmr.msra.gmra.mxu1 %vm204_vm4, %v844_v51 }
 0x78f   :  { %1148 = vmatpush1.msra.mxu1 %v5220_v3  ;;  %1195 = vmatprep.mubr.f32.mxu1 %v5102_v10 }
 0x790   :  { %1149 = vmatprep.subr.mxu1 %v5228_v5 }
 0x791   :  { %1150 = vmatpush1.msra.mxu1 %v5237_v7 }
 0x792   :  { %1151 = vmatprep.subr.mxu1 %v5246_v9 }
 0x793   :  { %1152 = vmatpush1.msra.mxu1 %v5252_v11 }
 0x794   :  { %1153 = vmatprep.subr.mxu1 %v5259_v12 }
 0x795   :  { %1154 = vmatpush1.msra.mxu1 %v5266_v13 }
 0x796   :  { %1155 = vmatprep.subr.mxu1 %v5275_v15 }
 0x797   :  { %1156 = vmatpush1.msra.mxu1 %v5282_v16 }
 0x798   :  { %1157 = vmatprep.subr.mxu1 %v5290_v17 }
 0x799   :  { %1158 = vmatpush1.msra.mxu1 %v5296_v18 }
 0x79a   :  { %1159 = vmatprep.subr.mxu1 %v5303_v19 }
 0x79b   :  { %1160 = vmatpush1.msra.mxu1 %v5310_v20 }
 0x79c   :  { %1161 = vmatprep.subr.mxu1 %v5317_v21 }
 0x79d   :  { %1162 = vmatpush1.msra.mxu1 %v5324_v22 }
 0x84e   :  { %v913_v2 = vpop.f32.mrf.mxu1 }
 0x84f   :  { %v920_v56 = vadd.f32 %v918_v38, %v913_v2 }
 0x850   :  { %v915_v23 = vpop.f32.mrf.mxu1 }
 0x851   :  { %v4537_v8 = vmul.f32 -1.442695, %v920_v56  ;;  %v921_v29 = vadd.f32 %v919_v60, %v915_v23 }
 0x853   :  { %4900 = vpow2.f32 %v4537_v8  ;;  %v4538_v42 = vmul.f32 -1.442695, %v921_v29 }
 0x854   :  { %4902 = vtanh.f32 %v921_v29 }
 0x860   :  { %v4901_v34 = vpop.eup %4900 }
 0x861   :  { %v928_v1 = vadd.f32 1.0, %v4901_v34  ;;  %v4903_v28 = vpop.eup %4902 }
 0x863   :  { %4904 = vrcp.f32 %v928_v1 }
 0x864   :  { %4906 = vpow2.f32 %v4538_v42 }
 0x870   :  { %v4905_v40 = vpop.eup %4904 }
 0x871   :  { %v936_v25 = vmul.f32 %v4905_v40, %v4903_v28  ;;  %v4907_v54 = vpop.eup %4906  ;;  %v935_v55 = vmul.f32 %v4905_v40, %v799_v46  ;;  %v5104_v28 = vmov 1966171168  }
 0x872   :  { %v929_v38 = vadd.f32 1.0, %v4907_v54  ;;  %v330_v40 = vunpack.c.l.s4 %v5104_v28 }
 0x873   :  { %938 = vrot.lane.b32.xlu0 %v936_v25, %s5103_s3 }
 0x874   :  { %4908 = vrcp.f32 %v929_v38  ;;  %v331_v14 = vunpack.c.0.s8 %v330_v40 }
 0x876   :  { %v5698_v32 = vsub.s32 %v331_v14, %v5361_v24 }
 0x878   :  { %v651_v38 = vrot.slane %v5580_v43, %v5698_v32 }
 0x881   :  { %v4909_v57 = vpop.eup %4908 }
 0x8e5   :  { %v939_v36 = vpop.permute.xlu0 %938 }
 0x8e6   :  { %v941_v45 = vadd.f32 %v939_v36, %v935_v55 }
 0x8e8   :  { %4910 = vtanh.f32 %v941_v45 }
 0x8f5   :  { %v4911_v58 = vpop.eup %4910 }
 0x8f6   :  { %v5645_v60 = vmul.f32 %v4911_v58, %v4909_v57  ;;  %v659_v58 = vrot.slane %v651_v38, %v5698_v32 }
 0x8f8   :  { %985 = vrot.lane.b32.xlu1 %v5645_v60, %s5103_s3 }
 0x96a   :  { %v986_v4 = vpop.permute.xlu1 %985 }
 0x96b   :  { %4539 = vmatmul.mubr.msk.f32.vlgmr.msra.gmra.mxu0 %vm204_vm4, %v986_v4  ;;  %v670_v4 = vrot.slane %v659_v58, %v5364_v26  ;;  %v1424_v58 = vld [vmem:[%s6685_s4 + $0x58] sm:$0xff] }
 0x96c   :  { %1290 = vmatpush1.msra.mxu0 %v5220_v3  ;;  %1337 = vmatprep.mubr.f32.mxu0 %v5102_v10 }
 0x96d   :  { %1291 = vmatprep.subr.mxu0 %v5228_v5 }
 0x96e   :  { %1292 = vmatpush1.msra.mxu0 %v5237_v7 }
 0x96f   :  { %1293 = vmatprep.subr.mxu0 %v5246_v9 }
 0x970   :  { %1294 = vmatpush1.msra.mxu0 %v5252_v11 }
 0x971   :  { %1295 = vmatprep.subr.mxu0 %v5259_v12 }
 0x972   :  { %1296 = vmatpush1.msra.mxu0 %v5266_v13 }
 0x973   :  { %1297 = vmatprep.subr.mxu0 %v5275_v15 }
 0x974   :  { %1298 = vmatpush1.msra.mxu0 %v5282_v16 }
 0x975   :  { %1299 = vmatprep.subr.mxu0 %v5290_v17 }
 0x976   :  { %1300 = vmatpush1.msra.mxu0 %v5296_v18 }
 0x977   :  { %1301 = vmatprep.subr.mxu0 %v5303_v19 }
 0x978   :  { %1302 = vmatpush1.msra.mxu0 %v5310_v20 }
 0x979   :  { %1303 = vmatprep.subr.mxu0 %v5317_v21 }
 0x97a   :  { %1304 = vmatpush1.msra.mxu0 %v5324_v22 }
 0xa2b   :  { %v1055_v3 = vpop.f32.mrf.mxu0 }
 0xa2c   :  { %v1062_v5 = vadd.f32 %v1060_v52, %v1055_v3 }
 0xa2d   :  { %v1057_v9 = vpop.f32.mrf.mxu0 }
 0xa2e   :  { %v4540_v7 = vmul.f32 -1.442695, %v1062_v5  ;;  %v1063_v11 = vadd.f32 %v1061_v61, %v1057_v9 }
 0xa30   :  { %4912 = vpow2.f32 %v4540_v7  ;;  %v4541_v18 = vmul.f32 -1.442695, %v1063_v11 }
 0xa31   :  { %4914 = vtanh.f32 %v1063_v11  ;;  %v652_v11 = vcombine.high %v651_v38, %v651_v38 }
 0xa3d   :  { %v4913_v12 = vpop.eup %4912 }
 0xa3e   :  { %v1070_v13 = vadd.f32 1.0, %v4913_v12  ;;  %v4915_v15 = vpop.eup %4914 }
 0xa40   :  { %4916 = vrcp.f32 %v1070_v13  ;;  %v666_v13 = vrot.slane %v652_v11, %v5698_v32 }
 0xa41   :  { %4918 = vpow2.f32 %v4541_v18 }
 0xa4d   :  { %v4917_v16 = vpop.eup %4916 }
 0xa4e   :  { %v1078_v17 = vmul.f32 %v4917_v16, %v4915_v15  ;;  %v4919_v19 = vpop.eup %4918  ;;  %v1077_v21 = vmul.f32 %v4917_v16, %v941_v45  ;;  %v951_v45 = vrot.slane %v5645_v60, %v5698_v32  ;;  %v674_v16 = vrot.slane %v666_v13, %v5364_v26 }
 0xa4f   :  { %v1071_v20 = vadd.f32 1.0, %v4919_v19 }
 0xa50   :  { %1080 = vrot.lane.b32.xlu0 %v1078_v17, %s5103_s3  ;;  %v959_v43 = vrot.slane %v951_v45, %v5698_v32  ;;  %v952_v15 = vcombine.high %v951_v45, %v951_v45  ;;  %v1426_v45 = vld [vmem:[%s6685_s4 + $0x68] sm:$0xff] }
 0xa51   :  { %4920 = vrcp.f32 %v1071_v20 }
 0xa52   :  { %v970_v3 = vrot.slane %v959_v43, %v5364_v26  ;;  %v966_v17 = vrot.slane %v952_v15, %v5698_v32  ;;  %v1423_v43 = vld [vmem:[%s6685_s4 + $0x50] sm:$0xff] }
 0xa54   :  { %v974_v19 = vrot.slane %v966_v17, %v5364_v26 }
 0xa5e   :  { %v4921_v33 = vpop.eup %4920 }
 0xac2   :  { %v1081_v22 = vpop.permute.xlu0 %1080 }
 0xac3   :  { %v1083_v30 = vadd.f32 %v1081_v22, %v1077_v21 }
 0xac5   :  { %4922 = vtanh.f32 %v1083_v30 }
 0xad2   :  { %v4923_v44 = vpop.eup %4922 }
 0xad3   :  { %v5677_v50 = vmul.f32 %v4923_v44, %v4921_v33 }
 0xad5   :  { %1127 = vrot.lane.b32.xlu1 %v5677_v50, %s5103_s3 }
 0xb47   :  { %v1128_v52 = vpop.permute.xlu1 %1127 }
 0xb48   :  { %4542 = vmatmul.mubr.msk.f32.vlgmr.msra.gmra.mxu1 %vm204_vm4, %v1128_v52 }
 0xb49   :  { %1527 = vmatprep.mubr.f32.mxu1 %v5102_v10 }
 0xc08   :  { %v1197_v61 = vpop.f32.mrf.mxu1 }
 0xc09   :  { %v1204_v46 = vadd.f32 %v1202_v48, %v1197_v61 }
 0xc0a   :  { %v1199_v49 = vpop.f32.mrf.mxu1 }
 0xc0b   :  { %v4543_v47 = vmul.f32 -1.442695, %v1204_v46  ;;  %v1205_v51 = vadd.f32 %v1203_v62, %v1199_v49  ;;  %v335_v62 = vrot.slane %v5514_v27, %v5698_v32  ;;  %v6710_v49 = vsel %vm5375_vm1, %v5406_v0, %v5402_v63 }
 0xc0c   :  { %v809_v63 = vrot.slane %v5613_v35, %v5698_v32 }
 0xc0d   :  { %4924 = vpow2.f32 %v4543_v47  ;;  %v4544_v59 = vmul.f32 -1.442695, %v1205_v51  ;;  %v343_v36 = vrot.slane %v335_v62, %v5698_v32  ;;  %v336_v7 = vcombine.high %v335_v62, %v335_v62 }
 0xc0e   :  { %4926 = vtanh.f32 %v1205_v51  ;;  %v817_v28 = vrot.slane %v809_v63, %v5698_v32 }
 0xc0f   :  { %v354_v57 = vrot.slane %v343_v36, %v5364_v26  ;;  %v350_v9 = vrot.slane %v336_v7, %v5698_v32  ;;  %v1427_v36 = vld [vmem:[%s6685_s4 + $0x70] sm:$0xff] }
 0xc11   :  { %v358_v12 = vrot.slane %v350_v9, %v5364_v26 }
 0xc1a   :  { %v4925_v2 = vpop.eup %4924 }
 0xc1b   :  { %v1212_v56 = vadd.f32 1.0, %v4925_v2  ;;  %v4927_v8 = vpop.eup %4926 }
 0xc1d   :  { %4928 = vrcp.f32 %v1212_v56 }
 0xc1e   :  { %4930 = vpow2.f32 %v4544_v59 }
 0xc2a   :  { %v4929_v23 = vpop.eup %4928 }
 0xc2b   :  { %v1220_v29 = vmul.f32 %v4929_v23, %v4927_v8  ;;  %v4931_v6 = vpop.eup %4930  ;;  %v1219_v34 = vmul.f32 %v4929_v23, %v1083_v30  ;;  %v6711_v8 = vsel %vm5381_vm2, %v5462_v53, %v5427_v31  ;;  %v1093_v31 = vrot.slane %v5677_v50, %v5698_v32 }
 0xc2c   :  { %v1213_v48 = vadd.f32 1.0, %v4931_v6  ;;  %v493_v6 = vrot.slane %v5547_v41, %v5698_v32  ;;  %v828_v41 = vrot.slane %v817_v28, %v5364_v26 }
 0xc2d   :  { %1222 = vrot.lane.b32.xlu0 %v1220_v29, %s5103_s3  ;;  %v1101_v40 = vrot.slane %v1093_v31, %v5698_v32  ;;  %v1094_v38 = vcombine.high %v1093_v31, %v1093_v31  ;;  %v5910_v31 = vld [vmem:[%s6686_s5 + $0x28] sm:$0xff] }
 0xc2e   :  { %4932 = vrcp.f32 %v1213_v48  ;;  %v494_v14 = vcombine.high %v493_v6, %v493_v6 }
 0xc2f   :  { %v1112_v35 = vrot.slane %v1101_v40, %v5364_v26 }
 0xc30   :  { %v508_v62 = vrot.slane %v494_v14, %v5698_v32 }
 0xc32   :  { %v516_v50 = vrot.slane %v508_v62, %v5364_v26  ;;  %v5932_v62 = vld [vmem:[%s6686_s5 + $0x18] sm:$0xff] }
 0xc3b   :  { %v4933_v42 = vpop.eup %4932 }
 0xc9f   :  { %v1223_v1 = vpop.permute.xlu0 %1222 }
 0xca0   :  { %v5694_v25 = vadd.f32 %v1223_v1, %v1219_v34  ;;  %v501_v1 = vrot.slane %v493_v6, %v5698_v32  ;;  %v1413_v6 = vld [vmem:[%s6685_s4] sm:$0xff] }
 0xca2   :  { %4934 = vtanh.f32 %v5694_v25  ;;  %v512_v53 = vrot.slane %v501_v1, %v5364_v26  ;;  %v5905_v1 = vld [vmem:[%s6686_s5 + $0x30] sm:$0xff] }
 0xcaf   :  { %v4935_v54 = vpop.eup %4934 }
 0xcb0   :  { %v1227_v55 = vmul.f32 %v4935_v54, %v4933_v42  ;;  %v810_v42 = vcombine.high %v809_v63, %v809_v63 }
 0xcb2   :  { %1269 = vrot.lane.b32.xlu1 %v1227_v55, %s5103_s3  ;;  %v1235_v27 = vrot.slane %v1227_v55, %v5698_v32  ;;  %v824_v54 = vrot.slane %v810_v42, %v5698_v32  ;;  %v1428_v55 = vld [vmem:[%s6685_s4 + $0x78] sm:$0xff]  ;;  %v5937_v42 = vld [vmem:[%s6686_s5 + $0x10] sm:$0xff] }
 0xcb3   :  { %1479 = vmatprep.subr.mxu1 %v1428_v55 }
 0xcb4   :  { %v1243_v5 = vrot.slane %v1235_v27, %v5698_v32  ;;  %v1236_v18 = vcombine.high %v1235_v27, %v1235_v27  ;;  %1480 = vmatpush1.msra.mxu1 %v1427_v36  ;;  %v832_v27 = vrot.slane %v824_v54, %v5364_v26  ;;  %v5951_v54 = vld [vmem:[%s6686_s5] sm:$0xff] }
 0xcb5   :  { %1481 = vmatprep.subr.mxu1 %v1426_v45 }
 0xcb6   :  { %359 = vrot.lane.b32.xlu1 %v354_v57, %s5103_s3  ;;  %v1254_v60 = vrot.slane %v1243_v5, %v5364_v26  ;;  %v1250_v20 = vrot.slane %v1236_v18, %v5698_v32  ;;  %v1425_v57 = vld [vmem:[%s6685_s4 + $0x60] sm:$0xff] }
 0xcb7   :  { %1482 = vmatpush1.msra.mxu1 %v1425_v57  ;;  %v1421_v5 = vld [vmem:[%s6685_s4 + $0x40] sm:$0xff] }
 0xcb8   :  { %v1258_v21 = vrot.slane %v1250_v20, %v5364_v26  ;;  %1483 = vmatprep.subr.mxu1 %v1424_v58  ;;  %v5824_v20 = vld [vmem:[%s6686_s5 + $0x78] sm:$0xff]  ;;  %v1445_v58 = vld [vmem:[%s6687_s6] sm:$0x3] }
 0xcb9   :  { %1484 = vmatpush1.msra.mxu1 %v1423_v43  ;;  %1556 = vmatprep.subr.mxu0 %v5824_v20 }
 0xcba   :  { %675 = vrot.lane.b32.xlu1 %v670_v4, %s5103_s3  ;;  %v1108_v4 = vrot.slane %v1094_v38, %v5698_v32 }
 0xcbc   :  { %v1116_v7 = vrot.slane %v1108_v4, %v5364_v26  ;;  %v6712_v4 = vsub.s32 1, %v5361_v24 }
 0xcbe   :  { %975 = vrot.lane.b32.xlu1 %v970_v3, %s5103_s3  ;;  %v1422_v3 = vld [vmem:[%s6685_s4 + $0x48] sm:$0xff]  ;;  %v1454_v43 = vrot.slane %v1445_v58, %v6712_v4 }
 0xcbf   :  { %1485 = vmatprep.subr.mxu1 %v1422_v3 }
 0xcc0   :  { %1486 = vmatpush1.msra.mxu1 %v1421_v5 }
 0xcc2   :  { %1259 = vrot.lane.b32.xlu1 %v1254_v60, %s5103_s3 }
 0xcc6   :  { %361 = vrot.lane.b32.xlu1 %v358_v12, %s5103_s3 }
 0xcca   :  { %677 = vrot.lane.b32.xlu1 %v674_v16, %s5103_s3 }
 0xcce   :  { %977 = vrot.lane.b32.xlu1 %v974_v19, %s5103_s3  ;;  %v1420_v19 = vld [vmem:[%s6685_s4 + $0x38] sm:$0xff] }
 0xccf   :  { %1487 = vmatprep.subr.mxu1 %v1420_v19 }
 0xcd2   :  { %1261 = vrot.lane.b32.xlu1 %v1258_v21, %s5103_s3  ;;  %v1419_v21 = vld [vmem:[%s6685_s4 + $0x30] sm:$0xff] }
 0xcd3   :  { %1488 = vmatpush1.msra.mxu1 %v1419_v21 }
 0xd24   :  { %v1270_v22 = vpop.permute.xlu1 %1269 }
 0xd25   :  { %4545 = vmatmul.mubr.msk.f32.vlgmr.msra.gmra.mxu0 %vm204_vm4, %v1270_v22  ;;  %v5835_v22 = vld [vmem:[%s6686_s5 + $0x70] sm:$0xff] }
 0xd26   :  { %1604 = vmatprep.mubr.f32.mxu0 %v5102_v10  ;;  %1557 = vmatpush1.msra.mxu0 %v5835_v22 }
 0xd28   :  { %v360_v30 = vpop.permute.xlu1 %359 }
 0xd29   :  { %366 = vst.msk [vmem:[#allocation2] sm:$0x1] %vm365_vm5, %v360_v30 }
 0xd2a   :  { %369 = vst.msk [vmem:[#allocation2 + $0x7] sm:$0x1] %vm368_vm6, %v360_v30  ;;  %v1418_v30 = vld [vmem:[%s6685_s4 + $0x28] sm:$0xff] }
 0xd2b   :  { %1489 = vmatprep.subr.mxu1 %v1418_v30 }
 0xd2c   :  { %v676_v33 = vpop.permute.xlu1 %675 }
 0xd2d   :  { %681 = vst.msk [vmem:[#allocation2 + $0x2] sm:$0x1] %vm365_vm5, %v676_v33 }
 0xd2e   :  { %683 = vst.msk [vmem:[#allocation2 + $0x5] sm:$0x1] %vm368_vm6, %v676_v33  ;;  %v5843_v33 = vld [vmem:[%s6686_s5 + $0x68] sm:$0xff] }
 0xd2f   :  { %1558 = vmatprep.subr.mxu0 %v5843_v33 }
 0xd30   :  { %v5738_v44 = vpop.permute.xlu1 %975 }
 0xd34   :  { %v5740_v52 = vpop.permute.xlu1 %1259 }
 0xd38   :  { %v362_v61 = vpop.permute.xlu1 %361 }
 0xd39   :  { %367 = vst.msk [vmem:[#allocation2 + $0x8] sm:$0x1] %vm365_vm5, %v362_v61 }
 0xd3a   :  { %370 = vst.msk [vmem:[#allocation2 + $0xf] sm:$0x1] %vm368_vm6, %v362_v61 }
 0xd3c   :  { %v678_v46 = vpop.permute.xlu1 %677 }
 0xd3d   :  { %682 = vst.msk [vmem:[#allocation2 + $0xa] sm:$0x1] %vm365_vm5, %v678_v46 }
 0xd3e   :  { %684 = vst.msk [vmem:[#allocation2 + $0xd] sm:$0x1] %vm368_vm6, %v678_v46 }
 0xde5   :  { %v1339_v47 = vpop.f32.mrf.mxu0 }
 0xde6   :  { %v1346_v51 = vadd.f32 %v6710_v49, %v1339_v47  ;;  %v1416_v49 = vld [vmem:[%s6685_s4 + $0x18] sm:$0xff] }
 0xde7   :  { %v1341_v56 = vpop.f32.mrf.mxu0 }
 0xde8   :  { %v4546_v2 = vmul.f32 -1.442695, %v1346_v51  ;;  %v1347_v23 = vadd.f32 %v6711_v8, %v1341_v56  ;;  %v5862_v51 = vld [vmem:[%s6686_s5 + $0x58] sm:$0xff] }
 0xdea   :  { %4936 = vpow2.f32 %v4546_v2  ;;  %v4547_v60 = vmul.f32 -1.442695, %v1347_v23  ;;  %v1415_v2 = vld [vmem:[%s6685_s4 + $0x10] sm:$0xff] }
 0xdeb   :  { %4938 = vtanh.f32 %v1347_v23  ;;  %v5873_v23 = vld [vmem:[%s6686_s5 + $0x50] sm:$0xff] }
 0xdf7   :  { %v4937_v29 = vpop.eup %4936 }
 0xdf8   :  { %v1354_v59 = vadd.f32 1.0, %v4937_v29  ;;  %v4939_v48 = vpop.eup %4938  ;;  %v1414_v29 = vld [vmem:[%s6685_s4 + $0x8] sm:$0xff] }
 0xdfa   :  { %4940 = vrcp.f32 %v1354_v59  ;;  %v5881_v59 = vld [vmem:[%s6686_s5 + $0x48] sm:$0xff] }
 0xdfb   :  { %4942 = vpow2.f32 %v4547_v60 }
 0xe07   :  { %v4941_v34 = vpop.eup %4940 }
 0xe08   :  { %v1362_v0 = vmul.f32 %v4941_v34, %v4939_v48  ;;  %v4943_v9 = vpop.eup %4942  ;;  %v1361_v12 = vmul.f32 %v4941_v34, %v5694_v25  ;;  %v978_v25 = vpop.permute.xlu1 %977  ;;  %v5892_v48 = vld [vmem:[%s6686_s5 + $0x40] sm:$0xff] }
 0xe09   :  { %v1355_v11 = vadd.f32 1.0, %v4943_v9 }
 0xe0a   :  { %1364 = vrot.lane.b32.xlu0 %v1362_v0, %s5103_s3  ;;  %v5900_v0 = vld [vmem:[%s6686_s5 + $0x38] sm:$0xff] }
 0xe0b   :  { %4944 = vrcp.f32 %v1355_v11 }
 0xe0c   :  { %v1262_v56 = vpop.permute.xlu1 %1261 }
 0xe0e   :  { %517 = vrot.lane.b32.xlu0 %v512_v53, %s5103_s3 }
 0xe12   :  { %833 = vrot.lane.b32.xlu0 %v828_v41, %s5103_s3  ;;  %v5919_v41 = vld [vmem:[%s6686_s5 + $0x20] sm:$0xff] }
 0xe16   :  { %1117 = vrot.lane.b32.xlu0 %v1112_v35, %s5103_s3 }
 0xe18   :  { %v4945_v61 = vpop.eup %4944 }
 0xe1a   :  { %519 = vrot.lane.b32.xlu0 %v516_v50, %s5103_s3  ;;  %v5942_v50 = vld [vmem:[%s6686_s5 + $0x8] sm:$0xff] }
 0xe1e   :  { %835 = vrot.lane.b32.xlu0 %v832_v27, %s5103_s3  ;;  %v1450_v27 = vrot.slane %v1445_v58, %v5364_v26 }
 0xe22   :  { %1119 = vrot.lane.b32.xlu0 %v1116_v7, %s5103_s3 }
 0xe7c   :  { %v1365_v13 = vpop.permute.xlu0 %1364 }
 0xe7d   :  { %v1367_v15 = vadd.f32 %v1365_v13, %v1361_v12 }
 0xe7f   :  { %4946 = vtanh.f32 %v1367_v15 }
 0xe80   :  { %v518_v16 = vpop.permute.xlu0 %517 }
 0xe81   :  { %523 = vst.msk [vmem:[#allocation2 + $0x1] sm:$0x1] %vm365_vm5, %v518_v16 }
 0xe82   :  { %525 = vst.msk [vmem:[#allocation2 + $0x6] sm:$0x1] %vm368_vm6, %v518_v16  ;;  %1267 = vst.msk [vmem:[#allocation2 + $0x1] sm:$0x1] %vm368_vm6, %v5740_v52 }
 0xe83   :  { %1265 = vst.msk [vmem:[#allocation2 + $0x6] sm:$0x1] %vm365_vm5, %v5740_v52  ;;  %v5852_v52 = vld [vmem:[%s6686_s5 + $0x60] sm:$0xff] }
 0xe84   :  { %v834_v17 = vpop.permute.xlu0 %833  ;;  %1559 = vmatpush1.msra.mxu0 %v5852_v52 }
 0xe85   :  { %839 = vst.msk [vmem:[#allocation2 + $0x3] sm:$0x1] %vm365_vm5, %v834_v17  ;;  %1560 = vmatprep.subr.mxu0 %v5862_v51 }
 0xe86   :  { %841 = vst.msk [vmem:[#allocation2 + $0x4] sm:$0x1] %vm368_vm6, %v834_v17  ;;  %983 = vst.msk [vmem:[#allocation2 + $0x3] sm:$0x1] %vm368_vm6, %v5738_v44  ;;  %1561 = vmatpush1.msra.mxu0 %v5873_v23 }
 0xe87   :  { %981 = vst.msk [vmem:[#allocation2 + $0x4] sm:$0x1] %vm365_vm5, %v5738_v44  ;;  %v1417_v44 = vld [vmem:[%s6685_s4 + $0x20] sm:$0xff]  ;;  %1562 = vmatprep.subr.mxu0 %v5881_v59 }
 0xe88   :  { %v1118_v18 = vpop.permute.xlu0 %1117  ;;  %1490 = vmatpush1.msra.mxu1 %v1417_v44  ;;  %1563 = vmatpush1.msra.mxu0 %v5892_v48 }
 0xe89   :  { %1123 = vst.msk [vmem:[#allocation2 + $0x5] sm:$0x1] %vm365_vm5, %v1118_v18  ;;  %1491 = vmatprep.subr.mxu1 %v1416_v49  ;;  %1564 = vmatprep.subr.mxu0 %v5900_v0 }
 0xe8a   :  { %1125 = vst.msk [vmem:[#allocation2 + $0x2] sm:$0x1] %vm368_vm6, %v1118_v18  ;;  %1492 = vmatpush1.msra.mxu1 %v1415_v2  ;;  %1565 = vmatpush1.msra.mxu0 %v5905_v1 }
 0xe8b   :  { %1493 = vmatprep.subr.mxu1 %v1414_v29  ;;  %1566 = vmatprep.subr.mxu0 %v5910_v31 }
 0xe8c   :  { %v4947_v46 = vpop.eup %4946  ;;  %v520_v47 = vpop.permute.xlu0 %519  ;;  %1494 = vmatpush1.msra.mxu1 %v1413_v6  ;;  %1567 = vmatpush1.msra.mxu0 %v5919_v41 }
 0xe8d   :  { %524 = vst.msk [vmem:[#allocation2 + $0x9] sm:$0x1] %vm365_vm5, %v520_v47  ;;  %v1369_v8 = vmul.f32 %v4947_v46, %v4945_v61  ;;  %1716 = vmatprep.subr.mxu1 %v5824_v20  ;;  %1568 = vmatprep.subr.mxu0 %v5932_v62 }
 0xe8e   :  { %526 = vst.msk [vmem:[#allocation2 + $0xe] sm:$0x1] %vm368_vm6, %v520_v47  ;;  %1268 = vst.msk [vmem:[#allocation2 + $0x9] sm:$0x1] %vm368_vm6, %v1262_v56  ;;  %1569 = vmatpush1.msra.mxu0 %v5937_v42 }
 0xe8f   :  { %1266 = vst.msk [vmem:[#allocation2 + $0xe] sm:$0x1] %vm365_vm5, %v1262_v56  ;;  %v1377_v34 = vrot.slane %v1369_v8, %v5698_v32  ;;  %1570 = vmatprep.subr.mxu0 %v5942_v50 }
 0xe90   :  { %v836_v63 = vpop.permute.xlu0 %835  ;;  %1571 = vmatpush1.msra.mxu0 %v5951_v54 }
 0xe91   :  { %840 = vst.msk [vmem:[#allocation2 + $0xb] sm:$0x1] %vm365_vm5, %v836_v63  ;;  %v1385_v53 = vrot.slane %v1377_v34, %v5698_v32  ;;  %v1378_v28 = vcombine.high %v1377_v34, %v1377_v34  ;;  %1605 = vmatmul.mubr.f32.vlgmr.msra.gmra.mxu0 %v5102_v10  ;;  %1872 = vmatprep.subr.mxu0 %v5824_v20 }
 0xe92   :  { %842 = vst.msk [vmem:[#allocation2 + $0xc] sm:$0x1] %vm368_vm6, %v836_v63  ;;  %984 = vst.msk [vmem:[#allocation2 + $0xb] sm:$0x1] %vm368_vm6, %v978_v25  ;;  %1920 = vmatprep.mubr.f32.mxu0 %v5102_v10  ;;  %1873 = vmatpush1.msra.mxu0 %v5835_v22 }
 0xe93   :  { %982 = vst.msk [vmem:[#allocation2 + $0xc] sm:$0x1] %vm365_vm5, %v978_v25  ;;  %v1396_v40 = vrot.slane %v1385_v53, %v5364_v26  ;;  %v1392_v14 = vrot.slane %v1378_v28, %v5698_v32  ;;  %1874 = vmatprep.subr.mxu0 %v5843_v33 }
 0xe94   :  { %v1120_v35 = vpop.permute.xlu0 %1119  ;;  %1875 = vmatpush1.msra.mxu0 %v5852_v52 }
 0xe95   :  { %1124 = vst.msk [vmem:[#allocation2 + $0xd] sm:$0x1] %vm365_vm5, %v1120_v35  ;;  %1401 = vrot.lane.b32.xlu0 %v1396_v40, %s5103_s3  ;;  %v1400_v38 = vrot.slane %v1392_v14, %v5364_v26  ;;  %1876 = vmatprep.subr.mxu0 %v5862_v51 }
 0xe96   :  { %1126 = vst.msk [vmem:[#allocation2 + $0xa] sm:$0x1] %vm368_vm6, %v1120_v35  ;;  %1877 = vmatpush1.msra.mxu0 %v5873_v23 }
 0xe97   :  { %1878 = vmatprep.subr.mxu0 %v5881_v59 }
 0xe98   :  { %1879 = vmatpush1.msra.mxu0 %v5892_v48 }
 0xe99   :  { %1403 = vrot.lane.b32.xlu0 %v1400_v38, %s5103_s3  ;;  %1880 = vmatprep.subr.mxu0 %v5900_v0 }
 0xe9a   :  { %1881 = vmatpush1.msra.mxu0 %v5905_v1 }
 0xe9b   :  { %1882 = vmatprep.subr.mxu0 %v5910_v31 }
 0xe9c   :  { %1883 = vmatpush1.msra.mxu0 %v5919_v41 }
 0xe9d   :  { %1884 = vmatprep.subr.mxu0 %v5932_v62 }
 0xe9e   :  { %1885 = vmatpush1.msra.mxu0 %v5937_v42 }
 0xe9f   :  { %1886 = vmatprep.subr.mxu0 %v5942_v50 }
 0xea0   :  { %1887 = vmatpush1.msra.mxu0 %v5951_v54 }
 0xea1   :  { %2188 = vmatprep.subr.mxu0 %v5824_v20 }
 0xf07   :  { %v1402_v55 = vpop.permute.xlu0 %1401 }
 0xf08   :  { %1407 = vst.msk [vmem:[#allocation2 + $0x7] sm:$0x1] %vm365_vm5, %v1402_v55 }
 0xf09   :  { %1409 = vst.msk [vmem:[#allocation2] sm:$0x1] %vm368_vm6, %v1402_v55 }
 0xf0b   :  { %v1404_v36 = vpop.permute.xlu0 %1403 }
 0xf0c   :  { %1408 = vst.msk [vmem:[#allocation2 + $0xf] sm:$0x1] %vm365_vm5, %v1404_v36 }
 0xf0d   :  { %1410 = vst.msk [vmem:[#allocation2 + $0x8] sm:$0x1] %vm368_vm6, %v1404_v36 }
 0xf10   :  { %v1411_v45 = vld [vmem:[#allocation2] sm:$0xff] }
 0xf11   :  { %4548 = vmatmul.mubr.msk.f32.vlgmr.msra.gmra.mxu1 %vm204_vm4, %v1411_v45 }
 0xf12   :  { %1533 = vmatprep.mubr.f32.mxu1 %v5102_v10  ;;  %1717 = vmatpush1.msra.mxu1 %v5835_v22 }
 0xf13   :  { %1718 = vmatprep.subr.mxu1 %v5843_v33 }
 0xf14   :  { %v1412_v57 = vld [vmem:[#allocation2 + $0x8] sm:$0xff]  ;;  %1719 = vmatpush1.msra.mxu1 %v5852_v52 }
 0xf15   :  { %4549 = vmatmul.mubr.msk.f32.gmra.mxu1 %vm204_vm4, %v1412_v57  ;;  %1720 = vmatprep.subr.mxu1 %v5862_v51 }
 0xf16   :  { %1721 = vmatpush1.msra.mxu1 %v5873_v23  ;;  %1764 = vmatprep.mubr.f32.mxu1 %v5102_v10 }
 0xf17   :  { %1722 = vmatprep.subr.mxu1 %v5881_v59 }
 0xf18   :  { %1723 = vmatpush1.msra.mxu1 %v5892_v48 }
 0xf19   :  { %1724 = vmatprep.subr.mxu1 %v5900_v0 }
 0xf1a   :  { %1725 = vmatpush1.msra.mxu1 %v5905_v1 }
 0xf1b   :  { %1726 = vmatprep.subr.mxu1 %v5910_v31 }
 0xf1c   :  { %1727 = vmatpush1.msra.mxu1 %v5919_v41 }
 0xf1d   :  { %1728 = vmatprep.subr.mxu1 %v5932_v62 }
 0xf1e   :  { %1729 = vmatpush1.msra.mxu1 %v5937_v42 }
 0xf1f   :  { %1730 = vmatprep.subr.mxu1 %v5942_v50 }
 0xf20   :  { %1731 = vmatpush1.msra.mxu1 %v5951_v54 }
 0xf21   :  { %2030 = vmatprep.subr.mxu1 %v5824_v20 }
 0xf51   :  { %v1606_v63 = vpop.f32.mrf.mxu0 }
 0xfd1   :  { %v1529_v3 = vpop.f32.mrf.mxu1 }
 0xfd2   :  { %v1530_v5 = vadd.f32 %v1529_v3, %v1450_v27 }
 0xfd3   :  { %v1531_v7 = vpop.f32.mrf.mxu1 }
 0xfd4   :  { %v1532_v60 = vadd.f32 %v1531_v7, %v1454_v43  ;;  %v1615_v11 = vrot.slane %v1530_v5, 7  ;;  %v1771_v12 = vrot.slane %v1530_v5, 6  ;;  %v1779_v15 = vrot.slane %v1530_v5, 1 }
 0xfd5   :  { %v1535_v9 = vpop.f32.mrf.mxu1  ;;  %v1927_v16 = vrot.slane %v1530_v5, 5  ;;  %v1935_v17 = vrot.slane %v1530_v5, 2  ;;  %v2085_v21 = vrot.slane %v1530_v5, 4  ;;  %v2093_v30 = vrot.slane %v1530_v5, 3 }
 0xfd6   :  { %v1536_v13 = vadd.f32 %v1535_v9, %v1450_v27  ;;  %v1618_v18 = vrot.slane %v1532_v60, 7  ;;  %v1774_v19 = vrot.slane %v1532_v60, 6  ;;  %v1781_v49 = vrot.slane %v1532_v60, 1 }
 0xfd7   :  { %v1537_v25 = vpop.f32.mrf.mxu1  ;;  %v1930_v6 = vrot.slane %v1532_v60, 5  ;;  %v1938_v55 = vrot.slane %v1532_v60, 2  ;;  %v2088_v36 = vrot.slane %v1532_v60, 4 }
 0xfd8   :  { %v1538_v44 = vadd.f32 %v1537_v25, %v1454_v43  ;;  %v1616_v61 = vrot.slane %v1536_v13, 6  ;;  %v1623_v24 = vrot.slane %v1536_v13, 7  ;;  %v1772_v46 = vrot.slane %v1536_v13, 5 }
 0xfd9   :  { %v6008_v47 = vsel %vm289_vm3, %v1536_v13, %v1779_v15  ;;  %v1928_v2 = vrot.slane %v1536_v13, 4  ;;  %v1936_v56 = vrot.slane %v1536_v13, 1  ;;  %v2086_v34 = vrot.slane %v1536_v13, 3 }
 0xfda   :  { %v6011_v8 = vsel %vm289_vm3, %v1616_v61, %v1615_v11  ;;  %v6014_v29 = vsel %vm289_vm3, %v1623_v24, %v1530_v5  ;;  %v6021_v28 = vsel %vm289_vm3, %v1772_v46, %v1771_v12  ;;  %v1775_v40 = vrot.slane %v1538_v44, 5 }
 0xfdb   :  { %v1629_v53 = vsel %vm5375_vm1, %v6011_v8, %v6014_v29  ;;  %v6024_v14 = vsel %vm289_vm3, %v1538_v44, %v1781_v49  ;;  %v1785_v38 = vsel %vm5375_vm1, %v6021_v28, %v6008_v47  ;;  %v1619_v45 = vrot.slane %v1538_v44, 6 }
 0xfdc   :  { %v1631_v35 = vadd.f32 %v1629_v53, %v1606_v63  ;;  %v6031_v57 = vsel %vm289_vm3, %v1775_v40, %v1774_v19  ;;  %v6034_v58 = vsel %vm289_vm3, %v1928_v2, %v1927_v16  ;;  %v6037_v27 = vsel %vm289_vm3, %v1936_v56, %v1935_v17 }
 0xfdd   :  { %v1625_v43 = vrot.slane %v1538_v44, 7  ;;  %v1786_v3 = vsel %vm5381_vm2, %v6031_v57, %v6024_v14  ;;  %v1943_v5 = vsel %vm5375_vm1, %v6034_v58, %v6037_v27  ;;  %v1931_v7 = vrot.slane %v1538_v44, 4 }
 0xfde   :  { %v4550_v4 = vmul.f32 -1.442695, %v1631_v35  ;;  %v1939_v9 = vrot.slane %v1538_v44, 1  ;;  %v6048_v11 = vsel %vm289_vm3, %v2086_v34, %v2085_v21  ;;  %v2094_v12 = vrot.slane %v1536_v13, 2  ;;  %v1608_v35 = vpop.f32.mrf.mxu0 }
 0xfdf   :  { %v2089_v15 = vrot.slane %v1538_v44, 3  ;;  %v2096_v16 = vrot.slane %v1532_v60, 3  ;;  %v2097_v17 = vrot.slane %v1538_v44, 2  ;;  %v6051_v25 = vsel %vm289_vm3, %v1619_v45, %v1618_v18 }
 0xfe0   :  { %4948 = vpow2.f32 %v4550_v4  ;;  %v6054_v19 = vsel %vm289_vm3, %v1931_v7, %v1930_v6  ;;  %v6057_v61 = vsel %vm289_vm3, %v1939_v9, %v1938_v55  ;;  %v6060_v24 = vsel %vm289_vm3, %v2094_v12, %v2093_v30 }
 0xfe1   :  { %v6063_v21 = vsel %vm289_vm3, %v1625_v43, %v1532_v60  ;;  %v1944_v13 = vsel %vm5381_vm2, %v6054_v19, %v6057_v61  ;;  %v2101_v18 = vsel %vm5375_vm1, %v6048_v11, %v6060_v24  ;;  %v6074_v44 = vsel %vm289_vm3, %v2089_v15, %v2088_v36 }
 0xfe2   :  { %v6077_v46 = vsel %vm289_vm3, %v2097_v17, %v2096_v16  ;;  %v2243_v60 = vsel %vm5375_vm1, %v6060_v24, %v6048_v11  ;;  %v2385_v30 = vsel %vm5375_vm1, %v6037_v27, %v6034_v58  ;;  %v2386_v49 = vsel %vm5381_vm2, %v6057_v61, %v6054_v19 }
 0xfe3   :  { %v2102_v2 = vsel %vm5381_vm2, %v6074_v44, %v6077_v46  ;;  %v2244_v56 = vsel %vm5381_vm2, %v6077_v46, %v6074_v44  ;;  %v2527_v6 = vsel %vm5375_vm1, %v6008_v47, %v6021_v28  ;;  %v2528_v34 = vsel %vm5381_vm2, %v6024_v14, %v6031_v57 }
 0xfe4   :  { %v1630_v40 = vsel %vm5381_vm2, %v6051_v25, %v6063_v21 }
 0xfe5   :  { %v1632_v55 = vadd.f32 %v1630_v40, %v1608_v35 }
 0xfe7   :  { %4950 = vtanh.f32 %v1632_v55  ;;  %v4551_v9 = vmul.f32 -1.442695, %v1632_v55 }
 0xfed   :  { %v4949_v36 = vpop.eup %4948 }
 0xfee   :  { %v1639_v45 = vadd.f32 1.0, %v4949_v36 }
 0xff0   :  { %4952 = vrcp.f32 %v1639_v45 }
 0xff1   :  { %4954 = vpow2.f32 %v4551_v9 }
 0xff4   :  { %v4951_v4 = vpop.eup %4950 }
 0xffd   :  { %v4953_v43 = vpop.eup %4952 }
 0xffe   :  { %v1647_v7 = vmul.f32 %v4953_v43, %v4951_v4  ;;  %v4955_v12 = vpop.eup %4954  ;;  %v1646_v16 = vmul.f32 0.0, %v4953_v43 }
 0xfff   :  { %v1640_v15 = vadd.f32 1.0, %v4955_v12 }
0x1000   :  { %1649 = vrot.lane.b32.xlu1 %v1647_v7, %s5103_s3 }
0x1001   :  { %4956 = vrcp.f32 %v1640_v15 }
0x100e   :  { %v4957_v63 = vpop.eup %4956 }
0x1072   :  { %v1650_v17 = vpop.permute.xlu1 %1649 }
0x1073   :  { %v1652_v53 = vadd.f32 %v1650_v17, %v1646_v16 }
0x1075   :  { %4958 = vtanh.f32 %v1652_v53 }
0x1082   :  { %v4959_v40 = vpop.eup %4958 }
0x1083   :  { %v6120_v35 = vmul.f32 %v4959_v40, %v4957_v63 }
0x1085   :  { %1696 = vrot.lane.b32.xlu0 %v6120_v35, %s5103_s3  ;;  %v1662_v14 = vrot.slane %v6120_v35, %v5698_v32 }
0x10f7   :  { %v1697_v36 = vpop.permute.xlu0 %1696 }
0x10f8   :  { %4552 = vmatmul.mubr.msk.f32.vlgmr.msra.gmra.mxu1 %vm204_vm4, %v1697_v36 }
0x10f9   :  { %2031 = vmatpush1.msra.mxu1 %v5835_v22  ;;  %2078 = vmatprep.mubr.f32.mxu1 %v5102_v10 }
0x10fa   :  { %2032 = vmatprep.subr.mxu1 %v5843_v33 }
0x10fb   :  { %2033 = vmatpush1.msra.mxu1 %v5852_v52 }
0x10fc   :  { %2034 = vmatprep.subr.mxu1 %v5862_v51 }
0x10fd   :  { %2035 = vmatpush1.msra.mxu1 %v5873_v23 }
0x10fe   :  { %2036 = vmatprep.subr.mxu1 %v5881_v59 }
0x10ff   :  { %2037 = vmatpush1.msra.mxu1 %v5892_v48 }
0x1100   :  { %2038 = vmatprep.subr.mxu1 %v5900_v0 }
0x1101   :  { %2039 = vmatpush1.msra.mxu1 %v5905_v1 }
0x1102   :  { %2040 = vmatprep.subr.mxu1 %v5910_v31 }
0x1103   :  { %2041 = vmatpush1.msra.mxu1 %v5919_v41 }
0x1104   :  { %2042 = vmatprep.subr.mxu1 %v5932_v62 }
0x1105   :  { %2043 = vmatpush1.msra.mxu1 %v5937_v42 }
0x1106   :  { %2044 = vmatprep.subr.mxu1 %v5942_v50 }
0x1107   :  { %2045 = vmatpush1.msra.mxu1 %v5951_v54 }
0x1108   :  { %2330 = vmatprep.subr.mxu1 %v5824_v20 }
0x11b8   :  { %v1766_v63 = vpop.f32.mrf.mxu1 }
0x11b9   :  { %v1787_v55 = vadd.f32 %v1785_v38, %v1766_v63 }
0x11ba   :  { %v1768_v4 = vpop.f32.mrf.mxu1 }
0x11bb   :  { %v4553_v45 = vmul.f32 -1.442695, %v1787_v55  ;;  %v1788_v43 = vadd.f32 %v1786_v3, %v1768_v4 }
0x11bd   :  { %4960 = vpow2.f32 %v4553_v45  ;;  %v4554_v17 = vmul.f32 -1.442695, %v1788_v43 }
0x11be   :  { %4962 = vtanh.f32 %v1788_v43 }
0x11ca   :  { %v4961_v7 = vpop.eup %4960 }
0x11cb   :  { %v1795_v9 = vadd.f32 1.0, %v4961_v7  ;;  %v4963_v12 = vpop.eup %4962 }
0x11cd   :  { %4964 = vrcp.f32 %v1795_v9 }
0x11ce   :  { %4966 = vpow2.f32 %v4554_v17 }
0x11da   :  { %v4965_v15 = vpop.eup %4964 }
0x11db   :  { %v1803_v16 = vmul.f32 %v4965_v15, %v4963_v12  ;;  %v4967_v38 = vpop.eup %4966  ;;  %v1802_v36 = vmul.f32 %v4965_v15, %v1652_v53 }
0x11dc   :  { %v1796_v40 = vadd.f32 1.0, %v4967_v38 }
0x11dd   :  { %1805 = vrot.lane.b32.xlu1 %v1803_v16, %s5103_s3 }
0x11de   :  { %4968 = vrcp.f32 %v1796_v40 }
0x11eb   :  { %v4969_v45 = vpop.eup %4968 }
0x124f   :  { %v1806_v63 = vpop.permute.xlu1 %1805 }
0x1250   :  { %v1808_v55 = vadd.f32 %v1806_v63, %v1802_v36 }
0x1252   :  { %4970 = vtanh.f32 %v1808_v55 }
0x125f   :  { %v4971_v3 = vpop.eup %4970 }
0x1260   :  { %v6153_v4 = vmul.f32 %v4971_v3, %v4969_v45 }
0x1262   :  { %1852 = vrot.lane.b32.xlu0 %v6153_v4, %s5103_s3  ;;  %v1818_v37 = vrot.slane %v6153_v4, %v5698_v32 }
0x12d4   :  { %v1853_v7 = vpop.permute.xlu0 %1852 }
0x12d5   :  { %4555 = vmatmul.mubr.msk.f32.vlgmr.msra.gmra.mxu0 %vm204_vm4, %v1853_v7 }
0x12d6   :  { %2189 = vmatpush1.msra.mxu0 %v5835_v22  ;;  %2236 = vmatprep.mubr.f32.mxu0 %v5102_v10 }
0x12d7   :  { %2190 = vmatprep.subr.mxu0 %v5843_v33 }
0x12d8   :  { %2191 = vmatpush1.msra.mxu0 %v5852_v52 }
0x12d9   :  { %2192 = vmatprep.subr.mxu0 %v5862_v51 }
0x12da   :  { %2193 = vmatpush1.msra.mxu0 %v5873_v23 }
0x12db   :  { %2194 = vmatprep.subr.mxu0 %v5881_v59 }
0x12dc   :  { %2195 = vmatpush1.msra.mxu0 %v5892_v48 }
0x12dd   :  { %2196 = vmatprep.subr.mxu0 %v5900_v0 }
0x12de   :  { %2197 = vmatpush1.msra.mxu0 %v5905_v1 }
0x12df   :  { %2198 = vmatprep.subr.mxu0 %v5910_v31 }
0x12e0   :  { %2199 = vmatpush1.msra.mxu0 %v5919_v41 }
0x12e1   :  { %2200 = vmatprep.subr.mxu0 %v5932_v62 }
0x12e2   :  { %2201 = vmatpush1.msra.mxu0 %v5937_v42 }
0x12e3   :  { %2202 = vmatprep.subr.mxu0 %v5942_v50 }
0x12e4   :  { %2203 = vmatpush1.msra.mxu0 %v5951_v54 }
0x12e5   :  { %2472 = vmatprep.subr.mxu0 %v5824_v20 }
0x1395   :  { %v1922_v53 = vpop.f32.mrf.mxu0 }
0x1396   :  { %v1945_v43 = vadd.f32 %v1943_v5, %v1922_v53 }
0x1397   :  { %v1924_v12 = vpop.f32.mrf.mxu0 }
0x1398   :  { %v4556_v9 = vmul.f32 -1.442695, %v1945_v43  ;;  %v1946_v15 = vadd.f32 %v1944_v13, %v1924_v12 }
0x139a   :  { %4972 = vpow2.f32 %v4556_v9  ;;  %v4557_v63 = vmul.f32 -1.442695, %v1946_v15 }
0x139b   :  { %4974 = vtanh.f32 %v1946_v15 }
0x13a7   :  { %v4973_v16 = vpop.eup %4972 }
0x13a8   :  { %v1953_v17 = vadd.f32 1.0, %v4973_v16  ;;  %v4975_v38 = vpop.eup %4974 }
0x13aa   :  { %4976 = vrcp.f32 %v1953_v17 }
0x13ab   :  { %4978 = vpow2.f32 %v4557_v63 }
0x13b7   :  { %v4977_v40 = vpop.eup %4976 }
0x13b8   :  { %v1961_v36 = vmul.f32 %v4977_v40, %v4975_v38  ;;  %v4979_v5 = vpop.eup %4978  ;;  %v1960_v3 = vmul.f32 %v4977_v40, %v1808_v55 }
0x13b9   :  { %v1954_v45 = vadd.f32 1.0, %v4979_v5 }
0x13ba   :  { %1963 = vrot.lane.b32.xlu1 %v1961_v36, %s5103_s3 }
0x13bb   :  { %4980 = vrcp.f32 %v1954_v45 }
0x13c8   :  { %v4981_v43 = vpop.eup %4980 }
0x142c   :  { %v1964_v7 = vpop.permute.xlu1 %1963 }
0x142d   :  { %v1966_v53 = vadd.f32 %v1964_v7, %v1960_v3 }
0x142f   :  { %4982 = vtanh.f32 %v1966_v53 }
0x143c   :  { %v4983_v13 = vpop.eup %4982 }
0x143d   :  { %v6186_v9 = vmul.f32 %v4983_v13, %v4981_v43 }
0x143f   :  { %2010 = vrot.lane.b32.xlu0 %v6186_v9, %s5103_s3 }
0x14b1   :  { %v2011_v12 = vpop.permute.xlu0 %2010 }
0x14b2   :  { %4558 = vmatmul.mubr.msk.f32.vlgmr.msra.gmra.mxu1 %vm204_vm4, %v2011_v12 }
0x14b3   :  { %2331 = vmatpush1.msra.mxu1 %v5835_v22  ;;  %2378 = vmatprep.mubr.f32.mxu1 %v5102_v10 }
0x14b4   :  { %2332 = vmatprep.subr.mxu1 %v5843_v33 }
0x14b5   :  { %2333 = vmatpush1.msra.mxu1 %v5852_v52 }
0x14b6   :  { %2334 = vmatprep.subr.mxu1 %v5862_v51 }
0x14b7   :  { %2335 = vmatpush1.msra.mxu1 %v5873_v23 }
0x14b8   :  { %2336 = vmatprep.subr.mxu1 %v5881_v59 }
0x14b9   :  { %2337 = vmatpush1.msra.mxu1 %v5892_v48 }
0x14ba   :  { %2338 = vmatprep.subr.mxu1 %v5900_v0 }
0x14bb   :  { %2339 = vmatpush1.msra.mxu1 %v5905_v1 }
0x14bc   :  { %2340 = vmatprep.subr.mxu1 %v5910_v31 }
0x14bd   :  { %2341 = vmatpush1.msra.mxu1 %v5919_v41 }
0x14be   :  { %2342 = vmatprep.subr.mxu1 %v5932_v62 }
0x14bf   :  { %2343 = vmatpush1.msra.mxu1 %v5937_v42 }
0x14c0   :  { %2344 = vmatprep.subr.mxu1 %v5942_v50 }
0x14c1   :  { %2345 = vmatpush1.msra.mxu1 %v5951_v54 }
0x14c2   :  { %2614 = vmatprep.subr.mxu1 %v5824_v20 }
0x1572   :  { %v2080_v55 = vpop.f32.mrf.mxu1 }
0x1573   :  { %v2103_v15 = vadd.f32 %v2101_v18, %v2080_v55 }
0x1574   :  { %v2082_v17 = vpop.f32.mrf.mxu1 }
0x1575   :  { %v4559_v16 = vmul.f32 -1.442695, %v2103_v15  ;;  %v2104_v38 = vadd.f32 %v2102_v2, %v2082_v17 }
0x1577   :  { %4984 = vpow2.f32 %v4559_v16  ;;  %v4560_v45 = vmul.f32 -1.442695, %v2104_v38 }
0x1578   :  { %4986 = vtanh.f32 %v2104_v38 }
0x1584   :  { %v4985_v40 = vpop.eup %4984 }
0x1585   :  { %v2111_v36 = vadd.f32 1.0, %v4985_v40  ;;  %v4987_v20 = vpop.eup %4986 }
0x1587   :  { %4988 = vrcp.f32 %v2111_v36 }
0x1588   :  { %4990 = vpow2.f32 %v4560_v45 }
0x1594   :  { %v4989_v63 = vpop.eup %4988 }
0x1595   :  { %v2119_v5 = vmul.f32 %v4989_v63, %v4987_v20  ;;  %v4991_v18 = vpop.eup %4990  ;;  %v2118_v7 = vmul.f32 %v4989_v63, %v1966_v53 }
0x1596   :  { %v2112_v3 = vadd.f32 1.0, %v4991_v18 }
0x1597   :  { %2121 = vrot.lane.b32.xlu1 %v2119_v5, %s5103_s3 }
0x1598   :  { %4992 = vrcp.f32 %v2112_v3 }
0x15a5   :  { %v4993_v12 = vpop.eup %4992 }
0x1609   :  { %v2122_v43 = vpop.permute.xlu1 %2121 }
0x160a   :  { %v2124_v13 = vadd.f32 %v2122_v43, %v2118_v7 }
0x160c   :  { %4994 = vtanh.f32 %v2124_v13 }
0x1619   :  { %v4995_v2 = vpop.eup %4994 }
0x161a   :  { %v6219_v55 = vmul.f32 %v4995_v2, %v4993_v12 }
0x161c   :  { %2168 = vrot.lane.b32.xlu0 %v6219_v55, %s5103_s3 }
0x168e   :  { %v2169_v15 = vpop.permute.xlu0 %2168 }
0x168f   :  { %4561 = vmatmul.mubr.msk.f32.vlgmr.msra.gmra.mxu0 %vm204_vm4, %v2169_v15 }
0x1690   :  { %2473 = vmatpush1.msra.mxu0 %v5835_v22  ;;  %2520 = vmatprep.mubr.f32.mxu0 %v5102_v10 }
0x1691   :  { %2474 = vmatprep.subr.mxu0 %v5843_v33 }
0x1692   :  { %2475 = vmatpush1.msra.mxu0 %v5852_v52 }
0x1693   :  { %2476 = vmatprep.subr.mxu0 %v5862_v51 }
0x1694   :  { %2477 = vmatpush1.msra.mxu0 %v5873_v23 }
0x1695   :  { %2478 = vmatprep.subr.mxu0 %v5881_v59 }
0x1696   :  { %2479 = vmatpush1.msra.mxu0 %v5892_v48 }
0x1697   :  { %2480 = vmatprep.subr.mxu0 %v5900_v0 }
0x1698   :  { %2481 = vmatpush1.msra.mxu0 %v5905_v1 }
0x1699   :  { %2482 = vmatprep.subr.mxu0 %v5910_v31 }
0x169a   :  { %2483 = vmatpush1.msra.mxu0 %v5919_v41 }
0x169b   :  { %2484 = vmatprep.subr.mxu0 %v5932_v62 }
0x169c   :  { %2485 = vmatpush1.msra.mxu0 %v5937_v42 }
0x169d   :  { %2486 = vmatprep.subr.mxu0 %v5942_v50 }
0x169e   :  { %2487 = vmatpush1.msra.mxu0 %v5951_v54 }
0x174f   :  { %v2238_v53 = vpop.f32.mrf.mxu0 }
0x1750   :  { %v2245_v16 = vadd.f32 %v2243_v60, %v2238_v53 }
0x1751   :  { %v2240_v38 = vpop.f32.mrf.mxu0 }
0x1752   :  { %v4562_v17 = vmul.f32 -1.442695, %v2245_v16  ;;  %v2246_v40 = vadd.f32 %v2244_v56, %v2240_v38 }
0x1754   :  { %4996 = vpow2.f32 %v4562_v17  ;;  %v4563_v11 = vmul.f32 -1.442695, %v2246_v40 }
0x1755   :  { %4998 = vtanh.f32 %v2246_v40 }
0x1761   :  { %v4997_v36 = vpop.eup %4996 }
0x1762   :  { %v2253_v20 = vadd.f32 1.0, %v4997_v36  ;;  %v4999_v63 = vpop.eup %4998 }
0x1764   :  { %5000 = vrcp.f32 %v2253_v20 }
0x1765   :  { %5002 = vpow2.f32 %v4563_v11  ;;  %v1670_v11 = vrot.slane %v1662_v14, %v5698_v32 }
0x1771   :  { %v5001_v5 = vpop.eup %5000 }
0x1772   :  { %v2261_v45 = vmul.f32 %v5001_v5, %v4999_v63  ;;  %v5003_v24 = vpop.eup %5002  ;;  %v2260_v18 = vmul.f32 %v5001_v5, %v2124_v13  ;;  %v1976_v5 = vrot.slane %v6186_v9, %v5698_v32 }
0x1773   :  { %v2254_v60 = vadd.f32 1.0, %v5003_v24  ;;  %v1681_v24 = vrot.slane %v1670_v11, %v5364_v26 }
0x1774   :  { %2263 = vrot.lane.b32.xlu1 %v2261_v45, %s5103_s3 }
0x1775   :  { %5004 = vrcp.f32 %v2254_v60  ;;  %v1984_v60 = vrot.slane %v1976_v5, %v5698_v32 }
0x1782   :  { %v5005_v44 = vpop.eup %5004 }
0x17e6   :  { %v2264_v3 = vpop.permute.xlu1 %2263 }
0x17e7   :  { %v2266_v7 = vadd.f32 %v2264_v3, %v2260_v18  ;;  %v1663_v18 = vcombine.high %v1662_v14, %v1662_v14  ;;  %v1995_v3 = vrot.slane %v1984_v60, %v5364_v26  ;;  %v2745_v14 = vld [vmem:[%s6688_s7 + $0x38] sm:$0xff] }
0x17e8   :  { %4683 = vmatprep.subr.mxu0 %v2745_v14 }
0x17e9   :  { %5006 = vtanh.f32 %v2266_v7  ;;  %v1677_v35 = vrot.slane %v1663_v18, %v5698_v32 }
0x17f6   :  { %v5007_v46 = vpop.eup %5006 }
0x17f7   :  { %v6251_v56 = vmul.f32 %v5007_v46, %v5005_v44  ;;  %v1685_v44 = vrot.slane %v1677_v35, %v5364_v26 }
0x17f9   :  { %2310 = vrot.lane.b32.xlu0 %v6251_v56, %s5103_s3  ;;  %v2276_v9 = vrot.slane %v6251_v56, %v5698_v32 }
0x186b   :  { %v2311_v43 = vpop.permute.xlu0 %2310 }
0x186c   :  { %4564 = vmatmul.mubr.msk.f32.vlgmr.msra.gmra.mxu1 %vm204_vm4, %v2311_v43 }
0x186d   :  { %2615 = vmatpush1.msra.mxu1 %v5835_v22  ;;  %2662 = vmatprep.mubr.f32.mxu1 %v5102_v10 }
0x186e   :  { %2616 = vmatprep.subr.mxu1 %v5843_v33 }
0x186f   :  { %2617 = vmatpush1.msra.mxu1 %v5852_v52 }
0x1870   :  { %2618 = vmatprep.subr.mxu1 %v5862_v51 }
0x1871   :  { %2619 = vmatpush1.msra.mxu1 %v5873_v23 }
0x1872   :  { %2620 = vmatprep.subr.mxu1 %v5881_v59 }
0x1873   :  { %2621 = vmatpush1.msra.mxu1 %v5892_v48 }
0x1874   :  { %2622 = vmatprep.subr.mxu1 %v5900_v0 }
0x1875   :  { %2623 = vmatpush1.msra.mxu1 %v5905_v1 }
0x1876   :  { %2624 = vmatprep.subr.mxu1 %v5910_v31 }
0x1877   :  { %2625 = vmatpush1.msra.mxu1 %v5919_v41 }
0x1878   :  { %2626 = vmatprep.subr.mxu1 %v5932_v62 }
0x1879   :  { %2627 = vmatpush1.msra.mxu1 %v5937_v42 }
0x187a   :  { %2628 = vmatprep.subr.mxu1 %v5942_v50 }
0x187b   :  { %2629 = vmatpush1.msra.mxu1 %v5951_v54 }
0x192c   :  { %v2380_v22 = vpop.f32.mrf.mxu1 }
0x192d   :  { %v2387_v33 = vadd.f32 %v2385_v30, %v2380_v22 }
0x192e   :  { %v2382_v51 = vpop.f32.mrf.mxu1 }
0x192f   :  { %v4565_v52 = vmul.f32 -1.442695, %v2387_v33  ;;  %v2388_v23 = vadd.f32 %v2386_v49, %v2382_v51  ;;  %v2284_v33 = vrot.slane %v2276_v9, %v5698_v32 }
0x1931   :  { %5008 = vpow2.f32 %v4565_v52  ;;  %v4566_v41 = vmul.f32 -1.442695, %v2388_v23  ;;  %v2295_v52 = vrot.slane %v2284_v33, %v5364_v26 }
0x1932   :  { %5010 = vtanh.f32 %v2388_v23  ;;  %v2277_v23 = vcombine.high %v2276_v9, %v2276_v9 }
0x193e   :  { %v5009_v59 = vpop.eup %5008 }
0x193f   :  { %v2395_v48 = vadd.f32 1.0, %v5009_v59  ;;  %v5011_v0 = vpop.eup %5010  ;;  %v2291_v59 = vrot.slane %v2277_v23, %v5698_v32  ;;  %v2838_v23 = vld [vmem:[%s6689_s8 + $0x20] sm:$0xff] }
0x1941   :  { %5012 = vrcp.f32 %v2395_v48 }
0x1942   :  { %5014 = vpow2.f32 %v4566_v41 }
0x194e   :  { %v5013_v1 = vpop.eup %5012 }
0x194f   :  { %v2403_v31 = vmul.f32 %v5013_v1, %v5011_v0  ;;  %v5015_v62 = vpop.eup %5014  ;;  %v2402_v50 = vmul.f32 %v5013_v1, %v2266_v7  ;;  %v1977_v7 = vcombine.high %v1976_v5, %v1976_v5  ;;  %v2299_v0 = vrot.slane %v2291_v59, %v5364_v26  ;;  %v2743_v5 = vld [vmem:[%s6688_s7 + $0x28] sm:$0xff]  ;;  %v2741_v59 = vld [vmem:[%s6688_s7 + $0x18] sm:$0xff] }
0x1950   :  { %v2396_v42 = vadd.f32 1.0, %v5015_v62 }
0x1951   :  { %2405 = vrot.lane.b32.xlu1 %v2403_v31, %s5103_s3  ;;  %v1991_v46 = vrot.slane %v1977_v7, %v5698_v32 }
0x1952   :  { %5016 = vrcp.f32 %v2396_v42 }
0x1953   :  { %v1999_v22 = vrot.slane %v1991_v46, %v5364_v26 }
0x195f   :  { %v5017_v27 = vpop.eup %5016 }
0x19c3   :  { %v2406_v54 = vpop.permute.xlu1 %2405 }
0x19c4   :  { %v2408_v58 = vadd.f32 %v2406_v54, %v2402_v50 }
0x19c6   :  { %5018 = vtanh.f32 %v2408_v58 }
0x19d3   :  { %v5019_v19 = vpop.eup %5018 }
0x19d4   :  { %v6283_v61 = vmul.f32 %v5019_v19, %v5017_v27  ;;  %v6713_v27 = vsel %vm5375_vm1, %v6014_v29, %v6011_v8  ;;  %v2134_v8 = vrot.slane %v6219_v55, %v5698_v32 }
0x19d6   :  { %2452 = vrot.lane.b32.xlu0 %v6283_v61, %s5103_s3  ;;  %v2418_v55 = vrot.slane %v6283_v61, %v5698_v32  ;;  %v2744_v61 = vld [vmem:[%s6688_s7 + $0x30] sm:$0xff] }
0x1a48   :  { %v2453_v30 = vpop.permute.xlu0 %2452 }
0x1a49   :  { %4567 = vmatmul.mubr.msk.f32.vlgmr.msra.gmra.mxu0 %vm204_vm4, %v2453_v30 }
0x1a4a   :  { %4684 = vmatpush3.msra.mxu0 %v2745_v14 }
0x1a4b   :  { %4685 = vmatprep.subr.mxu0 %v2744_v61 }
0x1a4c   :  { %4686 = vmatpush3.msra.mxu0 %v2744_v61 }
0x1a4d   :  { %4687 = vmatprep.subr.mxu0 %v2743_v5 }
0x1a4e   :  { %4688 = vmatpush3.msra.mxu0 %v2743_v5 }
0x1b09   :  { %v2522_v49 = vpop.f32.mrf.mxu0 }
0x1b0a   :  { %v2529_v13 = vadd.f32 %v2527_v6, %v2522_v49 }
0x1b0b   :  { %v2524_v2 = vpop.f32.mrf.mxu0 }
0x1b0c   :  { %v4568_v12 = vmul.f32 -1.442695, %v2529_v13  ;;  %v2530_v15 = vadd.f32 %v2528_v34, %v2524_v2  ;;  %v6714_v13 = vsel %vm5381_vm2, %v6063_v21, %v6051_v25  ;;  %v2142_v25 = vrot.slane %v2134_v8, %v5698_v32 }
0x1b0d   :  { %v1819_v21 = vcombine.high %v1818_v37, %v1818_v37 }
0x1b0e   :  { %5020 = vpow2.f32 %v4568_v12  ;;  %v4569_v47 = vmul.f32 -1.442695, %v2530_v15 }
0x1b0f   :  { %5022 = vtanh.f32 %v2530_v15  ;;  %v1833_v4 = vrot.slane %v1819_v21, %v5698_v32  ;;  %v2926_v21 = vld [vmem:[%s6690_s9 + $0x10] sm:$0xff] }
0x1b1b   :  { %v5021_v53 = vpop.eup %5020 }
0x1b1c   :  { %v2537_v16 = vadd.f32 1.0, %v5021_v53  ;;  %v5023_v17 = vpop.eup %5022 }
0x1b1e   :  { %5024 = vrcp.f32 %v2537_v16 }
0x1b1f   :  { %5026 = vpow2.f32 %v4569_v47  ;;  %v1841_v47 = vrot.slane %v1833_v4, %v5364_v26  ;;  %v2924_v4 = vld [vmem:[%s6690_s9] sm:$0xff] }
0x1b2b   :  { %v5025_v38 = vpop.eup %5024 }
0x1b2c   :  { %v2545_v40 = vmul.f32 %v5025_v38, %v5023_v17  ;;  %v5027_v28 = vpop.eup %5026  ;;  %v2544_v36 = vmul.f32 %v5025_v38, %v2408_v58  ;;  %v1826_v17 = vrot.slane %v1818_v37, %v5698_v32  ;;  %v2153_v38 = vrot.slane %v2142_v25, %v5364_v26  ;;  %v2927_v25 = vld [vmem:[%s6690_s9 + $0x18] sm:$0xff] }
0x1b2d   :  { %v2538_v6 = vadd.f32 1.0, %v5027_v28 }
0x1b2e   :  { %2547 = vrot.lane.b32.xlu1 %v2545_v40, %s5103_s3  ;;  %v1837_v39 = vrot.slane %v1826_v17, %v5364_v26  ;;  %v2135_v40 = vcombine.high %v2134_v8, %v2134_v8  ;;  %v2929_v17 = vld [vmem:[%s6690_s9 + $0x28] sm:$0xff] }
0x1b2f   :  { %5028 = vrcp.f32 %v2538_v6 }
0x1b30   :  { %v2149_v28 = vrot.slane %v2135_v40, %v5698_v32  ;;  %v4576_v40 = vld [vmem:[%s6692_s11] ss:$0 sm:$0xff]  ;;  %s5108_s11 = smov 80  }
0x1b32   :  { %v2157_v6 = vrot.slane %v2149_v28, %v5364_v26 }
0x1b3c   :  { %v5029_v57 = vpop.eup %5028 }
0x1ba0   :  { %v2548_v20 = vpop.permute.xlu1 %2547 }
0x1ba1   :  { %v6299_v63 = vadd.f32 %v2548_v20, %v2544_v36  ;;  %v2426_v36 = vrot.slane %v2418_v55, %v5698_v32  ;;  %v2419_v20 = vcombine.high %v2418_v55, %v2418_v55 }
0x1ba3   :  { %5030 = vtanh.f32 %v6299_v63  ;;  %v2433_v11 = vrot.slane %v2419_v20, %v5698_v32 }
0x1bb0   :  { %v5031_v34 = vpop.eup %5030 }
0x1bb1   :  { %v2552_v45 = vmul.f32 %v5031_v34, %v5029_v57  ;;  %v2841_v57 = vld [vmem:[%s6689_s8 + $0x38] sm:$0xff]  ;;  %v2840_v34 = vld [vmem:[%s6689_s8 + $0x30] sm:$0xff] }
0x1bb2   :  { %4702 = vmatprep.subr.mxu1 %v2841_v57 }
0x1bb3   :  { %2594 = vrot.lane.b32.xlu0 %v2552_v45, %s5103_s3  ;;  %v2560_v43 = vrot.slane %v2552_v45, %v5698_v32  ;;  %v2437_v45 = vrot.slane %v2426_v36, %v5364_v26 }
0x1bb5   :  { %v2568_v51 = vrot.slane %v2560_v43, %v5698_v32  ;;  %v2561_v48 = vcombine.high %v2560_v43, %v2560_v43 }
0x1bb7   :  { %1686 = vrot.lane.b32.xlu0 %v1681_v24, %s5103_s3  ;;  %v2579_v56 = vrot.slane %v2568_v51, %v5364_v26  ;;  %v2575_v1 = vrot.slane %v2561_v48, %v5698_v32  ;;  %v2441_v24 = vrot.slane %v2433_v11, %v5364_v26  ;;  %v2742_v51 = vld [vmem:[%s6688_s7 + $0x20] sm:$0xff] }
0x1bb8   :  { %4689 = vmatprep.subr.mxu0 %v2742_v51 }
0x1bb9   :  { %v2583_v31 = vrot.slane %v2575_v1, %v5364_v26  ;;  %4690 = vmatpush3.msra.mxu0 %v2742_v51 }
0x1bba   :  { %4691 = vmatprep.subr.mxu0 %v2741_v59 }
0x1bbb   :  { %2000 = vrot.lane.b32.xlu0 %v1995_v3, %s5103_s3  ;;  %4692 = vmatpush3.msra.mxu0 %v2741_v59 }
0x1bbf   :  { %1688 = vrot.lane.b32.xlu0 %v1685_v44, %s5103_s3 }
0x1bc3   :  { %2002 = vrot.lane.b32.xlu0 %v1999_v22, %s5103_s3 }
0x1bc7   :  { %2300 = vrot.lane.b32.xlu0 %v2295_v52, %s5103_s3  ;;  %v2839_v52 = vld [vmem:[%s6689_s8 + $0x28] sm:$0xff] }
0x1bcb   :  { %2584 = vrot.lane.b32.xlu0 %v2579_v56, %s5103_s3 }
0x1bcf   :  { %2302 = vrot.lane.b32.xlu0 %v2299_v0, %s5103_s3 }
0x1bd3   :  { %2586 = vrot.lane.b32.xlu0 %v2583_v31, %s5103_s3  ;;  %v2837_v31 = vld [vmem:[%s6689_s8 + $0x18] sm:$0xff] }
0x1c25   :  { %v2595_v41 = vpop.permute.xlu0 %2594 }
0x1c26   :  { %4570 = vmatmul.mubr.msk.f32.vlgmr.msra.gmra.mxu1 %vm204_vm4, %v2595_v41  ;;  %v2740_v41 = vld [vmem:[%s6688_s7 + $0x10] sm:$0xff] }
0x1c27   :  { %4703 = vmatpush3.msra.mxu1 %v2841_v57  ;;  %4693 = vmatprep.subr.mxu0 %v2740_v41 }
0x1c28   :  { %4704 = vmatprep.subr.mxu1 %v2840_v34  ;;  %4694 = vmatpush3.msra.mxu0 %v2740_v41 }
0x1c29   :  { %v1687_v62 = vpop.permute.xlu0 %1686  ;;  %4705 = vmatpush3.msra.mxu1 %v2840_v34 }
0x1c2a   :  { %1692 = vst.msk [vmem:[#allocation3] sm:$0x1] %vm365_vm5, %v1687_v62  ;;  %4706 = vmatprep.subr.mxu1 %v2839_v52 }
0x1c2b   :  { %1694 = vst.msk [vmem:[#allocation3 + $0x7] sm:$0x1] %vm368_vm6, %v1687_v62  ;;  %4707 = vmatpush3.msra.mxu1 %v2839_v52  ;;  %v2836_v62 = vld [vmem:[%s6689_s8 + $0x10] sm:$0xff] }
0x1c2c   :  { %4708 = vmatprep.subr.mxu1 %v2838_v23 }
0x1c2d   :  { %v2001_v42 = vpop.permute.xlu0 %2000  ;;  %4709 = vmatpush3.msra.mxu1 %v2838_v23 }
0x1c2e   :  { %2006 = vst.msk [vmem:[#allocation3 + $0x2] sm:$0x1] %vm365_vm5, %v2001_v42  ;;  %4710 = vmatprep.subr.mxu1 %v2837_v31 }
0x1c2f   :  { %2008 = vst.msk [vmem:[#allocation3 + $0x5] sm:$0x1] %vm368_vm6, %v2001_v42  ;;  %4711 = vmatpush3.msra.mxu1 %v2837_v31 }
0x1c30   :  { %4712 = vmatprep.subr.mxu1 %v2836_v62 }
0x1c31   :  { %v1689_v50 = vpop.permute.xlu0 %1688  ;;  %4713 = vmatpush3.msra.mxu1 %v2836_v62 }
0x1c32   :  { %1693 = vst.msk [vmem:[#allocation3 + $0x8] sm:$0x1] %vm365_vm5, %v1689_v50 }
0x1c33   :  { %1695 = vst.msk [vmem:[#allocation3 + $0xf] sm:$0x1] %vm368_vm6, %v1689_v50  ;;  %v2739_v50 = vld [vmem:[%s6688_s7 + $0x8] sm:$0xff] }
0x1c34   :  { %4695 = vmatprep.subr.mxu0 %v2739_v50 }
0x1c35   :  { %v2003_v54 = vpop.permute.xlu0 %2002  ;;  %4696 = vmatpush3.msra.mxu0 %v2739_v50 }
0x1c36   :  { %2007 = vst.msk [vmem:[#allocation3 + $0xa] sm:$0x1] %vm365_vm5, %v2003_v54 }
0x1c37   :  { %2009 = vst.msk [vmem:[#allocation3 + $0xd] sm:$0x1] %vm368_vm6, %v2003_v54 }
0x1c39   :  { %v2301_v3 = vpop.permute.xlu0 %2300 }
0x1c3d   :  { %v2585_v44 = vpop.permute.xlu0 %2584 }
0x1c41   :  { %v2303_v22 = vpop.permute.xlu0 %2302 }
0x1c45   :  { %v2587_v56 = vpop.permute.xlu0 %2586 }
0x1ce6   :  { %v2664_v58 = vpop.f32.mrf.mxu1 }
0x1ce7   :  { %v2671_v19 = vadd.f32 %v6713_v27, %v2664_v58  ;;  %v2835_v27 = vld [vmem:[%s6689_s8 + $0x8] sm:$0xff] }
0x1ce8   :  { %v2666_v49 = vpop.f32.mrf.mxu1  ;;  %4714 = vmatprep.subr.mxu1 %v2835_v27 }
0x1ce9   :  { %v4571_v30 = vmul.f32 -1.442695, %v2671_v19  ;;  %v2672_v12 = vadd.f32 %v6714_v13, %v2666_v49  ;;  %v2738_v19 = vld [vmem:[%s6688_s7] sm:$0xff]  ;;  %4715 = vmatpush3.msra.mxu1 %v2835_v27 }
0x1cea   :  { %4697 = vmatprep.subr.mxu0 %v2738_v19 }
0x1ceb   :  { %5032 = vpow2.f32 %v4571_v30  ;;  %v4572_v60 = vmul.f32 -1.442695, %v2672_v12  ;;  %v2834_v30 = vld [vmem:[%s6689_s8] sm:$0xff]  ;;  %4698 = vmatpush3.msra.mxu0 %v2738_v19 }
0x1cec   :  { %5034 = vtanh.f32 %v2672_v12  ;;  %v2931_v12 = vld [vmem:[%s6690_s9 + $0x38] sm:$0xff]  ;;  %4716 = vmatprep.subr.mxu1 %v2834_v30 }
0x1ced   :  { %4721 = vmatprep.subr.mxu0 %v2931_v12  ;;  %4717 = vmatpush3.msra.mxu1 %v2834_v30 }
0x1cee   :  { %4750 = vmatprep.subr.mxu1 %v5102_v10 }
0x1cf8   :  { %v5033_v2 = vpop.eup %5032 }
0x1cf9   :  { %v2679_v15 = vadd.f32 1.0, %v5033_v2  ;;  %v5035_v53 = vpop.eup %5034 }
0x1cfb   :  { %5036 = vrcp.f32 %v2679_v15 }
0x1cfc   :  { %5038 = vpow2.f32 %v4572_v60 }
0x1d08   :  { %v5037_v16 = vpop.eup %5036 }
0x1d09   :  { %v2687_v29 = vmul.f32 %v5037_v16, %v5035_v53  ;;  %v5039_v18 = vpop.eup %5038  ;;  %v2686_v7 = vmul.f32 %v5037_v16, %v6299_v63 }
0x1d0a   :  { %v2680_v35 = vadd.f32 1.0, %v5039_v18 }
0x1d0b   :  { %2689 = vrot.lane.b32.xlu1 %v2687_v29, %s5103_s3  ;;  %v2930_v29 = vld [vmem:[%s6690_s9 + $0x30] sm:$0xff] }
0x1d0c   :  { %5040 = vrcp.f32 %v2680_v35 }
0x1d0f   :  { %1842 = vrot.lane.b32.xlu1 %v1837_v39, %s5103_s3  ;;  %v2928_v39 = vld [vmem:[%s6690_s9 + $0x20] sm:$0xff] }
0x1d13   :  { %2158 = vrot.lane.b32.xlu1 %v2153_v38, %s5103_s3  ;;  %v2925_v38 = vld [vmem:[%s6690_s9 + $0x8] sm:$0xff] }
0x1d17   :  { %1844 = vrot.lane.b32.xlu1 %v1841_v47, %s5103_s3 }
0x1d19   :  { %v5041_v48 = vpop.eup %5040 }
0x1d1b   :  { %2160 = vrot.lane.b32.xlu1 %v2157_v6, %s5103_s3  ;;  %v4573_v6 = vld [vmem:[%s6691_s10] ss:$0 sm:$0xff]  ;;  %s5107_s10 = smov 96  }
0x1d1f   :  { %2442 = vrot.lane.b32.xlu1 %v2437_v45, %s5103_s3 }
0x1d23   :  { %2444 = vrot.lane.b32.xlu1 %v2441_v24, %s5103_s3 }
0x1d7d   :  { %v2690_v9 = vpop.permute.xlu1 %2689 }
0x1d7e   :  { %v2692_v46 = vadd.f32 %v2690_v9, %v2686_v7  ;;  %v4579_v9 = vld [vmem:[%s6693_s12] ss:$0 sm:$0xff] }
0x1d80   :  { %5042 = vtanh.f32 %v2692_v46 }
0x1d81   :  { %v1843_v43 = vpop.permute.xlu1 %1842 }
0x1d82   :  { %1848 = vst.msk [vmem:[#allocation3 + $0x1] sm:$0x1] %vm365_vm5, %v1843_v43 }
0x1d83   :  { %1850 = vst.msk [vmem:[#allocation3 + $0x6] sm:$0x1] %vm368_vm6, %v1843_v43  ;;  %2592 = vst.msk [vmem:[#allocation3 + $0x1] sm:$0x1] %vm368_vm6, %v2585_v44 }
0x1d84   :  { %2590 = vst.msk [vmem:[#allocation3 + $0x6] sm:$0x1] %vm365_vm5, %v2585_v44 }
0x1d85   :  { %v2159_v33 = vpop.permute.xlu1 %2158 }
0x1d86   :  { %2164 = vst.msk [vmem:[#allocation3 + $0x3] sm:$0x1] %vm365_vm5, %v2159_v33 }
0x1d87   :  { %2166 = vst.msk [vmem:[#allocation3 + $0x4] sm:$0x1] %vm368_vm6, %v2159_v33  ;;  %2308 = vst.msk [vmem:[#allocation3 + $0x3] sm:$0x1] %vm368_vm6, %v2301_v3 }
0x1d88   :  { %2306 = vst.msk [vmem:[#allocation3 + $0x4] sm:$0x1] %vm365_vm5, %v2301_v3 }
0x1d89   :  { %v1845_v63 = vpop.permute.xlu1 %1844 }
0x1d8a   :  { %1849 = vst.msk [vmem:[#allocation3 + $0x9] sm:$0x1] %vm365_vm5, %v1845_v63 }
0x1d8b   :  { %1851 = vst.msk [vmem:[#allocation3 + $0xe] sm:$0x1] %vm368_vm6, %v1845_v63  ;;  %2593 = vst.msk [vmem:[#allocation3 + $0x9] sm:$0x1] %vm368_vm6, %v2587_v56 }
0x1d8c   :  { %2591 = vst.msk [vmem:[#allocation3 + $0xe] sm:$0x1] %vm365_vm5, %v2587_v56 }
0x1d8d   :  { %v5043_v0 = vpop.eup %5042  ;;  %v2161_v1 = vpop.permute.xlu1 %2160 }
0x1d8e   :  { %2165 = vst.msk [vmem:[#allocation3 + $0xb] sm:$0x1] %vm365_vm5, %v2161_v1  ;;  %v2694_v42 = vmul.f32 %v5043_v0, %v5041_v48 }
0x1d8f   :  { %2167 = vst.msk [vmem:[#allocation3 + $0xc] sm:$0x1] %vm368_vm6, %v2161_v1  ;;  %2309 = vst.msk [vmem:[#allocation3 + $0xb] sm:$0x1] %vm368_vm6, %v2303_v22 }
0x1d90   :  { %2307 = vst.msk [vmem:[#allocation3 + $0xc] sm:$0x1] %vm365_vm5, %v2303_v22  ;;  %v2702_v54 = vrot.slane %v2694_v42, %v5698_v32 }
0x1d91   :  { %v2443_v58 = vpop.permute.xlu1 %2442 }
0x1d92   :  { %2448 = vst.msk [vmem:[#allocation3 + $0x5] sm:$0x1] %vm365_vm5, %v2443_v58  ;;  %v2710_v49 = vrot.slane %v2702_v54, %v5698_v32  ;;  %v2703_v13 = vcombine.high %v2702_v54, %v2702_v54 }
0x1d93   :  { %2450 = vst.msk [vmem:[#allocation3 + $0x2] sm:$0x1] %vm368_vm6, %v2443_v58 }
0x1d94   :  { %v2721_v2 = vrot.slane %v2710_v49, %v5364_v26  ;;  %v2717_v15 = vrot.slane %v2703_v13, %v5698_v32 }
0x1d95   :  { %v2445_v37 = vpop.permute.xlu1 %2444 }
0x1d96   :  { %2449 = vst.msk [vmem:[#allocation3 + $0xd] sm:$0x1] %vm365_vm5, %v2445_v37  ;;  %2726 = vrot.lane.b32.xlu1 %v2721_v2, %s5103_s3  ;;  %v2725_v53 = vrot.slane %v2717_v15, %v5364_v26 }
0x1d97   :  { %2451 = vst.msk [vmem:[#allocation3 + $0xa] sm:$0x1] %vm368_vm6, %v2445_v37 }
0x1d9a   :  { %2728 = vrot.lane.b32.xlu1 %v2725_v53, %s5103_s3 }
0x1e08   :  { %v2727_v16 = vpop.permute.xlu1 %2726 }
0x1e09   :  { %2732 = vst.msk [vmem:[#allocation3 + $0x7] sm:$0x1] %vm365_vm5, %v2727_v16 }
0x1e0a   :  { %2734 = vst.msk [vmem:[#allocation3] sm:$0x1] %vm368_vm6, %v2727_v16 }
0x1e0c   :  { %v2729_v32 = vpop.permute.xlu1 %2728 }
0x1e0d   :  { %2733 = vst.msk [vmem:[#allocation3 + $0xf] sm:$0x1] %vm365_vm5, %v2729_v32 }
0x1e0e   :  { %2735 = vst.msk [vmem:[#allocation3 + $0x8] sm:$0x1] %vm368_vm6, %v2729_v32 }
0x1e11   :  { %v6462_v8 = vld [vmem:[#allocation3] sm:$0xff] }
0x1e12   :  { %4699 = vmatprep.mubr.msk.f32.mxu0 %vm204_vm4, %v6462_v8  ;;  %4718 = vmatprep.mubr.msk.f32.mxu1 %vm204_vm4, %v6462_v8 }
0x1e15   :  { %v6468_v26 = vld [vmem:[#allocation3 + $0x8] sm:$0xff] }
0x1e16   :  { %4700 = vmatmul.mubr.msk.f32.vlgmr.msra.gmra.mxu0 %vm204_vm4, %v6468_v26  ;;  %4719 = vmatmul.mubr.msk.f32.vlgmr.msra.gmra.mxu1 %vm204_vm4, %v6468_v26 }
0x1e17   :  { %4722 = vmatpush3.msra.mxu0 %v2931_v12  ;;  %4737 = vmatprep.mubr.msk.f32.mxu0 %vm204_vm4, %v6462_v8 }
0x1e18   :  { %4723 = vmatprep.subr.mxu0 %v2930_v29  ;;  %4752 = vmatprep.mubr.msk.f32.mxu1 %vm5105_vm7, %v5102_v10 }
0x1e19   :  { %4724 = vmatpush3.msra.mxu0 %v2930_v29 }
0x1e1a   :  { %4725 = vmatprep.subr.mxu0 %v2929_v17 }
0x1e1b   :  { %4726 = vmatpush3.msra.mxu0 %v2929_v17 }
0x1e1c   :  { %4727 = vmatprep.subr.mxu0 %v2928_v39 }
0x1e1d   :  { %4728 = vmatpush3.msra.mxu0 %v2928_v39 }
0x1e1e   :  { %4729 = vmatprep.subr.mxu0 %v2927_v25 }
0x1e1f   :  { %4730 = vmatpush3.msra.mxu0 %v2927_v25 }
0x1e20   :  { %4731 = vmatprep.subr.mxu0 %v2926_v21 }
0x1e21   :  { %4732 = vmatpush3.msra.mxu0 %v2926_v21 }
0x1e22   :  { %4733 = vmatprep.subr.mxu0 %v2925_v38 }
0x1e23   :  { %4734 = vmatpush3.msra.mxu0 %v2925_v38 }
0x1e24   :  { %4735 = vmatprep.subr.mxu0 %v2924_v4 }
0x1e25   :  { %4736 = vmatpush3.msra.mxu0 %v2924_v4 }
0x1e26   :  { %4738 = vmatmul.mubr.msk.f32.vlgmr.msra.gmra.mxu0 %vm204_vm4, %v6468_v26  ;;  %4740 = vmatprep.subr.mxu0 %v5102_v10 }
0x1e27   :  { %4742 = vmatprep.mubr.msk.f32.mxu0 %vm5105_vm7, %v5102_v10 }
0x1ed6   :  { %v4701_v55 = vpop.f32.mrf.mxu0  ;;  %v4720_v47 = vpop.f32.mrf.mxu1 }
0x1ed7   :  { %v2921_v28 = vadd.f32 %v4720_v47, %v4576_v40  ;;  %v2831_v57 = vadd.f32 %v4701_v55, %v4573_v6 }
0x1ed8   :  { %v2915_v36 = vpop.f32.mrf.mxu1  ;;  %v2825_v20 = vpop.f32.mrf.mxu0 }
0x1ed9   :  { %v2916_v14 = vadd.f32 %v4576_v40, %v2915_v36  ;;  %3032 = vrot.lane.b32.xlu1 %v2921_v28, %s5106_s1  ;;  %v2826_v61 = vadd.f32 %v4573_v6, %v2825_v20 }
0x1edb   :  { %3030 = vrot.lane.b32.xlu0 %v2916_v14, %s5106_s1  ;;  %4741 = vmatpush3.xpose.msk.msra.mxu0 %vm91_vm0, %v2916_v14 }
0x1edc   :  { %4745 = vmatprep.subr.mxu0 %v5102_v10 }
0x1edd   :  { %3018 = vrot.lane.b32.xlu1 %v2831_v57, %s5106_s1 }
0x1ede   :  { %4743 = vmatmul.mubr.msk.f32.vlgmr.msra.gmra.mxu0 %vm91_vm0, %v2826_v61 }
0x1edf   :  { %3016 = vrot.lane.b32.xlu0 %v2826_v61, %s5106_s1  ;;  %4746 = vmatpush3.xpose.msk.msra.mxu0 %vm91_vm0, %v2921_v28 }
0x1ee0   :  { %4747 = vmatprep.mubr.msk.f32.mxu0 %vm5105_vm7, %v5102_v10  ;;  %4755 = vmatprep.subr.mxu0 %v5102_v10 }
0x1ee1   :  { %3036 = vrot.lane.b32.xlu1 %v2921_v28, %s5107_s10 }
0x1ee2   :  { %4748 = vmatmul.mubr.msk.f32.vlgmr.msra.gmra.mxu0 %vm91_vm0, %v2831_v57 }
0x1ee3   :  { %3034 = vrot.lane.b32.xlu0 %v2916_v14, %s5107_s10  ;;  %4757 = vmatprep.mubr.msk.f32.mxu0 %vm5105_vm7, %v5102_v10 }
0x1ee5   :  { %3022 = vrot.lane.b32.xlu1 %v2831_v57, %s5107_s10 }
0x1ee6   :  { %v4739_v35 = vpop.f32.mrf.mxu0 }
0x1ee7   :  { %3020 = vrot.lane.b32.xlu0 %v2826_v61, %s5107_s10  ;;  %v6558_v43 = vadd.f32 %v4739_v35, %v4579_v9 }
0x1ee8   :  { %v3005_v46 = vpop.f32.mrf.mxu0 }
0x1ee9   :  { %3040 = vrot.lane.b32.xlu1 %v2921_v28, %s5108_s11  ;;  %v6562_v33 = vadd.f32 %v4579_v9, %v3005_v46 }
0x1eeb   :  { %3038 = vrot.lane.b32.xlu0 %v2916_v14, %s5108_s11 }
0x1eed   :  { %3026 = vrot.lane.b32.xlu1 %v2831_v57, %s5108_s11 }
0x1eef   :  { %3024 = vrot.lane.b32.xlu0 %v2826_v61, %s5108_s11 }
0x1f4b   :  { %v3033_v34 = vpop.permute.xlu1 %3032 }
0x1f4c   :  { %4756 = vmatpush3.xpose.msk.msra.mxu0 %vm91_vm0, %v3033_v34 }
0x1f4d   :  { %v3031_v5 = vpop.permute.xlu0 %3030  ;;  %4765 = vmatprep.subr.mxu0 %v5102_v10 }
0x1f4e   :  { %4751 = vmatpush3.xpose.msk.msra.mxu1 %vm91_vm0, %v3031_v5 }
0x1f4f   :  { %v3019_v45 = vpop.permute.xlu1 %3018  ;;  %4760 = vmatprep.subr.mxu1 %v5102_v10 }
0x1f50   :  { %4758 = vmatmul.mubr.msk.f32.vlgmr.msra.gmra.mxu0 %vm91_vm0, %v3019_v45 }
0x1f51   :  { %v3017_v11 = vpop.permute.xlu0 %3016  ;;  %4767 = vmatprep.mubr.msk.f32.mxu0 %vm5105_vm7, %v5102_v10 }
0x1f52   :  { %4753 = vmatmul.mubr.msk.f32.vlgmr.msra.gmra.mxu1 %vm91_vm0, %v3017_v11 }
0x1f53   :  { %v3037_v24 = vpop.permute.xlu1 %3036  ;;  %4762 = vmatprep.mubr.msk.f32.mxu1 %vm5105_vm7, %v5102_v10 }
0x1f54   :  { %4766 = vmatpush3.xpose.msk.msra.mxu0 %vm91_vm0, %v3037_v24 }
0x1f55   :  { %v3035_v60 = vpop.permute.xlu0 %3034  ;;  %4775 = vmatprep.subr.mxu0 %v5102_v10 }
0x1f56   :  { %4761 = vmatpush3.xpose.msk.msra.mxu1 %vm91_vm0, %v3035_v60 }
0x1f57   :  { %v3023_v18 = vpop.permute.xlu1 %3022  ;;  %4770 = vmatprep.subr.mxu1 %v5102_v10 }
0x1f58   :  { %4768 = vmatmul.mubr.msk.f32.vlgmr.msra.gmra.mxu0 %vm91_vm0, %v3023_v18 }
0x1f59   :  { %v3021_v3 = vpop.permute.xlu0 %3020  ;;  %4777 = vmatprep.mubr.msk.f32.mxu0 %vm5105_vm7, %v5102_v10 }
0x1f5a   :  { %4763 = vmatmul.mubr.msk.f32.vlgmr.msra.gmra.mxu1 %vm91_vm0, %v3021_v3 }
0x1f5b   :  { %v3041_v7 = vpop.permute.xlu1 %3040  ;;  %4772 = vmatprep.mubr.msk.f32.mxu1 %vm5105_vm7, %v5102_v10 }
0x1f5c   :  { %4776 = vmatpush3.xpose.msk.msra.mxu0 %vm91_vm0, %v3041_v7 }
0x1f5d   :  { %v3039_v44 = vpop.permute.xlu0 %3038  ;;  %4785 = vmatprep.subr.mxu0 %v5102_v10 }
0x1f5e   :  { %4771 = vmatpush3.xpose.msk.msra.mxu1 %vm91_vm0, %v3039_v44 }
0x1f5f   :  { %v3027_v22 = vpop.permute.xlu1 %3026  ;;  %4780 = vmatprep.subr.mxu1 %v5102_v10 }
0x1f60   :  { %4778 = vmatmul.mubr.msk.f32.vlgmr.msra.gmra.mxu0 %vm91_vm0, %v3027_v22 }
0x1f61   :  { %4786 = vmatpush3.msra.mxu0 %v6558_v43  ;;  %v3025_v63 = vpop.permute.xlu0 %3024  ;;  %4787 = vmatprep.mubr.msk.f32.mxu0 %vm5105_vm7, %v5102_v10 }
0x1f62   :  { %4773 = vmatmul.mubr.msk.f32.vlgmr.msra.gmra.mxu1 %vm91_vm0, %v3025_v63  ;;  %4795 = vmatprep.subr.mxu0 %v5102_v10 }
0x1f63   :  { %4781 = vmatpush3.msra.mxu1 %v6562_v33  ;;  %4782 = vmatprep.mubr.msk.f32.mxu1 %vm5105_vm7, %v5102_v10 }
0x1f64   :  { %4790 = vmatprep.subr.mxu1 %v5102_v10 }
0x1f9e   :  { %v3132_v52 = vpop.f32.mrf.mxu0 }
0x1f9f   :  { %v3655_v51 = vsel %vm3654_vm8, %v3132_v52, -inf }
0x1fa0   :  { %3656 = vmax.xlane.f32.xlu0 %v3655_v51  ;;  %v4744_v23 = vpop.f32.mrf.mxu0 }
0x1fa2   :  { %v3206_v56 = vpop.f32.mrf.mxu0 }
0x1fa3   :  { %v3658_v59 = vsel %vm3654_vm8, %v3206_v56, -inf }
0x1fa4   :  { %3659 = vmax.xlane.f32.xlu1 %v3658_v59  ;;  %v4749_v48 = vpop.f32.mrf.mxu0 }
0x2010   :  { %v3354_v0 = vpop.f32.mrf.mxu0 }
0x2011   :  { %v3664_v42 = vsel %vm3654_vm8, %v3354_v0, -inf }
0x2012   :  { %v3280_v1 = vpop.f32.mrf.mxu1  ;;  %v4759_v31 = vpop.f32.mrf.mxu0 }
0x2013   :  { %v3661_v41 = vsel %vm3654_vm8, %v3280_v1, -inf }
0x2014   :  { %v4754_v62 = vpop.f32.mrf.mxu1  ;;  %3662 = vmax.xlane.f32.xlu0 %v3661_v41 }
0x2018   :  { %3665 = vmax.xlane.f32.xlu0 %v3664_v42  ;;  %v3502_v50 = vpop.f32.mrf.mxu0 }
0x2019   :  { %v3670_v19 = vsel %vm3654_vm8, %v3502_v50, -inf }
0x201a   :  { %v3428_v54 = vpop.f32.mrf.mxu1  ;;  %v4769_v58 = vpop.f32.mrf.mxu0 }
0x201b   :  { %v3667_v27 = vsel %vm3654_vm8, %v3428_v54, -inf }
0x201c   :  { %v4764_v30 = vpop.f32.mrf.mxu1  ;;  %3668 = vmax.xlane.f32.xlu1 %v3667_v27  ;;  %3671 = vmax.xlane.f32.xlu0 %v3670_v19 }
0x2020   :  { %v3650_v49 = vpop.f32.mrf.mxu0 }
0x2021   :  { %v3676_v13 = vsel %vm3654_vm8, %v3650_v49, -inf }
0x2022   :  { %v3576_v12 = vpop.f32.mrf.mxu1  ;;  %3677 = vmax.xlane.f32.xlu0 %v3676_v13  ;;  %v4779_v2 = vpop.f32.mrf.mxu0 }
0x2023   :  { %v3673_v15 = vsel %vm3654_vm8, %v3576_v12, -inf }
0x2024   :  { %v4774_v37 = vpop.f32.mrf.mxu1  ;;  %3674 = vmax.xlane.f32.xlu1 %v3673_v15 }
0x2029   :  { %v3657_v29 = vpop.xlane.xlu0 %3656 }
0x202a   :  { %v3679_v17 = vsub.f32 %v3132_v52, %v3657_v29 }
0x202c   :  { %v3687_v39 = vmul.f32 1.442695, %v3679_v17 }
0x202d   :  { %v3660_v53 = vpop.xlane.xlu1 %3659 }
0x202e   :  { %v3680_v16 = vsub.f32 %v3206_v56, %v3660_v53 }
0x2030   :  { %v3689_v32 = vmul.f32 1.442695, %v3680_v16 }
0x2032   :  { %5044 = vpow2.f32 %v3689_v32 }
0x2033   :  { %5046 = vpow2.f32 %v3687_v39 }
0x2035   :  { %3044 = vrot.lane.b32.xlu1 %v6562_v33, %s5106_s1 }
0x2038   :  { %3046 = vrot.lane.b32.xlu0 %v6558_v43, %s5106_s1 }
0x2039   :  { %3050 = vrot.lane.b32.xlu1 %v6562_v33, %s5107_s10 }
0x203d   :  { %3052 = vrot.lane.b32.xlu1 %v6558_v43, %s5107_s10 }
0x203f   :  { %v5045_v25 = vpop.eup %5044 }
0x2040   :  { %v3706_v21 = vsel %vm3654_vm8, %v5045_v25, 0.0  ;;  %v5047_v38 = vpop.eup %5046 }
0x2041   :  { %v3703_v4 = vsel %vm3654_vm8, %v5047_v38, 0.0 }
0x2057   :  { %3707 = vadd.xlane.f32.xlu0 %v3706_v21 }
0x2061   :  { %3704 = vadd.xlane.f32.xlu1 %v3703_v4 }
0x209d   :  { %v3663_v40 = vpop.xlane.xlu0 %3662 }
0x209e   :  { %v3681_v55 = vsub.f32 %v3280_v1, %v3663_v40 }
0x20a0   :  { %v3691_v47 = vmul.f32 1.442695, %v3681_v55 }
0x20a1   :  { %v3666_v28 = vpop.xlane.xlu0 %3665 }
0x20a2   :  { %5048 = vpow2.f32 %v3691_v47  ;;  %v3682_v6 = vsub.f32 %v3354_v0, %v3666_v28  ;;  %v4366_v28 = vld [vmem:[%s6694_s13 + $0x38] sm:$0xff] }
0x20a4   :  { %v3693_v36 = vmul.f32 1.442695, %v3682_v6  ;;  %v4364_v6 = vld [vmem:[%s6694_s13 + $0x28] sm:$0xff] }
0x20a5   :  { %v3669_v20 = vpop.xlane.xlu1 %3668  ;;  %v3672_v14 = vpop.xlane.xlu0 %3671 }
0x20a6   :  { %5050 = vpow2.f32 %v3693_v36  ;;  %v3683_v57 = vsub.f32 %v3428_v54, %v3669_v20  ;;  %v3684_v61 = vsub.f32 %v3502_v50, %v3672_v14  ;;  %v4363_v36 = vld [vmem:[%s6694_s13 + $0x20] sm:$0xff]  ;;  %v4362_v20 = vld [vmem:[%s6694_s13 + $0x18] sm:$0xff]  ;;  %v4361_v14 = vld [vmem:[%s6694_s13 + $0x10] sm:$0xff] }
0x20a8   :  { %v3695_v34 = vmul.f32 1.442695, %v3683_v57  ;;  %v3697_v5 = vmul.f32 1.442695, %v3684_v61 }
0x20aa   :  { %5052 = vpow2.f32 %v3695_v34  ;;  %v4360_v34 = vld [vmem:[%s6694_s13 + $0x8] sm:$0xff] }
0x20ab   :  { %5054 = vpow2.f32 %v3697_v5  ;;  %v3678_v45 = vpop.xlane.xlu0 %3677 }
0x20ac   :  { %v3686_v11 = vsub.f32 %v3650_v49, %v3678_v45  ;;  %v4359_v45 = vld [vmem:[%s6694_s13] sm:$0xff] }
0x20ad   :  { %v3675_v24 = vpop.xlane.xlu1 %3674 }
0x20ae   :  { %v3701_v60 = vmul.f32 1.442695, %v3686_v11  ;;  %v3685_v18 = vsub.f32 %v3576_v12, %v3675_v24 }
0x20af   :  { %v5049_v3 = vpop.eup %5048  ;;  %v3047_v0 = vpop.permute.xlu0 %3046 }
0x20b0   :  { %5056 = vpow2.f32 %v3701_v60  ;;  %v3699_v35 = vmul.f32 1.442695, %v3685_v18  ;;  %v3709_v7 = vsel %vm3654_vm8, %v5049_v3, 0.0 }
0x20b1   :  { %3710 = vadd.xlane.f32.xlu1 %v3709_v7  ;;  %v3045_v48 = vpop.permute.xlu1 %3044 }
0x20b2   :  { %5058 = vpow2.f32 %v3699_v35 }
0x20b3   :  { %v5051_v9 = vpop.eup %5050 }
0x20b4   :  { %v3712_v44 = vsel %vm3654_vm8, %v5051_v9, 0.0 }
0x20b5   :  { %3713 = vadd.xlane.f32.xlu0 %v3712_v44  ;;  %v3051_v1 = vpop.permute.xlu1 %3050 }
0x20b7   :  { %v5053_v46 = vpop.eup %5052 }
0x20b8   :  { %v5055_v22 = vpop.eup %5054  ;;  %v3715_v63 = vsel %vm3654_vm8, %v5053_v46, 0.0 }
0x20b9   :  { %3716 = vadd.xlane.f32.xlu1 %v3715_v63  ;;  %v3718_v52 = vsel %vm3654_vm8, %v5055_v22, 0.0  ;;  %v3053_v41 = vpop.permute.xlu1 %3052 }
0x20ba   :  { %3719 = vadd.xlane.f32.xlu0 %v3718_v52 }
0x20bd   :  { %v6595_v51 = vpop.eup %5056 }
0x20be   :  { %v3724_v23 = vsel %vm3654_vm8, %v6595_v51, 0.0 }
0x20bf   :  { %v6599_v56 = vpop.eup %5058  ;;  %3725 = vadd.xlane.f32.xlu0 %v3724_v23 }
0x20c0   :  { %v3721_v59 = vsel %vm3654_vm8, %v6599_v56, 0.0 }
0x20c1   :  { %3722 = vadd.xlane.f32.xlu1 %v3721_v59 }
0x20d2   :  { %3058 = vrot.lane.b32.xlu1 %v6558_v43, %s5108_s11 }
0x20d5   :  { %3056 = vrot.lane.b32.xlu0 %v6562_v33, %s5108_s11  ;;  %s5112_s11 = smov [#allocation4]  }
0x20d6   :  { %s4512_s20 = sshll.u32 %s5112_s11, 4  ;;  %s4513_s20 = int_to_ptr.vmem [resolvable:$true] %s4512_s20 }
0x20d7   :  { %p5085_p1 = scmp.lt.s32.totalorder %s4513_s20, %s4513_s20 }
0x20e0   :  { %v3708_v31 = vpop.xlane.xlu0 %3707 }
0x20e1   :  { %5060 = vrcp.f32 %v3708_v31 }
0x20ea   :  { %v3705_v62 = vpop.xlane.xlu1 %3704 }
0x20eb   :  { %5062 = vrcp.f32 %v3705_v62 }
0x20ee   :  { %v5061_v42 = vpop.eup %5060 }
0x20ef   :  { %v3736_v50 = vmul.f32 %v5061_v42, %v5045_v25 }
0x20f1   :  { %4788 = vmatmul.mubr.msk.f32.vlgmr.msra.gmra.mxu0 %vm3654_vm8, %v3736_v50 }
0x20f2   :  { %4796 = vmatpush3.msra.mxu0 %v3047_v0  ;;  %4797 = vmatprep.mubr.msk.f32.mxu0 %vm5105_vm7, %v5102_v10 }
0x20f3   :  { %4805 = vmatprep.subr.mxu0 %v5102_v10 }
0x20f8   :  { %v5063_v43 = vpop.eup %5062 }
0x20f9   :  { %v3735_v33 = vmul.f32 %v5063_v43, %v5047_v38 }
0x20fb   :  { %4783 = vmatmul.mubr.msk.f32.vlgmr.msra.gmra.mxu1 %vm3654_vm8, %v3735_v33 }
0x20fc   :  { %4791 = vmatpush3.msra.mxu1 %v3045_v48  ;;  %4792 = vmatprep.mubr.msk.f32.mxu1 %vm5105_vm7, %v5102_v10 }
0x20fd   :  { %4800 = vmatprep.subr.mxu1 %v5102_v10 }
0x213a   :  { %v3711_v54 = vpop.xlane.xlu1 %3710 }
0x213b   :  { %5064 = vrcp.f32 %v3711_v54 }
0x213e   :  { %v3714_v58 = vpop.xlane.xlu0 %3713 }
0x213f   :  { %5066 = vrcp.f32 %v3714_v58 }
0x2142   :  { %v3717_v27 = vpop.xlane.xlu1 %3716 }
0x2143   :  { %5068 = vrcp.f32 %v3717_v27  ;;  %v3720_v19 = vpop.xlane.xlu0 %3719 }
0x2144   :  { %5070 = vrcp.f32 %v3720_v19 }
0x2148   :  { %v5065_v30 = vpop.eup %5064  ;;  %v3726_v49 = vpop.xlane.xlu0 %3725 }
0x2149   :  { %5072 = vrcp.f32 %v3726_v49  ;;  %v3737_v13 = vmul.f32 %v5065_v30, %v5049_v3 }
0x214a   :  { %v3723_v12 = vpop.xlane.xlu1 %3722 }
0x214b   :  { %5074 = vrcp.f32 %v3723_v12  ;;  %4793 = vmatmul.mubr.msk.f32.vlgmr.msra.gmra.mxu1 %vm3654_vm8, %v3737_v13 }
0x214c   :  { %v5067_v2 = vpop.eup %5066  ;;  %4801 = vmatpush3.msra.mxu1 %v3051_v1  ;;  %4802 = vmatprep.mubr.msk.f32.mxu1 %vm5105_vm7, %v5102_v10  ;;  %v3057_v29 = vpop.permute.xlu0 %3056 }
0x214d   :  { %v3738_v15 = vmul.f32 %v5067_v2, %v5051_v9  ;;  %4810 = vmatprep.subr.mxu1 %v5102_v10 }
0x214e   :  { %v3059_v17 = vpop.permute.xlu1 %3058 }
0x214f   :  { %4798 = vmatmul.mubr.msk.f32.vlgmr.msra.gmra.mxu0 %vm3654_vm8, %v3738_v15 }
0x2150   :  { %v5069_v37 = vpop.eup %5068  ;;  %4806 = vmatpush3.msra.mxu0 %v3053_v41  ;;  %4807 = vmatprep.mubr.msk.f32.mxu0 %vm5105_vm7, %v5102_v10  ;;  %v4606_v41 = vld [vmem:[%s6695_s14] ss:$0 sm:$0xff] }
0x2151   :  { %v5071_v53 = vpop.eup %5070  ;;  %4815 = vmatprep.subr.mxu0 %v5102_v10  ;;  %v3739_v16 = vmul.f32 %v5069_v37, %v5053_v46 }
0x2152   :  { %v3740_v32 = vmul.f32 %v5071_v53, %v5055_v22 }
0x2153   :  { %4803 = vmatmul.mubr.msk.f32.vlgmr.msra.gmra.mxu1 %vm3654_vm8, %v3739_v16 }
0x2154   :  { %4808 = vmatmul.mubr.msk.f32.vlgmr.msra.gmra.mxu0 %vm3654_vm8, %v3740_v32  ;;  %4811 = vmatpush3.msra.mxu1 %v3057_v29 }
0x2155   :  { %4816 = vmatpush3.msra.mxu0 %v3059_v17  ;;  %4817 = vmatprep.mubr.msk.f32.mxu0 %vm5105_vm7, %v5102_v10 }
0x2156   :  { %v5073_v39 = vpop.eup %5072  ;;  %4812 = vmatprep.mubr.msk.f32.mxu1 %vm5105_vm7, %v5102_v10  ;;  %4820 = vmatprep.subr.mxu1 %v4366_v28  ;;  %v4365_v10 = vld [vmem:[%s6694_s13 + $0x30] sm:$0xff] }
0x2157   :  { %v3742_v25 = vmul.f32 %v5073_v39, %v6595_v51 }
0x2158   :  { %v5075_v21 = vpop.eup %5074 }
0x2159   :  { %4818 = vmatmul.mubr.msk.f32.vlgmr.msra.gmra.mxu0 %vm3654_vm8, %v3742_v25  ;;  %v3741_v38 = vmul.f32 %v5075_v21, %v6599_v56 }
0x215b   :  { %4813 = vmatmul.mubr.msk.f32.vlgmr.msra.gmra.mxu1 %vm3654_vm8, %v3741_v38 }
0x215c   :  { %4821 = vmatpush3.msra.mxu1 %v4366_v28 }
0x215d   :  { %4822 = vmatprep.subr.mxu1 %v4365_v10 }
0x215e   :  { %4823 = vmatpush3.msra.mxu1 %v4365_v10 }
0x215f   :  { %4824 = vmatprep.subr.mxu1 %v4364_v6 }
0x2160   :  { %4825 = vmatpush3.msra.mxu1 %v4364_v6 }
0x2161   :  { %4826 = vmatprep.subr.mxu1 %v4363_v36 }
0x2162   :  { %4827 = vmatpush3.msra.mxu1 %v4363_v36 }
0x2163   :  { %4828 = vmatprep.subr.mxu1 %v4362_v20 }
0x2164   :  { %4829 = vmatpush3.msra.mxu1 %v4362_v20 }
0x2165   :  { %4830 = vmatprep.subr.mxu1 %v4361_v14 }
0x2166   :  { %4831 = vmatpush3.msra.mxu1 %v4361_v14 }
0x2167   :  { %4832 = vmatprep.subr.mxu1 %v4360_v34 }
0x2168   :  { %4833 = vmatpush3.msra.mxu1 %v4360_v34 }
0x2169   :  { %4834 = vmatprep.subr.mxu1 %v4359_v45 }
0x216a   :  { %4835 = vmatpush3.msra.mxu1 %v4359_v45 }
0x21b1   :  { %v3885_v4 = vpop.f32.mrf.mxu0 }
0x21b3   :  { %v4789_v40 = vpop.f32.mrf.mxu0 }
0x21b4   :  { %v4609_v40 = vld [vmem:[%s6696_s15] ss:$0 sm:$0xff]  ;;  %s5080_s15 = scalar_lea.vmem %s4513_s20, 256 }
0x21b5   :  { %p5081_p0 = scmp.ne.s32.totalorder %s4513_s20, %s5080_s15  ;;  %p5086_p2 = scmp.lt.s32.totalorder %s5080_s15, %s5080_s15 }
0x21b7   :  { %p5087_p3 = por %p5086_p2, %p5085_p1 }
0x21b9   :  { %p5088_p4 = pnand %p5087_p3, %p5081_p0 }
0x21bb   :  { %v3812_v55 = vpop.f32.mrf.mxu1 }
0x21bd   :  { %v4784_v47 = vpop.f32.mrf.mxu1 }
0x21be   :  { %v4610_v47 = vld [vmem:[%s6697_s16] ss:$0 sm:$0xff] }
0x220b   :  { %v3958_v57 = vpop.f32.mrf.mxu1 }
0x220c   :  { %4329 = vrot.lane.b32.xlu0 %v3958_v57, %s5109_s28 }
0x220d   :  { %v4794_v61 = vpop.f32.mrf.mxu1 }
0x220f   :  { %v4031_v5 = vpop.f32.mrf.mxu0 }
0x2210   :  { %4331 = vrot.lane.b32.xlu1 %v4031_v5, %s5109_s28 }
0x2211   :  { %v4799_v11 = vpop.f32.mrf.mxu0 }
0x2213   :  { %v4104_v24 = vpop.f32.mrf.mxu1 }
0x2214   :  { %v4177_v60 = vpop.f32.mrf.mxu0  ;;  %4337 = vrot.lane.b32.xlu0 %v4104_v24, %s5110_s26 }
0x2215   :  { %4339 = vrot.lane.b32.xlu1 %v4177_v60, %s5110_s26  ;;  %v4804_v18 = vpop.f32.mrf.mxu1 }
0x2216   :  { %v4809_v3 = vpop.f32.mrf.mxu0 }
0x2219   :  { %v4323_v35 = vpop.f32.mrf.mxu0 }
0x221a   :  { %4347 = vrot.lane.b32.xlu1 %v4323_v35, %s5111_s18 }
0x221b   :  { %v4250_v7 = vpop.f32.mrf.mxu1  ;;  %v4819_v9 = vpop.f32.mrf.mxu0 }
0x221c   :  { %4345 = vrot.lane.b32.xlu0 %v4250_v7, %s5111_s18 }
0x221d   :  { %v4814_v44 = vpop.f32.mrf.mxu1 }
0x227e   :  { %v4330_v22 = vpop.permute.xlu0 %4329 }
0x227f   :  { %v4351_v51 = vsel %vm91_vm0, %v3812_v55, %v4330_v22 }
0x2282   :  { %v4332_v46 = vpop.permute.xlu1 %4331 }
0x2283   :  { %v4352_v56 = vsel %vm91_vm0, %v3885_v4, %v4332_v46 }
0x2286   :  { %v4338_v52 = vpop.permute.xlu0 %4337 }
0x2287   :  { %v4340_v63 = vpop.permute.xlu1 %4339  ;;  %v4354_v59 = vsel %vm4353_vm9, %v4351_v51, %v4338_v52 }
0x2288   :  { %v4355_v0 = vsel %vm4353_vm9, %v4352_v56, %v4340_v63 }
0x228c   :  { %v4348_v23 = vpop.permute.xlu1 %4347 }
0x228d   :  { %v4358_v31 = vsel %vm4356_vm10, %v4355_v0, %v4348_v23 }
0x228e   :  { %v4346_v48 = vpop.permute.xlu0 %4345 }
0x228f   :  { %v4357_v1 = vsel %vm4356_vm10, %v4354_v59, %v4346_v48 }
0x2290   :  { %4836 = vmatprep.mubr.msk.f32.mxu1 %vm204_vm4, %v4357_v1 }
0x2291   :  { %4837 = vmatmul.mubr.msk.f32.vlgmr.msra.gmra.mxu1 %vm204_vm4, %v4358_v31 }
0x2351   :  { %v4838_v62 = vpop.f32.mrf.mxu1 }
0x2352   :  { %v4452_v42 = vadd.f32 %v4838_v62, %v4606_v41 }
0x2353   :  { %v4446_v50 = vpop.f32.mrf.mxu1 }
0x2354   :  { %v4456_v43 = vadd.f32 %v4452_v42, %v6468_v26  ;;  %v4447_v33 = vadd.f32 %v4606_v41, %v4446_v50 }
0x2356   :  { %v4455_v54 = vadd.f32 %v4447_v33, %v6462_v8  ;;  %v4460_v58 = vsel %vm204_vm4, %v4456_v43, 0.0  ;;  %v4466_v49 = vmul.f32 %v4456_v43, %v4456_v43 }
0x2357   :  { %4461 = vadd.xlane.f32.xlu1 %v4460_v58 }
0x2358   :  { %v4457_v27 = vsel %vm204_vm4, %v4455_v54, 0.0  ;;  %v4465_v19 = vmul.f32 %v4455_v54, %v4455_v54  ;;  %v4470_v13 = vsel %vm204_vm4, %v4466_v49, 0.0 }
0x2359   :  { %4458 = vadd.xlane.f32.xlu0 %v4457_v27 }
0x235a   :  { %v4467_v30 = vsel %vm204_vm4, %v4465_v19, 0.0 }
0x235d   :  { %4468 = vadd.xlane.f32.xlu0 %v4467_v30 }
0x2361   :  { %4471 = vadd.xlane.f32.xlu0 %v4470_v13 }
0x23e0   :  { %v4462_v26 = vpop.xlane.xlu1 %4461 }
0x23e1   :  { %v4464_v37 = vmul.f32 0.015625, %v4462_v26 }
0x23e2   :  { %v4459_v12 = vpop.xlane.xlu0 %4458 }
0x23e3   :  { %v4463_v2 = vmul.f32 0.015625, %v4459_v12  ;;  %v4476_v29 = vmul.f32 %v4464_v37, %v4464_v37  ;;  %v4480_v28 = vsub.f32 %v4456_v43, %v4464_v37 }
0x23e5   :  { %v4475_v8 = vmul.f32 %v4463_v2, %v4463_v2  ;;  %v4479_v38 = vsub.f32 %v4455_v54, %v4463_v2 }
0x23e6   :  { %v4469_v15 = vpop.xlane.xlu0 %4468 }
0x23e7   :  { %v4473_v53 = vmul.f32 0.015625, %v4469_v15 }
0x23e9   :  { %v4477_v16 = vsub.f32 %v4473_v53, %v4475_v8 }
0x23ea   :  { %v4472_v32 = vpop.xlane.xlu0 %4471 }
0x23eb   :  { %v4481_v17 = vadd.f32 1e-05, %v4477_v16  ;;  %v4474_v39 = vmul.f32 0.015625, %v4472_v32 }
0x23ed   :  { %5076 = vrsqrt.f32 %v4481_v17  ;;  %v4478_v25 = vsub.f32 %v4474_v39, %v4476_v29 }
0x23ef   :  { %v4482_v21 = vadd.f32 1e-05, %v4478_v25 }
0x23f1   :  { %5078 = vrsqrt.f32 %v4482_v21 }
0x23fa   :  { %v5077_v4 = vpop.eup %5076 }
0x23fb   :  { %v4485_v55 = vmul.f32 %v5077_v4, %v4479_v38 }
0x23fd   :  { %v4494_v10 = vmul.f32 %v4609_v40, %v4485_v55 }
0x23fe   :  { %v5079_v6 = vpop.eup %5078 }
0x23ff   :  { %v4486_v36 = vmul.f32 %v5079_v6, %v4480_v28  ;;  %v4503_v20 = vadd.f32 %v4610_v47, %v4494_v10 }
0x2401   :  { %v4495_v14 = vmul.f32 %v4609_v40, %v4486_v36  ;;  %4505 = vst.msk [vmem:[#allocation4] sm:$0xff] %vm204_vm4, %v4503_v20 }
0x2403   :  { %v4504_v57 = vadd.f32 %v4610_v47, %v4495_v14 }
0x2405   :  { %4506 = vst.msk [vmem:[#allocation4 + $0x8] sm:$0xff] %vm204_vm4, %v4504_v57 }
0x2406   :  { %5091 = shalt.err (!%p5088_p4)
}
0x2407   :  { %s5113_s16 = smov 128   ;;  %s5114_s21 = smov 8  }
0x2408   :  { %4518 = dma.vmem_to_hbm [thread:$0]  %s4513_s20, 256, %s6698_s17, [#allocation5], %s5113_s16, %s5113_s16, %s5114_s21  }
0x2409   :  { %5100 = dma.done.wait [#allocation5], 256  }
0x240a   :  { %5101 = vsyncadd [#allocation5], 4294967040 }
0x240b   :  { %4522 = vsyncpa [#allocation5], 1 }

</bundles_post_ra>
